<compile_context>
chip_gen: v7x
topology: tpu7x:2x2x1
jax: 0.10.0
libtpu: 0.0.40
codegen_flags: <defaults>
</compile_context>

<pallas_src>
import jax
import jax.numpy as jnp
import numpy as np
from jax.experimental import pallas as pl
from jax.experimental.pallas import tpu as pltpu


def hdot(a, b):
    """Full-f32 matmul (wrapper prep and the f32 reference)."""
    return jnp.dot(a, b, precision=jax.lax.Precision.HIGHEST,
                   preferred_element_type=jnp.float32)


def bdot(a, b):
    """MXU-style matmul: bf16 inputs, f32 accumulation (matches the kernel)."""
    return jnp.dot(a.astype(jnp.bfloat16), b.astype(jnp.bfloat16),
                   preferred_element_type=jnp.float32)


def _antideriv_tanh(y):
    # antiderivative of tanh: log(exp(y) + exp(-y)), numerically stable form
    ay = jnp.abs(y)
    return ay + jnp.log1p(jnp.exp(-2.0 * ay))


# ----------------------------------------------------------------------------
# Pallas kernel: full RK4 integration (nt steps) of the OT-Flow ODE for one
# batch tile, in a batch-on-lanes layout.
# ----------------------------------------------------------------------------
def make_otflow_kernel(d, m, n_layers, alpha0, nt, tspan, tile_n,
                       dtype=jnp.float32):
    L = n_layers
    h_res = 1.0 / (L - 1)
    t_start = float(tspan[0])
    h_t = (float(tspan[1]) - float(tspan[0])) / nt
    neg_inv_a = -1.0 / alpha0
    sign = -1.0 if tspan[0] > tspan[1] else 1.0
    n = tile_n

    def kernel(x_ref, K0c_ref, b0_ref, Kr_ref, KrT_ref, br_ref, w_ref,
               symA_ref, cw_ref, trA_ref, out_ref):
        # ---------------- hoisted, loop-invariant preamble --------------------
        K0ca = K0c_ref[...]                       # (d+1, m, 1)
        K0c = [K0ca[j] for j in range(d + 1)]     # columns of K0, each (m, 1)
        b0c = b0_ref[...]                         # (m, 1)
        wc = w_ref[...]                           # (m, 1)
        KrA = Kr_ref[...]                         # (L-1, m, m)
        KrTA = KrT_ref[...]                       # (L-1, m, m)
        brA = br_ref[...]                         # (L-1, m, 1)
        Krs = [KrA[i].astype(jnp.bfloat16) for i in range(L - 1)]
        KrTs = [KrTA[i].astype(jnp.bfloat16) for i in range(L - 1)]
        brs = [brA[i] for i in range(L - 1)]      # (m, 1)
        # scalar parameters from SMEM (kept in sregs across the whole loop)
        sA = [[symA_ref[a, b] for b in range(d + 1)] for a in range(d + 1)]
        cws = [cw_ref[0, j] for j in range(d + 1)]
        trA = trA_ref[0, 0]
        # sum_{j<d} K0[:, j]^2 -> (m, 1), for the tanh'' part of tr(Hessian)
        kq = K0c[0] * K0c[0]
        for j in range(1, d):
            kq = kq + K0c[j] * K0c[j]

        def mdot(w_bf, a):                        # MXU: bf16 x bf16 -> f32
            return jnp.dot(w_bf, a.astype(jnp.bfloat16),
                           preferred_element_type=jnp.float32)

        # -------- OT potential: gradient rows + Hessian trace -----------------
        def grad_and_trH(xrows, t):
            # xrows: d arrays of shape (1, n); t: scalar time
            opening = K0c[d] * t + b0c                      # (m, 1)
            for j in range(d):
                opening = opening + K0c[j] * xrows[j]       # -> (m, n)
            tanhopen = jnp.tanh(opening)
            u = _antideriv_tanh(opening)                    # (m, n)
            Jlist = [tanhopen * K0c[j] for j in range(d)]   # d x (m, n)

            lins, ths, KJs = [], [], []
            for i in range(L - 1):
                # de-fused MXU matmuls (no concat / slice-out materialization)
                lin = mdot(Krs[i], u) + brs[i]              # (m, n)
                KJ = [mdot(Krs[i], Jlist[j]) for j in range(d)]
                lins.append(lin)
                KJs.append(KJ)
                u = u + h_res * _antideriv_tanh(lin)
                th = jnp.tanh(lin)                          # computed once, reused
                ths.append(th)
                if i < L - 2:
                    Jlist = [Jlist[j] + h_res * th * KJ[j] for j in range(d)]

            # backward pass for grad Phi (reuse th and th*term)
            z = [None] * (L + 1)
            terms = [None] * L
            tzs = [None] * L
            for i in range(L - 1, 0, -1):
                term = wc if i == L - 1 else z[i + 1]
                tz_i = ths[i - 1] * term
                terms[i] = term
                tzs[i] = tz_i
                z[i] = term + h_res * mdot(KrTs[i - 1], tz_i)
            z1 = z[1]                                       # (m, n)

            # gradient rows (d+1 of them), f32 on VPU/XLU
            tz0 = tanhopen * z1                             # (m, n)
            grad_rows = []
            for j in range(d + 1):
                gj = jnp.sum(K0c[j] * tz0, axis=0, keepdims=True)   # (1, n)
                for k in range(d):
                    gj = gj + sA[k][j] * xrows[k]
                grad_rows.append(gj + (sA[d][j] * t + cws[j]))

            # trace of the Hessian (w.r.t. the first d coordinates)
            # (z1 - tanhopen*tz0) == (1 - tanhopen^2) * z1, reusing tz0
            trH = jnp.sum((z1 - tanhopen * tz0) * kq, axis=0, keepdims=True)
            for i in range(1, L):
                coef = terms[i] - ths[i - 1] * tzs[i]       # (1 - th^2) * term
                KJ = KJs[i - 1]
                acc = None
                for j in range(d):
                    c = jnp.sum(coef * KJ[j] * KJ[j], axis=0, keepdims=True)
                    acc = c if acc is None else acc + c
                trH = trH + h_res * acc
            return grad_rows, trH + trA

        # ---------------- ODE right-hand side (packed state slab) -------------
        def odefun(Z, t):
            # Z: (d+3, n) slab; rows 0..d-1 hold the coordinates
            xrows = [Z[j:j + 1, :] for j in range(d)]
            grad_rows, trH = grad_and_trH(xrows, t)
            dx = [neg_inv_a * grad_rows[j] for j in range(d)]
            dl = neg_inv_a * trH
            dv = dx[0] * dx[0]
            for j in range(1, d):
                dv = dv + dx[j] * dx[j]
            dv = 0.5 * dv
            dr = jnp.abs(alpha0 * dv - grad_rows[d])
            return jnp.concatenate(dx + [dl, dv, dr], axis=0)   # (d+3, n)

        # incremental-accumulation RK4 (matches torch step_rk4 exactly;
        # only z0, the running accumulator, and the current stage K stay live)
        def rk4_step(Z, t0):
            tm = t0 + 0.5 * h_t
            z0 = Z
            K = h_t * odefun(z0, t0)
            z = z0 + (1.0 / 6.0) * K
            K = h_t * odefun(z0 + 0.5 * K, tm)
            z = z + (2.0 / 6.0) * K
            K = h_t * odefun(z0 + 0.5 * K, tm)
            z = z + (2.0 / 6.0) * K
            K = h_t * odefun(z0 + K, t0 + h_t)
            z = z + (1.0 / 6.0) * K
            return z

        Z0 = jnp.concatenate([x_ref[...], jnp.zeros((3, n), dtype)], axis=0)

        def body(step, Z):
            t0 = t_start + h_t * step.astype(dtype)
            return rk4_step(Z, t0)

        Z = jax.lax.fori_loop(0, nt, body, Z0)

        # whole-slab, lane-dense store of [x_0..x_{d-1}, l, v, r]
        if sign == 1.0:
            out_ref[...] = Z
        else:
            scale = jnp.concatenate([jnp.ones((d + 1, 1), dtype),
                                     jnp.full((2, 1), sign, dtype)], axis=0)
            out_ref[...] = Z * scale

    return kernel


# ----------------------------------------------------------------------------
# Wrapper: OTFlow.forward(x, nt) -> (x_latent, log_det, transport_cost, hjb)
# ----------------------------------------------------------------------------
def otflow_forward(x, params, *, nt=8, n_layers=2, alpha=(1.0, 1.0, 1.0),
                   tspan=(0.0, 1.0), tile_n=None):
    x = jnp.asarray(x, jnp.float32)
    N, d = x.shape
    m = params["K0"].shape[0]
    L = n_layers

    if tile_n is None:
        # vreg pressure (not VMEM / DMA) limits the tile: cap lanes at 256.
        tile_n = min(256, max(128, pl.next_power_of_2(max(N, 1))))
        nb = pl.cdiv(N, tile_n)
        # v7x: prefer an even block count so both TensorCores get equal work.
        if nb > 1 and nb % 2 == 1 and tile_n > 128:
            tile_n = 128
    n_blocks = pl.cdiv(N, tile_n)
    Npad = n_blocks * tile_n

    xT = x.T                                       # (d, N): batch on lanes
    if Npad != N:
        xT = jnp.pad(xT, ((0, 0), (0, Npad - N)))

    # parameter prep (plain JAX glue, done once; transposes hoisted out of kernel)
    f32 = lambda a: jnp.asarray(a, jnp.float32)
    K0 = f32(params["K0"])                         # (m, d+1)
    symA = hdot(f32(params["A"]).T, f32(params["A"]))     # (d+1, d+1)
    trA = jnp.trace(symA[:d, :d]).reshape(1, 1)
    K0cols = K0.T.reshape(d + 1, m, 1)             # K0cols[j] = K0[:, j] as (m,1)
    b0c = f32(params["b0"]).reshape(m, 1)
    wc = f32(params["w"]).reshape(m, 1)
    cw2 = f32(params["cw"]).reshape(1, d + 1)
    Kr = f32(params["Kr"])                         # (L-1, m, m)
    KrT = jnp.transpose(Kr, (0, 2, 1))
    brc = f32(params["br"]).reshape(L - 1, m, 1)

    kernel = make_otflow_kernel(d, m, L, float(alpha[0]), nt, tspan, tile_n,
                                jnp.float32)

    def vfull(shape):
        nd = len(shape)
        return pl.BlockSpec(shape, lambda i, _nd=nd: (0,) * _nd)

    def sfull(shape):
        nd = len(shape)
        return pl.BlockSpec(shape, lambda i, _nd=nd: (0,) * _nd,
                            memory_space=pltpu.MemorySpace.SMEM)

    out = pl.pallas_call(
        kernel,
        out_shape=jax.ShapeDtypeStruct((d + 3, Npad), jnp.float32),
        grid=(n_blocks,),
        in_specs=[
            pl.BlockSpec((d, tile_n), lambda i: (0, i)),   # x^T tile
            vfull((d + 1, m, 1)),                          # columns of K0
            vfull((m, 1)),                                 # b0
            vfull((L - 1, m, m)),                          # Kr
            vfull((L - 1, m, m)),                          # Kr^T
            vfull((L - 1, m, 1)),                          # br
            vfull((m, 1)),                                 # w
            sfull((d + 1, d + 1)),                         # symA (SMEM scalars)
            sfull((1, d + 1)),                             # cw   (SMEM scalars)
            sfull((1, 1)),                                 # tr(symA[:d,:d])
        ],
        out_specs=pl.BlockSpec((d + 3, tile_n), lambda i: (0, i)),
        compiler_params=pltpu.CompilerParams(dimension_semantics=("parallel",)),
    )(xT, K0cols, b0c, Kr, KrT, brc, wc, symA, cw2, trA)

    out = out[:, :N]
    # unpack(z): (x, l, v, r)
    return out[:d, :].T, out[d, :], out[d + 1, :], out[d + 2, :]


# ----------------------------------------------------------------------------
# Pure-JAX reference mirroring the PyTorch code structure (for verification).
# mxu_bf16=True mimics the kernel's bf16-input / f32-accum MXU matmuls so the
# tight tolerance check is precision-matched; mxu_bf16=False is full f32.
# ----------------------------------------------------------------------------
def ref_forward(x, params, *, nt=8, n_layers=2, alpha=(1.0, 1.0, 1.0),
                tspan=(0.0, 1.0), mxu_bf16=True):
    d = x.shape[1]
    L = n_layers
    h_res = 1.0 / (L - 1)
    alpha0 = alpha[0]
    K0, b0 = params["K0"], params["b0"]
    Kr, br = params["Kr"], params["br"]
    w, cw = params["w"], params["cw"]
    symA = hdot(params["A"].T, params["A"])
    mm = bdot if mxu_bf16 else hdot

    def grad_trH(s):
        opening = hdot(s, K0.T) + b0
        tanhopen = jnp.tanh(opening)
        u = [_antideriv_tanh(opening)]
        lins = []
        for i in range(L - 1):
            lin = mm(u[i], Kr[i].T) + br[i]
            lins.append(lin)
            u.append(u[i] + h_res * _antideriv_tanh(lin))
        z = [None] * (L + 1)
        for i in range(L - 1, 0, -1):
            term = w[None, :] if i == L - 1 else z[i + 1]
            z[i] = term + h_res * mm(jnp.tanh(lins[i - 1]) * term, Kr[i - 1])
        z0 = hdot(tanhopen * z[1], K0)
        grad = z0 + hdot(s, symA) + cw[None, :]
        Kopen = K0[:, :d]
        trH = jnp.sum((1.0 - tanhopen ** 2) * z[1] *
                      jnp.sum(Kopen ** 2, axis=1)[None, :], axis=1)
        Jac = tanhopen[:, :, None] * Kopen[None, :, :]          # (n, m, d)
        for i in range(1, L):
            if mxu_bf16:
                KJ = jnp.einsum("ab,nbj->naj",
                                Kr[i - 1].astype(jnp.bfloat16),
                                Jac.astype(jnp.bfloat16),
                                preferred_element_type=jnp.float32)
            else:
                KJ = jnp.einsum("ab,nbj->naj", Kr[i - 1], Jac,
                                precision=jax.lax.Precision.HIGHEST)
            term = w[None, :] if i == L - 1 else z[i + 1]
            th = jnp.tanh(lins[i - 1])
            t_i = jnp.sum(((1.0 - th ** 2) * term)[:, :, None] * KJ ** 2,
                          axis=(1, 2))
            trH = trH + h_res * t_i
            if i < L - 1:
                Jac = Jac + h_res * th[:, :, None] * KJ
        return grad, trH + jnp.trace(symA[:d, :d])

    def odefun(zf, t):
        nb = zf.shape[0]
        s = jnp.concatenate([zf[:, :d], jnp.full((nb, 1), t, zf.dtype)], axis=1)
        grad, trH = grad_trH(s)
        dx = -(1.0 / alpha0) * grad[:, :d]
        dl = -(1.0 / alpha0) * trH[:, None]
        dv = 0.5 * jnp.sum(dx ** 2, axis=1, keepdims=True)
        dr = jnp.abs(-grad[:, -1:] + alpha0 * dv)
        return jnp.concatenate([dx, dl, dv, dr], axis=1)

    def step(z, t0, t1):
        h = t1 - t0
        z0 = z
        K = h * odefun(z0, t0)
        z = z0 + (1.0 / 6.0) * K
        K = h * odefun(z0 + 0.5 * K, t0 + h / 2.0)
        z = z + (2.0 / 6.0) * K
        K = h * odefun(z0 + 0.5 * K, t0 + h / 2.0)
        z = z + (2.0 / 6.0) * K
        K = h * odefun(z0 + K, t0 + h)
        z = z + (1.0 / 6.0) * K
        return z

    z = jnp.concatenate([x, jnp.zeros((x.shape[0], 3), x.dtype)], axis=1)
    h_t = (tspan[1] - tspan[0]) / nt
    tk = tspan[0]
    for _ in range(nt):
        z = step(z, tk, tk + h_t)
        tk += h_t
    if tspan[0] > tspan[1]:
        z = z.at[:, -2:].multiply(-1.0)
    return z[:, :d], z[:, d], z[:, d + 1], z[:, d + 2]


if __name__ == "__main__":
    # OTFlow(d=2, m=16) — small shapes consistent with the module.
    d, m = 2, 16

    def make_params(key, n_layers, sc=0.25):
        k = jax.random.split(key, 8)
        r_rank = min(10, d + 1)
        p = dict(
            K0=sc * jax.random.normal(k[0], (m, d + 1), jnp.float32),
            b0=sc * jax.random.normal(k[1], (m,), jnp.float32),
            Kr=sc * jax.random.normal(k[2], (n_layers - 1, m, m), jnp.float32),
            br=sc * jax.random.normal(k[3], (n_layers - 1, m), jnp.float32),
            w=sc * jax.random.normal(k[4], (m,), jnp.float32),
            A=sc * jax.random.normal(k[5], (r_rank, d + 1), jnp.float32),
            cw=sc * jax.random.normal(k[6], (d + 1,), jnp.float32),
        )
        return p, k[7]

    # ---- default module config: n_layers=2, nt=8; N=512 -> tile_n=256, 2 blocks
    params, kx = make_params(jax.random.PRNGKey(0), 2)
    x = jax.random.normal(kx, (512, d), jnp.float32)
    outs = otflow_forward(x, params, nt=8, n_layers=2)
    jax.block_until_ready(outs)

    # tight check against a precision-matched reference (bf16-input MXU matmuls)
    ref_m = ref_forward(x, params, nt=8, n_layers=2, mxu_bf16=True)
    for got, want in zip(outs, ref_m):
        np.testing.assert_allclose(np.asarray(got), np.asarray(want),
                                   rtol=2e-3, atol=2e-3)
    # looser sanity check against the full-f32 reference
    ref_hi = ref_forward(x, params, nt=8, n_layers=2, mxu_bf16=False)
    for got, want in zip(outs, ref_hi):
        np.testing.assert_allclose(np.asarray(got), np.asarray(want),
                                   rtol=1e-2, atol=1e-2)

    # ---- exercise the multi-layer ResNet path (n_layers=3)
    params3, kx3 = make_params(jax.random.PRNGKey(1), 3)
    x3 = jax.random.normal(kx3, (128, d), jnp.float32)
    outs3 = otflow_forward(x3, params3, nt=4, n_layers=3)
    jax.block_until_ready(outs3)
    ref3 = ref_forward(x3, params3, nt=4, n_layers=3, mxu_bf16=True)
    for got, want in zip(outs3, ref3):
        np.testing.assert_allclose(np.asarray(got), np.asarray(want),
                                   rtol=5e-3, atol=5e-3)

    print("KERNEL_OK")
</pallas_src>

<mosaic_0001>
module attributes {stable_mosaic.version = 11 : i64} {
  func.func @kernel(%arg0: i32, %arg1: memref<2x256xf32, #tpu.memory_space<vmem>>, %arg2: memref<3x16x1xf32, #tpu.memory_space<vmem>>, %arg3: memref<16x1xf32, #tpu.memory_space<vmem>>, %arg4: memref<1x16x16xf32, #tpu.memory_space<vmem>>, %arg5: memref<1x16x16xf32, #tpu.memory_space<vmem>>, %arg6: memref<1x16x1xf32, #tpu.memory_space<vmem>>, %arg7: memref<16x1xf32, #tpu.memory_space<vmem>>, %arg8: memref<3x3xf32, #tpu.memory_space<smem>>, %arg9: memref<1x3xf32, #tpu.memory_space<smem>>, %arg10: memref<1x1xf32, #tpu.memory_space<smem>>, %arg11: memref<5x256xf32, #tpu.memory_space<vmem>>) attributes {dimension_semantics = [#tpu.dimension_semantics<parallel>], iteration_bounds = array<i64: 2>, scalar_prefetch = 0 : i64, scratch_operands = 0 : i64, tpu.core_type = #tpu.core_type<tc>, window_params = [{transform_indices = @transform_0, window_bounds = array<i64: 2, 256>}, {pipeline_mode = #tpu.pipeline_mode<synchronous>, transform_indices = @transform_1, window_bounds = array<i64: 3, 16, 1>}, {pipeline_mode = #tpu.pipeline_mode<synchronous>, transform_indices = @transform_2, window_bounds = array<i64: 16, 1>}, {pipeline_mode = #tpu.pipeline_mode<synchronous>, transform_indices = @transform_3, window_bounds = array<i64: 1, 16, 16>}, {pipeline_mode = #tpu.pipeline_mode<synchronous>, transform_indices = @transform_4, window_bounds = array<i64: 1, 16, 16>}, {pipeline_mode = #tpu.pipeline_mode<synchronous>, transform_indices = @transform_5, window_bounds = array<i64: 1, 16, 1>}, {pipeline_mode = #tpu.pipeline_mode<synchronous>, transform_indices = @transform_6, window_bounds = array<i64: 16, 1>}, {transform_indices = @transform_7, window_bounds = array<i64: 3, 3>}, {transform_indices = @transform_8, window_bounds = array<i64: 1, 3>}, {transform_indices = @transform_9, window_bounds = array<i64: 1, 1>}, {transform_indices = @transform_10, window_bounds = array<i64: 5, 256>}]} {
    %c0 = arith.constant 0 : index
    %c0_0 = arith.constant 0 : index
    %c0_1 = arith.constant 0 : index
    %0 = vector.load %arg2[%c0, %c0_0, %c0_1] : memref<3x16x1xf32, #tpu.memory_space<vmem>>, vector<3x16x1xf32>
    %1 = vector.extract_strided_slice %0 {offsets = [0, 0, 0], sizes = [1, 16, 1], strides = [1, 1, 1]} : vector<3x16x1xf32> to vector<1x16x1xf32>
    %2 = vector.shape_cast %1 : vector<1x16x1xf32> to vector<16x1xf32>
    %3 = vector.extract_strided_slice %0 {offsets = [1, 0, 0], sizes = [1, 16, 1], strides = [1, 1, 1]} : vector<3x16x1xf32> to vector<1x16x1xf32>
    %4 = vector.shape_cast %3 : vector<1x16x1xf32> to vector<16x1xf32>
    %5 = vector.extract_strided_slice %0 {offsets = [2, 0, 0], sizes = [1, 16, 1], strides = [1, 1, 1]} : vector<3x16x1xf32> to vector<1x16x1xf32>
    %6 = vector.shape_cast %5 : vector<1x16x1xf32> to vector<16x1xf32>
    %c0_2 = arith.constant 0 : index
    %c0_3 = arith.constant 0 : index
    %7 = vector.load %arg3[%c0_2, %c0_3] : memref<16x1xf32, #tpu.memory_space<vmem>>, vector<16x1xf32>
    %c0_4 = arith.constant 0 : index
    %c0_5 = arith.constant 0 : index
    %8 = vector.load %arg7[%c0_4, %c0_5] : memref<16x1xf32, #tpu.memory_space<vmem>>, vector<16x1xf32>
    %c0_6 = arith.constant 0 : index
    %c0_7 = arith.constant 0 : index
    %c0_8 = arith.constant 0 : index
    %9 = vector.load %arg4[%c0_6, %c0_7, %c0_8] : memref<1x16x16xf32, #tpu.memory_space<vmem>>, vector<1x16x16xf32>
    %c0_9 = arith.constant 0 : index
    %c0_10 = arith.constant 0 : index
    %c0_11 = arith.constant 0 : index
    %10 = vector.load %arg5[%c0_9, %c0_10, %c0_11] : memref<1x16x16xf32, #tpu.memory_space<vmem>>, vector<1x16x16xf32>
    %c0_12 = arith.constant 0 : index
    %c0_13 = arith.constant 0 : index
    %c0_14 = arith.constant 0 : index
    %11 = vector.load %arg6[%c0_12, %c0_13, %c0_14] : memref<1x16x1xf32, #tpu.memory_space<vmem>>, vector<1x16x1xf32>
    %12 = vector.shape_cast %9 : vector<1x16x16xf32> to vector<16x16xf32>
    %13 = arith.truncf %12 : vector<16x16xf32> to vector<16x16xbf16>
    %14 = vector.shape_cast %10 : vector<1x16x16xf32> to vector<16x16xf32>
    %15 = arith.truncf %14 : vector<16x16xf32> to vector<16x16xbf16>
    %16 = vector.shape_cast %11 : vector<1x16x1xf32> to vector<16x1xf32>
    %c0_15 = arith.constant 0 : index
    %c0_16 = arith.constant 0 : index
    %17 = memref.load %arg8[%c0_15, %c0_16] : memref<3x3xf32, #tpu.memory_space<smem>>
    %c0_17 = arith.constant 0 : index
    %c1 = arith.constant 1 : index
    %18 = memref.load %arg8[%c0_17, %c1] : memref<3x3xf32, #tpu.memory_space<smem>>
    %c0_18 = arith.constant 0 : index
    %c2 = arith.constant 2 : index
    %19 = memref.load %arg8[%c0_18, %c2] : memref<3x3xf32, #tpu.memory_space<smem>>
    %c1_19 = arith.constant 1 : index
    %c0_20 = arith.constant 0 : index
    %20 = memref.load %arg8[%c1_19, %c0_20] : memref<3x3xf32, #tpu.memory_space<smem>>
    %c1_21 = arith.constant 1 : index
    %c1_22 = arith.constant 1 : index
    %21 = memref.load %arg8[%c1_21, %c1_22] : memref<3x3xf32, #tpu.memory_space<smem>>
    %c1_23 = arith.constant 1 : index
    %c2_24 = arith.constant 2 : index
    %22 = memref.load %arg8[%c1_23, %c2_24] : memref<3x3xf32, #tpu.memory_space<smem>>
    %c2_25 = arith.constant 2 : index
    %c0_26 = arith.constant 0 : index
    %23 = memref.load %arg8[%c2_25, %c0_26] : memref<3x3xf32, #tpu.memory_space<smem>>
    %c2_27 = arith.constant 2 : index
    %c1_28 = arith.constant 1 : index
    %24 = memref.load %arg8[%c2_27, %c1_28] : memref<3x3xf32, #tpu.memory_space<smem>>
    %c2_29 = arith.constant 2 : index
    %c2_30 = arith.constant 2 : index
    %25 = memref.load %arg8[%c2_29, %c2_30] : memref<3x3xf32, #tpu.memory_space<smem>>
    %c0_31 = arith.constant 0 : index
    %c0_32 = arith.constant 0 : index
    %26 = memref.load %arg9[%c0_31, %c0_32] : memref<1x3xf32, #tpu.memory_space<smem>>
    %c0_33 = arith.constant 0 : index
    %c1_34 = arith.constant 1 : index
    %27 = memref.load %arg9[%c0_33, %c1_34] : memref<1x3xf32, #tpu.memory_space<smem>>
    %c0_35 = arith.constant 0 : index
    %c2_36 = arith.constant 2 : index
    %28 = memref.load %arg9[%c0_35, %c2_36] : memref<1x3xf32, #tpu.memory_space<smem>>
    %c0_37 = arith.constant 0 : index
    %c0_38 = arith.constant 0 : index
    %29 = memref.load %arg10[%c0_37, %c0_38] : memref<1x1xf32, #tpu.memory_space<smem>>
    %30 = arith.mulf %2, %2 : vector<16x1xf32>
    %31 = arith.mulf %4, %4 : vector<16x1xf32>
    %32 = arith.addf %30, %31 : vector<16x1xf32>
    %c0_39 = arith.constant 0 : index
    %c0_40 = arith.constant 0 : index
    %33 = vector.load %arg1[%c0_39, %c0_40] : memref<2x256xf32, #tpu.memory_space<vmem>>, vector<2x256xf32>
    %cst = arith.constant 0.000000e+00 : f32
    %34 = vector.broadcast %cst : f32 to vector<3x256xf32>
    %35 = tpu.concatenate %33, %34 in 0 : vector<2x256xf32>, vector<3x256xf32> -> vector<5x256xf32>
    %c0_i32 = arith.constant 0 : i32
    %c8_i32 = arith.constant 8 : i32
    %36 = arith.addi %c0_i32, %c8_i32 : i32
    %c1_i32 = arith.constant 1 : i32
    %37 = scf.for %arg12 = %c0_i32 to %36 step %c1_i32 iter_args(%arg13 = %35) -> (vector<5x256xf32>)  : i32 {
      %39 = arith.sitofp %arg12 : i32 to f32
      %cst_44 = arith.constant 1.250000e-01 : f32
      %40 = arith.mulf %cst_44, %39 : f32
      %cst_45 = arith.constant 0.000000e+00 : f32
      %41 = arith.addf %cst_45, %40 : f32
      %cst_46 = arith.constant 6.250000e-02 : f32
      %42 = arith.addf %41, %cst_46 : f32
      %43 = vector.extract_strided_slice %arg13 {offsets = [0, 0], sizes = [1, 256], strides = [1, 1]} : vector<5x256xf32> to vector<1x256xf32>
      %44 = vector.extract_strided_slice %arg13 {offsets = [1, 0], sizes = [1, 256], strides = [1, 1]} : vector<5x256xf32> to vector<1x256xf32>
      %45 = vector.broadcast %41 : f32 to vector<16x1xf32>
      %46 = arith.mulf %6, %45 : vector<16x1xf32>
      %47 = arith.addf %46, %7 : vector<16x1xf32>
      %48 = vector.broadcast %2 : vector<16x1xf32> to vector<16x256xf32>
      %49 = vector.broadcast %43 : vector<1x256xf32> to vector<16x256xf32>
      %50 = arith.mulf %48, %49 : vector<16x256xf32>
      %51 = vector.broadcast %47 : vector<16x1xf32> to vector<16x256xf32>
      %52 = arith.addf %51, %50 : vector<16x256xf32>
      %53 = vector.broadcast %4 : vector<16x1xf32> to vector<16x256xf32>
      %54 = vector.broadcast %44 : vector<1x256xf32> to vector<16x256xf32>
      %55 = arith.mulf %53, %54 : vector<16x256xf32>
      %56 = arith.addf %52, %55 : vector<16x256xf32>
      %57 = math.tanh %56 : vector<16x256xf32>
      %58 = math.absf %56 : vector<16x256xf32>
      %cst_47 = arith.constant -2.000000e+00 : f32
      %59 = vector.broadcast %cst_47 : f32 to vector<16x256xf32>
      %60 = arith.mulf %59, %58 : vector<16x256xf32>
      %61 = math.exp %60 : vector<16x256xf32>
      %62 = math.log1p %61 : vector<16x256xf32>
      %63 = arith.addf %58, %62 : vector<16x256xf32>
      %64 = vector.broadcast %2 : vector<16x1xf32> to vector<16x256xf32>
      %65 = arith.mulf %57, %64 : vector<16x256xf32>
      %66 = vector.broadcast %4 : vector<16x1xf32> to vector<16x256xf32>
      %67 = arith.mulf %57, %66 : vector<16x256xf32>
      %68 = arith.truncf %63 : vector<16x256xf32> to vector<16x256xbf16>
      %cst_48 = arith.constant dense<0.000000e+00> : vector<16x256xf32>
      %69 = tpu.matmul %13, %68, %cst_48 {dimension_numbers = #tpu.dot_dimension_numbers<[1], [0], [0], [1], [0, 0, 1, 1], [], []>} : vector<16x16xbf16>, vector<16x256xbf16>, vector<16x256xf32> -> vector<16x256xf32>
      %70 = vector.broadcast %16 : vector<16x1xf32> to vector<16x256xf32>
      %71 = arith.addf %69, %70 : vector<16x256xf32>
      %72 = arith.truncf %65 : vector<16x256xf32> to vector<16x256xbf16>
      %cst_49 = arith.constant dense<0.000000e+00> : vector<16x256xf32>
      %73 = tpu.matmul %13, %72, %cst_49 {dimension_numbers = #tpu.dot_dimension_numbers<[1], [0], [0], [1], [0, 0, 1, 1], [], []>} : vector<16x16xbf16>, vector<16x256xbf16>, vector<16x256xf32> -> vector<16x256xf32>
      %74 = arith.truncf %67 : vector<16x256xf32> to vector<16x256xbf16>
      %cst_50 = arith.constant dense<0.000000e+00> : vector<16x256xf32>
      %75 = tpu.matmul %13, %74, %cst_50 {dimension_numbers = #tpu.dot_dimension_numbers<[1], [0], [0], [1], [0, 0, 1, 1], [], []>} : vector<16x16xbf16>, vector<16x256xbf16>, vector<16x256xf32> -> vector<16x256xf32>
      %76 = math.tanh %71 : vector<16x256xf32>
      %77 = vector.broadcast %8 : vector<16x1xf32> to vector<16x256xf32>
      %78 = arith.mulf %76, %77 : vector<16x256xf32>
      %79 = arith.truncf %78 : vector<16x256xf32> to vector<16x256xbf16>
      %cst_51 = arith.constant dense<0.000000e+00> : vector<16x256xf32>
      %80 = tpu.matmul %15, %79, %cst_51 {dimension_numbers = #tpu.dot_dimension_numbers<[1], [0], [0], [1], [0, 0, 1, 1], [], []>} : vector<16x16xbf16>, vector<16x256xbf16>, vector<16x256xf32> -> vector<16x256xf32>
      %cst_52 = arith.constant 1.000000e+00 : f32
      %81 = vector.broadcast %cst_52 : f32 to vector<16x256xf32>
      %82 = arith.mulf %81, %80 : vector<16x256xf32>
      %83 = vector.broadcast %8 : vector<16x1xf32> to vector<16x256xf32>
      %84 = arith.addf %83, %82 : vector<16x256xf32>
      %85 = arith.mulf %57, %84 : vector<16x256xf32>
      %86 = vector.broadcast %2 : vector<16x1xf32> to vector<16x256xf32>
      %87 = arith.mulf %86, %85 : vector<16x256xf32>
      %cst_53 = arith.constant dense<0.000000e+00> : vector<256xf32>
      %88 = vector.multi_reduction <add>, %87, %cst_53 [0] : vector<16x256xf32> to vector<256xf32>
      %89 = vector.shape_cast %88 : vector<256xf32> to vector<1x256xf32>
      %90 = vector.broadcast %17 : f32 to vector<1x256xf32>
      %91 = arith.mulf %90, %43 : vector<1x256xf32>
      %92 = arith.addf %89, %91 : vector<1x256xf32>
      %93 = vector.broadcast %20 : f32 to vector<1x256xf32>
      %94 = arith.mulf %93, %44 : vector<1x256xf32>
      %95 = arith.addf %92, %94 : vector<1x256xf32>
      %96 = arith.mulf %23, %41 : f32
      %97 = arith.addf %96, %26 : f32
      %98 = vector.broadcast %97 : f32 to vector<1x256xf32>
      %99 = arith.addf %95, %98 : vector<1x256xf32>
      %100 = vector.broadcast %4 : vector<16x1xf32> to vector<16x256xf32>
      %101 = arith.mulf %100, %85 : vector<16x256xf32>
      %cst_54 = arith.constant dense<0.000000e+00> : vector<256xf32>
      %102 = vector.multi_reduction <add>, %101, %cst_54 [0] : vector<16x256xf32> to vector<256xf32>
      %103 = vector.shape_cast %102 : vector<256xf32> to vector<1x256xf32>
      %104 = vector.broadcast %18 : f32 to vector<1x256xf32>
      %105 = arith.mulf %104, %43 : vector<1x256xf32>
      %106 = arith.addf %103, %105 : vector<1x256xf32>
      %107 = vector.broadcast %21 : f32 to vector<1x256xf32>
      %108 = arith.mulf %107, %44 : vector<1x256xf32>
      %109 = arith.addf %106, %108 : vector<1x256xf32>
      %110 = arith.mulf %24, %41 : f32
      %111 = arith.addf %110, %27 : f32
      %112 = vector.broadcast %111 : f32 to vector<1x256xf32>
      %113 = arith.addf %109, %112 : vector<1x256xf32>
      %114 = vector.broadcast %6 : vector<16x1xf32> to vector<16x256xf32>
      %115 = arith.mulf %114, %85 : vector<16x256xf32>
      %cst_55 = arith.constant dense<0.000000e+00> : vector<256xf32>
      %116 = vector.multi_reduction <add>, %115, %cst_55 [0] : vector<16x256xf32> to vector<256xf32>
      %117 = vector.shape_cast %116 : vector<256xf32> to vector<1x256xf32>
      %118 = vector.broadcast %19 : f32 to vector<1x256xf32>
      %119 = arith.mulf %118, %43 : vector<1x256xf32>
      %120 = arith.addf %117, %119 : vector<1x256xf32>
      %121 = vector.broadcast %22 : f32 to vector<1x256xf32>
      %122 = arith.mulf %121, %44 : vector<1x256xf32>
      %123 = arith.addf %120, %122 : vector<1x256xf32>
      %124 = arith.mulf %25, %41 : f32
      %125 = arith.addf %124, %28 : f32
      %126 = vector.broadcast %125 : f32 to vector<1x256xf32>
      %127 = arith.addf %123, %126 : vector<1x256xf32>
      %128 = arith.mulf %57, %85 : vector<16x256xf32>
      %129 = arith.subf %84, %128 : vector<16x256xf32>
      %130 = vector.broadcast %32 : vector<16x1xf32> to vector<16x256xf32>
      %131 = arith.mulf %129, %130 : vector<16x256xf32>
      %cst_56 = arith.constant dense<0.000000e+00> : vector<256xf32>
      %132 = vector.multi_reduction <add>, %131, %cst_56 [0] : vector<16x256xf32> to vector<256xf32>
      %133 = vector.shape_cast %132 : vector<256xf32> to vector<1x256xf32>
      %134 = arith.mulf %76, %78 : vector<16x256xf32>
      %135 = vector.broadcast %8 : vector<16x1xf32> to vector<16x256xf32>
      %136 = arith.subf %135, %134 : vector<16x256xf32>
      %137 = arith.mulf %136, %73 : vector<16x256xf32>
      %138 = arith.mulf %137, %73 : vector<16x256xf32>
      %cst_57 = arith.constant dense<0.000000e+00> : vector<256xf32>
      %139 = vector.multi_reduction <add>, %138, %cst_57 [0] : vector<16x256xf32> to vector<256xf32>
      %140 = vector.shape_cast %139 : vector<256xf32> to vector<1x256xf32>
      %141 = arith.mulf %136, %75 : vector<16x256xf32>
      %142 = arith.mulf %141, %75 : vector<16x256xf32>
      %cst_58 = arith.constant dense<0.000000e+00> : vector<256xf32>
      %143 = vector.multi_reduction <add>, %142, %cst_58 [0] : vector<16x256xf32> to vector<256xf32>
      %144 = vector.shape_cast %143 : vector<256xf32> to vector<1x256xf32>
      %145 = arith.addf %140, %144 : vector<1x256xf32>
      %cst_59 = arith.constant 1.000000e+00 : f32
      %146 = vector.broadcast %cst_59 : f32 to vector<1x256xf32>
      %147 = arith.mulf %146, %145 : vector<1x256xf32>
      %148 = arith.addf %133, %147 : vector<1x256xf32>
      %149 = vector.broadcast %29 : f32 to vector<1x256xf32>
      %150 = arith.addf %148, %149 : vector<1x256xf32>
      %cst_60 = arith.constant -1.000000e+00 : f32
      %151 = vector.broadcast %cst_60 : f32 to vector<1x256xf32>
      %152 = arith.mulf %151, %99 : vector<1x256xf32>
      %cst_61 = arith.constant -1.000000e+00 : f32
      %153 = vector.broadcast %cst_61 : f32 to vector<1x256xf32>
      %154 = arith.mulf %153, %113 : vector<1x256xf32>
      %cst_62 = arith.constant -1.000000e+00 : f32
      %155 = vector.broadcast %cst_62 : f32 to vector<1x256xf32>
      %156 = arith.mulf %155, %150 : vector<1x256xf32>
      %157 = arith.mulf %152, %152 : vector<1x256xf32>
      %158 = arith.mulf %154, %154 : vector<1x256xf32>
      %159 = arith.addf %157, %158 : vector<1x256xf32>
      %cst_63 = arith.constant 5.000000e-01 : f32
      %160 = vector.broadcast %cst_63 : f32 to vector<1x256xf32>
      %161 = arith.mulf %160, %159 : vector<1x256xf32>
      %cst_64 = arith.constant 1.000000e+00 : f32
      %162 = vector.broadcast %cst_64 : f32 to vector<1x256xf32>
      %163 = arith.mulf %162, %161 : vector<1x256xf32>
      %164 = arith.subf %163, %127 : vector<1x256xf32>
      %165 = math.absf %164 : vector<1x256xf32>
      %166 = tpu.concatenate %152, %154, %156, %161, %165 in 0 : vector<1x256xf32>, vector<1x256xf32>, vector<1x256xf32>, vector<1x256xf32>, vector<1x256xf32> -> vector<5x256xf32>
      %cst_65 = arith.constant 1.250000e-01 : f32
      %167 = vector.broadcast %cst_65 : f32 to vector<5x256xf32>
      %168 = arith.mulf %167, %166 : vector<5x256xf32>
      %cst_66 = arith.constant 0.166666672 : f32
      %169 = vector.broadcast %cst_66 : f32 to vector<5x256xf32>
      %170 = arith.mulf %169, %168 : vector<5x256xf32>
      %171 = arith.addf %arg13, %170 : vector<5x256xf32>
      %cst_67 = arith.constant 5.000000e-01 : f32
      %172 = vector.broadcast %cst_67 : f32 to vector<5x256xf32>
      %173 = arith.mulf %172, %168 : vector<5x256xf32>
      %174 = arith.addf %arg13, %173 : vector<5x256xf32>
      %175 = vector.extract_strided_slice %174 {offsets = [0, 0], sizes = [1, 256], strides = [1, 1]} : vector<5x256xf32> to vector<1x256xf32>
      %176 = vector.extract_strided_slice %174 {offsets = [1, 0], sizes = [1, 256], strides = [1, 1]} : vector<5x256xf32> to vector<1x256xf32>
      %177 = vector.broadcast %42 : f32 to vector<16x1xf32>
      %178 = arith.mulf %6, %177 : vector<16x1xf32>
      %179 = arith.addf %178, %7 : vector<16x1xf32>
      %180 = vector.broadcast %2 : vector<16x1xf32> to vector<16x256xf32>
      %181 = vector.broadcast %175 : vector<1x256xf32> to vector<16x256xf32>
      %182 = arith.mulf %180, %181 : vector<16x256xf32>
      %183 = vector.broadcast %179 : vector<16x1xf32> to vector<16x256xf32>
      %184 = arith.addf %183, %182 : vector<16x256xf32>
      %185 = vector.broadcast %4 : vector<16x1xf32> to vector<16x256xf32>
      %186 = vector.broadcast %176 : vector<1x256xf32> to vector<16x256xf32>
      %187 = arith.mulf %185, %186 : vector<16x256xf32>
      %188 = arith.addf %184, %187 : vector<16x256xf32>
      %189 = math.tanh %188 : vector<16x256xf32>
      %190 = math.absf %188 : vector<16x256xf32>
      %cst_68 = arith.constant -2.000000e+00 : f32
      %191 = vector.broadcast %cst_68 : f32 to vector<16x256xf32>
      %192 = arith.mulf %191, %190 : vector<16x256xf32>
      %193 = math.exp %192 : vector<16x256xf32>
      %194 = math.log1p %193 : vector<16x256xf32>
      %195 = arith.addf %190, %194 : vector<16x256xf32>
      %196 = vector.broadcast %2 : vector<16x1xf32> to vector<16x256xf32>
      %197 = arith.mulf %189, %196 : vector<16x256xf32>
      %198 = vector.broadcast %4 : vector<16x1xf32> to vector<16x256xf32>
      %199 = arith.mulf %189, %198 : vector<16x256xf32>
      %200 = arith.truncf %195 : vector<16x256xf32> to vector<16x256xbf16>
      %cst_69 = arith.constant dense<0.000000e+00> : vector<16x256xf32>
      %201 = tpu.matmul %13, %200, %cst_69 {dimension_numbers = #tpu.dot_dimension_numbers<[1], [0], [0], [1], [0, 0, 1, 1], [], []>} : vector<16x16xbf16>, vector<16x256xbf16>, vector<16x256xf32> -> vector<16x256xf32>
      %202 = vector.broadcast %16 : vector<16x1xf32> to vector<16x256xf32>
      %203 = arith.addf %201, %202 : vector<16x256xf32>
      %204 = arith.truncf %197 : vector<16x256xf32> to vector<16x256xbf16>
      %cst_70 = arith.constant dense<0.000000e+00> : vector<16x256xf32>
      %205 = tpu.matmul %13, %204, %cst_70 {dimension_numbers = #tpu.dot_dimension_numbers<[1], [0], [0], [1], [0, 0, 1, 1], [], []>} : vector<16x16xbf16>, vector<16x256xbf16>, vector<16x256xf32> -> vector<16x256xf32>
      %206 = arith.truncf %199 : vector<16x256xf32> to vector<16x256xbf16>
      %cst_71 = arith.constant dense<0.000000e+00> : vector<16x256xf32>
      %207 = tpu.matmul %13, %206, %cst_71 {dimension_numbers = #tpu.dot_dimension_numbers<[1], [0], [0], [1], [0, 0, 1, 1], [], []>} : vector<16x16xbf16>, vector<16x256xbf16>, vector<16x256xf32> -> vector<16x256xf32>
      %208 = math.tanh %203 : vector<16x256xf32>
      %209 = vector.broadcast %8 : vector<16x1xf32> to vector<16x256xf32>
      %210 = arith.mulf %208, %209 : vector<16x256xf32>
      %211 = arith.truncf %210 : vector<16x256xf32> to vector<16x256xbf16>
      %cst_72 = arith.constant dense<0.000000e+00> : vector<16x256xf32>
      %212 = tpu.matmul %15, %211, %cst_72 {dimension_numbers = #tpu.dot_dimension_numbers<[1], [0], [0], [1], [0, 0, 1, 1], [], []>} : vector<16x16xbf16>, vector<16x256xbf16>, vector<16x256xf32> -> vector<16x256xf32>
      %cst_73 = arith.constant 1.000000e+00 : f32
      %213 = vector.broadcast %cst_73 : f32 to vector<16x256xf32>
      %214 = arith.mulf %213, %212 : vector<16x256xf32>
      %215 = vector.broadcast %8 : vector<16x1xf32> to vector<16x256xf32>
      %216 = arith.addf %215, %214 : vector<16x256xf32>
      %217 = arith.mulf %189, %216 : vector<16x256xf32>
      %218 = vector.broadcast %2 : vector<16x1xf32> to vector<16x256xf32>
      %219 = arith.mulf %218, %217 : vector<16x256xf32>
      %cst_74 = arith.constant dense<0.000000e+00> : vector<256xf32>
      %220 = vector.multi_reduction <add>, %219, %cst_74 [0] : vector<16x256xf32> to vector<256xf32>
      %221 = vector.shape_cast %220 : vector<256xf32> to vector<1x256xf32>
      %222 = vector.broadcast %17 : f32 to vector<1x256xf32>
      %223 = arith.mulf %222, %175 : vector<1x256xf32>
      %224 = arith.addf %221, %223 : vector<1x256xf32>
      %225 = vector.broadcast %20 : f32 to vector<1x256xf32>
      %226 = arith.mulf %225, %176 : vector<1x256xf32>
      %227 = arith.addf %224, %226 : vector<1x256xf32>
      %228 = arith.mulf %23, %42 : f32
      %229 = arith.addf %228, %26 : f32
      %230 = vector.broadcast %229 : f32 to vector<1x256xf32>
      %231 = arith.addf %227, %230 : vector<1x256xf32>
      %232 = vector.broadcast %4 : vector<16x1xf32> to vector<16x256xf32>
      %233 = arith.mulf %232, %217 : vector<16x256xf32>
      %cst_75 = arith.constant dense<0.000000e+00> : vector<256xf32>
      %234 = vector.multi_reduction <add>, %233, %cst_75 [0] : vector<16x256xf32> to vector<256xf32>
      %235 = vector.shape_cast %234 : vector<256xf32> to vector<1x256xf32>
      %236 = vector.broadcast %18 : f32 to vector<1x256xf32>
      %237 = arith.mulf %236, %175 : vector<1x256xf32>
      %238 = arith.addf %235, %237 : vector<1x256xf32>
      %239 = vector.broadcast %21 : f32 to vector<1x256xf32>
      %240 = arith.mulf %239, %176 : vector<1x256xf32>
      %241 = arith.addf %238, %240 : vector<1x256xf32>
      %242 = arith.mulf %24, %42 : f32
      %243 = arith.addf %242, %27 : f32
      %244 = vector.broadcast %243 : f32 to vector<1x256xf32>
      %245 = arith.addf %241, %244 : vector<1x256xf32>
      %246 = vector.broadcast %6 : vector<16x1xf32> to vector<16x256xf32>
      %247 = arith.mulf %246, %217 : vector<16x256xf32>
      %cst_76 = arith.constant dense<0.000000e+00> : vector<256xf32>
      %248 = vector.multi_reduction <add>, %247, %cst_76 [0] : vector<16x256xf32> to vector<256xf32>
      %249 = vector.shape_cast %248 : vector<256xf32> to vector<1x256xf32>
      %250 = vector.broadcast %19 : f32 to vector<1x256xf32>
      %251 = arith.mulf %250, %175 : vector<1x256xf32>
      %252 = arith.addf %249, %251 : vector<1x256xf32>
      %253 = vector.broadcast %22 : f32 to vector<1x256xf32>
      %254 = arith.mulf %253, %176 : vector<1x256xf32>
      %255 = arith.addf %252, %254 : vector<1x256xf32>
      %256 = arith.mulf %25, %42 : f32
      %257 = arith.addf %256, %28 : f32
      %258 = vector.broadcast %257 : f32 to vector<1x256xf32>
      %259 = arith.addf %255, %258 : vector<1x256xf32>
      %260 = arith.mulf %189, %217 : vector<16x256xf32>
      %261 = arith.subf %216, %260 : vector<16x256xf32>
      %262 = vector.broadcast %32 : vector<16x1xf32> to vector<16x256xf32>
      %263 = arith.mulf %261, %262 : vector<16x256xf32>
      %cst_77 = arith.constant dense<0.000000e+00> : vector<256xf32>
      %264 = vector.multi_reduction <add>, %263, %cst_77 [0] : vector<16x256xf32> to vector<256xf32>
      %265 = vector.shape_cast %264 : vector<256xf32> to vector<1x256xf32>
      %266 = arith.mulf %208, %210 : vector<16x256xf32>
      %267 = vector.broadcast %8 : vector<16x1xf32> to vector<16x256xf32>
      %268 = arith.subf %267, %266 : vector<16x256xf32>
      %269 = arith.mulf %268, %205 : vector<16x256xf32>
      %270 = arith.mulf %269, %205 : vector<16x256xf32>
      %cst_78 = arith.constant dense<0.000000e+00> : vector<256xf32>
      %271 = vector.multi_reduction <add>, %270, %cst_78 [0] : vector<16x256xf32> to vector<256xf32>
      %272 = vector.shape_cast %271 : vector<256xf32> to vector<1x256xf32>
      %273 = arith.mulf %268, %207 : vector<16x256xf32>
      %274 = arith.mulf %273, %207 : vector<16x256xf32>
      %cst_79 = arith.constant dense<0.000000e+00> : vector<256xf32>
      %275 = vector.multi_reduction <add>, %274, %cst_79 [0] : vector<16x256xf32> to vector<256xf32>
      %276 = vector.shape_cast %275 : vector<256xf32> to vector<1x256xf32>
      %277 = arith.addf %272, %276 : vector<1x256xf32>
      %cst_80 = arith.constant 1.000000e+00 : f32
      %278 = vector.broadcast %cst_80 : f32 to vector<1x256xf32>
      %279 = arith.mulf %278, %277 : vector<1x256xf32>
      %280 = arith.addf %265, %279 : vector<1x256xf32>
      %281 = vector.broadcast %29 : f32 to vector<1x256xf32>
      %282 = arith.addf %280, %281 : vector<1x256xf32>
      %cst_81 = arith.constant -1.000000e+00 : f32
      %283 = vector.broadcast %cst_81 : f32 to vector<1x256xf32>
      %284 = arith.mulf %283, %231 : vector<1x256xf32>
      %cst_82 = arith.constant -1.000000e+00 : f32
      %285 = vector.broadcast %cst_82 : f32 to vector<1x256xf32>
      %286 = arith.mulf %285, %245 : vector<1x256xf32>
      %cst_83 = arith.constant -1.000000e+00 : f32
      %287 = vector.broadcast %cst_83 : f32 to vector<1x256xf32>
      %288 = arith.mulf %287, %282 : vector<1x256xf32>
      %289 = arith.mulf %284, %284 : vector<1x256xf32>
      %290 = arith.mulf %286, %286 : vector<1x256xf32>
      %291 = arith.addf %289, %290 : vector<1x256xf32>
      %cst_84 = arith.constant 5.000000e-01 : f32
      %292 = vector.broadcast %cst_84 : f32 to vector<1x256xf32>
      %293 = arith.mulf %292, %291 : vector<1x256xf32>
      %cst_85 = arith.constant 1.000000e+00 : f32
      %294 = vector.broadcast %cst_85 : f32 to vector<1x256xf32>
      %295 = arith.mulf %294, %293 : vector<1x256xf32>
      %296 = arith.subf %295, %259 : vector<1x256xf32>
      %297 = math.absf %296 : vector<1x256xf32>
      %298 = tpu.concatenate %284, %286, %288, %293, %297 in 0 : vector<1x256xf32>, vector<1x256xf32>, vector<1x256xf32>, vector<1x256xf32>, vector<1x256xf32> -> vector<5x256xf32>
      %cst_86 = arith.constant 1.250000e-01 : f32
      %299 = vector.broadcast %cst_86 : f32 to vector<5x256xf32>
      %300 = arith.mulf %299, %298 : vector<5x256xf32>
      %cst_87 = arith.constant 0.333333343 : f32
      %301 = vector.broadcast %cst_87 : f32 to vector<5x256xf32>
      %302 = arith.mulf %301, %300 : vector<5x256xf32>
      %303 = arith.addf %171, %302 : vector<5x256xf32>
      %cst_88 = arith.constant 5.000000e-01 : f32
      %304 = vector.broadcast %cst_88 : f32 to vector<5x256xf32>
      %305 = arith.mulf %304, %300 : vector<5x256xf32>
      %306 = arith.addf %arg13, %305 : vector<5x256xf32>
      %307 = vector.extract_strided_slice %306 {offsets = [0, 0], sizes = [1, 256], strides = [1, 1]} : vector<5x256xf32> to vector<1x256xf32>
      %308 = vector.extract_strided_slice %306 {offsets = [1, 0], sizes = [1, 256], strides = [1, 1]} : vector<5x256xf32> to vector<1x256xf32>
      %309 = vector.broadcast %42 : f32 to vector<16x1xf32>
      %310 = arith.mulf %6, %309 : vector<16x1xf32>
      %311 = arith.addf %310, %7 : vector<16x1xf32>
      %312 = vector.broadcast %2 : vector<16x1xf32> to vector<16x256xf32>
      %313 = vector.broadcast %307 : vector<1x256xf32> to vector<16x256xf32>
      %314 = arith.mulf %312, %313 : vector<16x256xf32>
      %315 = vector.broadcast %311 : vector<16x1xf32> to vector<16x256xf32>
      %316 = arith.addf %315, %314 : vector<16x256xf32>
      %317 = vector.broadcast %4 : vector<16x1xf32> to vector<16x256xf32>
      %318 = vector.broadcast %308 : vector<1x256xf32> to vector<16x256xf32>
      %319 = arith.mulf %317, %318 : vector<16x256xf32>
      %320 = arith.addf %316, %319 : vector<16x256xf32>
      %321 = math.tanh %320 : vector<16x256xf32>
      %322 = math.absf %320 : vector<16x256xf32>
      %cst_89 = arith.constant -2.000000e+00 : f32
      %323 = vector.broadcast %cst_89 : f32 to vector<16x256xf32>
      %324 = arith.mulf %323, %322 : vector<16x256xf32>
      %325 = math.exp %324 : vector<16x256xf32>
      %326 = math.log1p %325 : vector<16x256xf32>
      %327 = arith.addf %322, %326 : vector<16x256xf32>
      %328 = vector.broadcast %2 : vector<16x1xf32> to vector<16x256xf32>
      %329 = arith.mulf %321, %328 : vector<16x256xf32>
      %330 = vector.broadcast %4 : vector<16x1xf32> to vector<16x256xf32>
      %331 = arith.mulf %321, %330 : vector<16x256xf32>
      %332 = arith.truncf %327 : vector<16x256xf32> to vector<16x256xbf16>
      %cst_90 = arith.constant dense<0.000000e+00> : vector<16x256xf32>
      %333 = tpu.matmul %13, %332, %cst_90 {dimension_numbers = #tpu.dot_dimension_numbers<[1], [0], [0], [1], [0, 0, 1, 1], [], []>} : vector<16x16xbf16>, vector<16x256xbf16>, vector<16x256xf32> -> vector<16x256xf32>
      %334 = vector.broadcast %16 : vector<16x1xf32> to vector<16x256xf32>
      %335 = arith.addf %333, %334 : vector<16x256xf32>
      %336 = arith.truncf %329 : vector<16x256xf32> to vector<16x256xbf16>
      %cst_91 = arith.constant dense<0.000000e+00> : vector<16x256xf32>
      %337 = tpu.matmul %13, %336, %cst_91 {dimension_numbers = #tpu.dot_dimension_numbers<[1], [0], [0], [1], [0, 0, 1, 1], [], []>} : vector<16x16xbf16>, vector<16x256xbf16>, vector<16x256xf32> -> vector<16x256xf32>
      %338 = arith.truncf %331 : vector<16x256xf32> to vector<16x256xbf16>
      %cst_92 = arith.constant dense<0.000000e+00> : vector<16x256xf32>
      %339 = tpu.matmul %13, %338, %cst_92 {dimension_numbers = #tpu.dot_dimension_numbers<[1], [0], [0], [1], [0, 0, 1, 1], [], []>} : vector<16x16xbf16>, vector<16x256xbf16>, vector<16x256xf32> -> vector<16x256xf32>
      %340 = math.tanh %335 : vector<16x256xf32>
      %341 = vector.broadcast %8 : vector<16x1xf32> to vector<16x256xf32>
      %342 = arith.mulf %340, %341 : vector<16x256xf32>
      %343 = arith.truncf %342 : vector<16x256xf32> to vector<16x256xbf16>
      %cst_93 = arith.constant dense<0.000000e+00> : vector<16x256xf32>
      %344 = tpu.matmul %15, %343, %cst_93 {dimension_numbers = #tpu.dot_dimension_numbers<[1], [0], [0], [1], [0, 0, 1, 1], [], []>} : vector<16x16xbf16>, vector<16x256xbf16>, vector<16x256xf32> -> vector<16x256xf32>
      %cst_94 = arith.constant 1.000000e+00 : f32
      %345 = vector.broadcast %cst_94 : f32 to vector<16x256xf32>
      %346 = arith.mulf %345, %344 : vector<16x256xf32>
      %347 = vector.broadcast %8 : vector<16x1xf32> to vector<16x256xf32>
      %348 = arith.addf %347, %346 : vector<16x256xf32>
      %349 = arith.mulf %321, %348 : vector<16x256xf32>
      %350 = vector.broadcast %2 : vector<16x1xf32> to vector<16x256xf32>
      %351 = arith.mulf %350, %349 : vector<16x256xf32>
      %cst_95 = arith.constant dense<0.000000e+00> : vector<256xf32>
      %352 = vector.multi_reduction <add>, %351, %cst_95 [0] : vector<16x256xf32> to vector<256xf32>
      %353 = vector.shape_cast %352 : vector<256xf32> to vector<1x256xf32>
      %354 = vector.broadcast %17 : f32 to vector<1x256xf32>
      %355 = arith.mulf %354, %307 : vector<1x256xf32>
      %356 = arith.addf %353, %355 : vector<1x256xf32>
      %357 = vector.broadcast %20 : f32 to vector<1x256xf32>
      %358 = arith.mulf %357, %308 : vector<1x256xf32>
      %359 = arith.addf %356, %358 : vector<1x256xf32>
      %360 = arith.mulf %23, %42 : f32
      %361 = arith.addf %360, %26 : f32
      %362 = vector.broadcast %361 : f32 to vector<1x256xf32>
      %363 = arith.addf %359, %362 : vector<1x256xf32>
      %364 = vector.broadcast %4 : vector<16x1xf32> to vector<16x256xf32>
      %365 = arith.mulf %364, %349 : vector<16x256xf32>
      %cst_96 = arith.constant dense<0.000000e+00> : vector<256xf32>
      %366 = vector.multi_reduction <add>, %365, %cst_96 [0] : vector<16x256xf32> to vector<256xf32>
      %367 = vector.shape_cast %366 : vector<256xf32> to vector<1x256xf32>
      %368 = vector.broadcast %18 : f32 to vector<1x256xf32>
      %369 = arith.mulf %368, %307 : vector<1x256xf32>
      %370 = arith.addf %367, %369 : vector<1x256xf32>
      %371 = vector.broadcast %21 : f32 to vector<1x256xf32>
      %372 = arith.mulf %371, %308 : vector<1x256xf32>
      %373 = arith.addf %370, %372 : vector<1x256xf32>
      %374 = arith.mulf %24, %42 : f32
      %375 = arith.addf %374, %27 : f32
      %376 = vector.broadcast %375 : f32 to vector<1x256xf32>
      %377 = arith.addf %373, %376 : vector<1x256xf32>
      %378 = vector.broadcast %6 : vector<16x1xf32> to vector<16x256xf32>
      %379 = arith.mulf %378, %349 : vector<16x256xf32>
      %cst_97 = arith.constant dense<0.000000e+00> : vector<256xf32>
      %380 = vector.multi_reduction <add>, %379, %cst_97 [0] : vector<16x256xf32> to vector<256xf32>
      %381 = vector.shape_cast %380 : vector<256xf32> to vector<1x256xf32>
      %382 = vector.broadcast %19 : f32 to vector<1x256xf32>
      %383 = arith.mulf %382, %307 : vector<1x256xf32>
      %384 = arith.addf %381, %383 : vector<1x256xf32>
      %385 = vector.broadcast %22 : f32 to vector<1x256xf32>
      %386 = arith.mulf %385, %308 : vector<1x256xf32>
      %387 = arith.addf %384, %386 : vector<1x256xf32>
      %388 = arith.mulf %25, %42 : f32
      %389 = arith.addf %388, %28 : f32
      %390 = vector.broadcast %389 : f32 to vector<1x256xf32>
      %391 = arith.addf %387, %390 : vector<1x256xf32>
      %392 = arith.mulf %321, %349 : vector<16x256xf32>
      %393 = arith.subf %348, %392 : vector<16x256xf32>
      %394 = vector.broadcast %32 : vector<16x1xf32> to vector<16x256xf32>
      %395 = arith.mulf %393, %394 : vector<16x256xf32>
      %cst_98 = arith.constant dense<0.000000e+00> : vector<256xf32>
      %396 = vector.multi_reduction <add>, %395, %cst_98 [0] : vector<16x256xf32> to vector<256xf32>
      %397 = vector.shape_cast %396 : vector<256xf32> to vector<1x256xf32>
      %398 = arith.mulf %340, %342 : vector<16x256xf32>
      %399 = vector.broadcast %8 : vector<16x1xf32> to vector<16x256xf32>
      %400 = arith.subf %399, %398 : vector<16x256xf32>
      %401 = arith.mulf %400, %337 : vector<16x256xf32>
      %402 = arith.mulf %401, %337 : vector<16x256xf32>
      %cst_99 = arith.constant dense<0.000000e+00> : vector<256xf32>
      %403 = vector.multi_reduction <add>, %402, %cst_99 [0] : vector<16x256xf32> to vector<256xf32>
      %404 = vector.shape_cast %403 : vector<256xf32> to vector<1x256xf32>
      %405 = arith.mulf %400, %339 : vector<16x256xf32>
      %406 = arith.mulf %405, %339 : vector<16x256xf32>
      %cst_100 = arith.constant dense<0.000000e+00> : vector<256xf32>
      %407 = vector.multi_reduction <add>, %406, %cst_100 [0] : vector<16x256xf32> to vector<256xf32>
      %408 = vector.shape_cast %407 : vector<256xf32> to vector<1x256xf32>
      %409 = arith.addf %404, %408 : vector<1x256xf32>
      %cst_101 = arith.constant 1.000000e+00 : f32
      %410 = vector.broadcast %cst_101 : f32 to vector<1x256xf32>
      %411 = arith.mulf %410, %409 : vector<1x256xf32>
      %412 = arith.addf %397, %411 : vector<1x256xf32>
      %413 = vector.broadcast %29 : f32 to vector<1x256xf32>
      %414 = arith.addf %412, %413 : vector<1x256xf32>
      %cst_102 = arith.constant -1.000000e+00 : f32
      %415 = vector.broadcast %cst_102 : f32 to vector<1x256xf32>
      %416 = arith.mulf %415, %363 : vector<1x256xf32>
      %cst_103 = arith.constant -1.000000e+00 : f32
      %417 = vector.broadcast %cst_103 : f32 to vector<1x256xf32>
      %418 = arith.mulf %417, %377 : vector<1x256xf32>
      %cst_104 = arith.constant -1.000000e+00 : f32
      %419 = vector.broadcast %cst_104 : f32 to vector<1x256xf32>
      %420 = arith.mulf %419, %414 : vector<1x256xf32>
      %421 = arith.mulf %416, %416 : vector<1x256xf32>
      %422 = arith.mulf %418, %418 : vector<1x256xf32>
      %423 = arith.addf %421, %422 : vector<1x256xf32>
      %cst_105 = arith.constant 5.000000e-01 : f32
      %424 = vector.broadcast %cst_105 : f32 to vector<1x256xf32>
      %425 = arith.mulf %424, %423 : vector<1x256xf32>
      %cst_106 = arith.constant 1.000000e+00 : f32
      %426 = vector.broadcast %cst_106 : f32 to vector<1x256xf32>
      %427 = arith.mulf %426, %425 : vector<1x256xf32>
      %428 = arith.subf %427, %391 : vector<1x256xf32>
      %429 = math.absf %428 : vector<1x256xf32>
      %430 = tpu.concatenate %416, %418, %420, %425, %429 in 0 : vector<1x256xf32>, vector<1x256xf32>, vector<1x256xf32>, vector<1x256xf32>, vector<1x256xf32> -> vector<5x256xf32>
      %cst_107 = arith.constant 1.250000e-01 : f32
      %431 = vector.broadcast %cst_107 : f32 to vector<5x256xf32>
      %432 = arith.mulf %431, %430 : vector<5x256xf32>
      %cst_108 = arith.constant 0.333333343 : f32
      %433 = vector.broadcast %cst_108 : f32 to vector<5x256xf32>
      %434 = arith.mulf %433, %432 : vector<5x256xf32>
      %435 = arith.addf %303, %434 : vector<5x256xf32>
      %436 = arith.addf %arg13, %432 : vector<5x256xf32>
      %cst_109 = arith.constant 1.250000e-01 : f32
      %437 = arith.addf %41, %cst_109 : f32
      %438 = vector.extract_strided_slice %436 {offsets = [0, 0], sizes = [1, 256], strides = [1, 1]} : vector<5x256xf32> to vector<1x256xf32>
      %439 = vector.extract_strided_slice %436 {offsets = [1, 0], sizes = [1, 256], strides = [1, 1]} : vector<5x256xf32> to vector<1x256xf32>
      %440 = vector.broadcast %437 : f32 to vector<16x1xf32>
      %441 = arith.mulf %6, %440 : vector<16x1xf32>
      %442 = arith.addf %441, %7 : vector<16x1xf32>
      %443 = vector.broadcast %2 : vector<16x1xf32> to vector<16x256xf32>
      %444 = vector.broadcast %438 : vector<1x256xf32> to vector<16x256xf32>
      %445 = arith.mulf %443, %444 : vector<16x256xf32>
      %446 = vector.broadcast %442 : vector<16x1xf32> to vector<16x256xf32>
      %447 = arith.addf %446, %445 : vector<16x256xf32>
      %448 = vector.broadcast %4 : vector<16x1xf32> to vector<16x256xf32>
      %449 = vector.broadcast %439 : vector<1x256xf32> to vector<16x256xf32>
      %450 = arith.mulf %448, %449 : vector<16x256xf32>
      %451 = arith.addf %447, %450 : vector<16x256xf32>
      %452 = math.tanh %451 : vector<16x256xf32>
      %453 = math.absf %451 : vector<16x256xf32>
      %cst_110 = arith.constant -2.000000e+00 : f32
      %454 = vector.broadcast %cst_110 : f32 to vector<16x256xf32>
      %455 = arith.mulf %454, %453 : vector<16x256xf32>
      %456 = math.exp %455 : vector<16x256xf32>
      %457 = math.log1p %456 : vector<16x256xf32>
      %458 = arith.addf %453, %457 : vector<16x256xf32>
      %459 = vector.broadcast %2 : vector<16x1xf32> to vector<16x256xf32>
      %460 = arith.mulf %452, %459 : vector<16x256xf32>
      %461 = vector.broadcast %4 : vector<16x1xf32> to vector<16x256xf32>
      %462 = arith.mulf %452, %461 : vector<16x256xf32>
      %463 = arith.truncf %458 : vector<16x256xf32> to vector<16x256xbf16>
      %cst_111 = arith.constant dense<0.000000e+00> : vector<16x256xf32>
      %464 = tpu.matmul %13, %463, %cst_111 {dimension_numbers = #tpu.dot_dimension_numbers<[1], [0], [0], [1], [0, 0, 1, 1], [], []>} : vector<16x16xbf16>, vector<16x256xbf16>, vector<16x256xf32> -> vector<16x256xf32>
      %465 = vector.broadcast %16 : vector<16x1xf32> to vector<16x256xf32>
      %466 = arith.addf %464, %465 : vector<16x256xf32>
      %467 = arith.truncf %460 : vector<16x256xf32> to vector<16x256xbf16>
      %cst_112 = arith.constant dense<0.000000e+00> : vector<16x256xf32>
      %468 = tpu.matmul %13, %467, %cst_112 {dimension_numbers = #tpu.dot_dimension_numbers<[1], [0], [0], [1], [0, 0, 1, 1], [], []>} : vector<16x16xbf16>, vector<16x256xbf16>, vector<16x256xf32> -> vector<16x256xf32>
      %469 = arith.truncf %462 : vector<16x256xf32> to vector<16x256xbf16>
      %cst_113 = arith.constant dense<0.000000e+00> : vector<16x256xf32>
      %470 = tpu.matmul %13, %469, %cst_113 {dimension_numbers = #tpu.dot_dimension_numbers<[1], [0], [0], [1], [0, 0, 1, 1], [], []>} : vector<16x16xbf16>, vector<16x256xbf16>, vector<16x256xf32> -> vector<16x256xf32>
      %471 = math.tanh %466 : vector<16x256xf32>
      %472 = vector.broadcast %8 : vector<16x1xf32> to vector<16x256xf32>
      %473 = arith.mulf %471, %472 : vector<16x256xf32>
      %474 = arith.truncf %473 : vector<16x256xf32> to vector<16x256xbf16>
      %cst_114 = arith.constant dense<0.000000e+00> : vector<16x256xf32>
      %475 = tpu.matmul %15, %474, %cst_114 {dimension_numbers = #tpu.dot_dimension_numbers<[1], [0], [0], [1], [0, 0, 1, 1], [], []>} : vector<16x16xbf16>, vector<16x256xbf16>, vector<16x256xf32> -> vector<16x256xf32>
      %cst_115 = arith.constant 1.000000e+00 : f32
      %476 = vector.broadcast %cst_115 : f32 to vector<16x256xf32>
      %477 = arith.mulf %476, %475 : vector<16x256xf32>
      %478 = vector.broadcast %8 : vector<16x1xf32> to vector<16x256xf32>
      %479 = arith.addf %478, %477 : vector<16x256xf32>
      %480 = arith.mulf %452, %479 : vector<16x256xf32>
      %481 = vector.broadcast %2 : vector<16x1xf32> to vector<16x256xf32>
      %482 = arith.mulf %481, %480 : vector<16x256xf32>
      %cst_116 = arith.constant dense<0.000000e+00> : vector<256xf32>
      %483 = vector.multi_reduction <add>, %482, %cst_116 [0] : vector<16x256xf32> to vector<256xf32>
      %484 = vector.shape_cast %483 : vector<256xf32> to vector<1x256xf32>
      %485 = vector.broadcast %17 : f32 to vector<1x256xf32>
      %486 = arith.mulf %485, %438 : vector<1x256xf32>
      %487 = arith.addf %484, %486 : vector<1x256xf32>
      %488 = vector.broadcast %20 : f32 to vector<1x256xf32>
      %489 = arith.mulf %488, %439 : vector<1x256xf32>
      %490 = arith.addf %487, %489 : vector<1x256xf32>
      %491 = arith.mulf %23, %437 : f32
      %492 = arith.addf %491, %26 : f32
      %493 = vector.broadcast %492 : f32 to vector<1x256xf32>
      %494 = arith.addf %490, %493 : vector<1x256xf32>
      %495 = vector.broadcast %4 : vector<16x1xf32> to vector<16x256xf32>
      %496 = arith.mulf %495, %480 : vector<16x256xf32>
      %cst_117 = arith.constant dense<0.000000e+00> : vector<256xf32>
      %497 = vector.multi_reduction <add>, %496, %cst_117 [0] : vector<16x256xf32> to vector<256xf32>
      %498 = vector.shape_cast %497 : vector<256xf32> to vector<1x256xf32>
      %499 = vector.broadcast %18 : f32 to vector<1x256xf32>
      %500 = arith.mulf %499, %438 : vector<1x256xf32>
      %501 = arith.addf %498, %500 : vector<1x256xf32>
      %502 = vector.broadcast %21 : f32 to vector<1x256xf32>
      %503 = arith.mulf %502, %439 : vector<1x256xf32>
      %504 = arith.addf %501, %503 : vector<1x256xf32>
      %505 = arith.mulf %24, %437 : f32
      %506 = arith.addf %505, %27 : f32
      %507 = vector.broadcast %506 : f32 to vector<1x256xf32>
      %508 = arith.addf %504, %507 : vector<1x256xf32>
      %509 = vector.broadcast %6 : vector<16x1xf32> to vector<16x256xf32>
      %510 = arith.mulf %509, %480 : vector<16x256xf32>
      %cst_118 = arith.constant dense<0.000000e+00> : vector<256xf32>
      %511 = vector.multi_reduction <add>, %510, %cst_118 [0] : vector<16x256xf32> to vector<256xf32>
      %512 = vector.shape_cast %511 : vector<256xf32> to vector<1x256xf32>
      %513 = vector.broadcast %19 : f32 to vector<1x256xf32>
      %514 = arith.mulf %513, %438 : vector<1x256xf32>
      %515 = arith.addf %512, %514 : vector<1x256xf32>
      %516 = vector.broadcast %22 : f32 to vector<1x256xf32>
      %517 = arith.mulf %516, %439 : vector<1x256xf32>
      %518 = arith.addf %515, %517 : vector<1x256xf32>
      %519 = arith.mulf %25, %437 : f32
      %520 = arith.addf %519, %28 : f32
      %521 = vector.broadcast %520 : f32 to vector<1x256xf32>
      %522 = arith.addf %518, %521 : vector<1x256xf32>
      %523 = arith.mulf %452, %480 : vector<16x256xf32>
      %524 = arith.subf %479, %523 : vector<16x256xf32>
      %525 = vector.broadcast %32 : vector<16x1xf32> to vector<16x256xf32>
      %526 = arith.mulf %524, %525 : vector<16x256xf32>
      %cst_119 = arith.constant dense<0.000000e+00> : vector<256xf32>
      %527 = vector.multi_reduction <add>, %526, %cst_119 [0] : vector<16x256xf32> to vector<256xf32>
      %528 = vector.shape_cast %527 : vector<256xf32> to vector<1x256xf32>
      %529 = arith.mulf %471, %473 : vector<16x256xf32>
      %530 = vector.broadcast %8 : vector<16x1xf32> to vector<16x256xf32>
      %531 = arith.subf %530, %529 : vector<16x256xf32>
      %532 = arith.mulf %531, %468 : vector<16x256xf32>
      %533 = arith.mulf %532, %468 : vector<16x256xf32>
      %cst_120 = arith.constant dense<0.000000e+00> : vector<256xf32>
      %534 = vector.multi_reduction <add>, %533, %cst_120 [0] : vector<16x256xf32> to vector<256xf32>
      %535 = vector.shape_cast %534 : vector<256xf32> to vector<1x256xf32>
      %536 = arith.mulf %531, %470 : vector<16x256xf32>
      %537 = arith.mulf %536, %470 : vector<16x256xf32>
      %cst_121 = arith.constant dense<0.000000e+00> : vector<256xf32>
      %538 = vector.multi_reduction <add>, %537, %cst_121 [0] : vector<16x256xf32> to vector<256xf32>
      %539 = vector.shape_cast %538 : vector<256xf32> to vector<1x256xf32>
      %540 = arith.addf %535, %539 : vector<1x256xf32>
      %cst_122 = arith.constant 1.000000e+00 : f32
      %541 = vector.broadcast %cst_122 : f32 to vector<1x256xf32>
      %542 = arith.mulf %541, %540 : vector<1x256xf32>
      %543 = arith.addf %528, %542 : vector<1x256xf32>
      %544 = vector.broadcast %29 : f32 to vector<1x256xf32>
      %545 = arith.addf %543, %544 : vector<1x256xf32>
      %cst_123 = arith.constant -1.000000e+00 : f32
      %546 = vector.broadcast %cst_123 : f32 to vector<1x256xf32>
      %547 = arith.mulf %546, %494 : vector<1x256xf32>
      %cst_124 = arith.constant -1.000000e+00 : f32
      %548 = vector.broadcast %cst_124 : f32 to vector<1x256xf32>
      %549 = arith.mulf %548, %508 : vector<1x256xf32>
      %cst_125 = arith.constant -1.000000e+00 : f32
      %550 = vector.broadcast %cst_125 : f32 to vector<1x256xf32>
      %551 = arith.mulf %550, %545 : vector<1x256xf32>
      %552 = arith.mulf %547, %547 : vector<1x256xf32>
      %553 = arith.mulf %549, %549 : vector<1x256xf32>
      %554 = arith.addf %552, %553 : vector<1x256xf32>
      %cst_126 = arith.constant 5.000000e-01 : f32
      %555 = vector.broadcast %cst_126 : f32 to vector<1x256xf32>
      %556 = arith.mulf %555, %554 : vector<1x256xf32>
      %cst_127 = arith.constant 1.000000e+00 : f32
      %557 = vector.broadcast %cst_127 : f32 to vector<1x256xf32>
      %558 = arith.mulf %557, %556 : vector<1x256xf32>
      %559 = arith.subf %558, %522 : vector<1x256xf32>
      %560 = math.absf %559 : vector<1x256xf32>
      %561 = tpu.concatenate %547, %549, %551, %556, %560 in 0 : vector<1x256xf32>, vector<1x256xf32>, vector<1x256xf32>, vector<1x256xf32>, vector<1x256xf32> -> vector<5x256xf32>
      %cst_128 = arith.constant 1.250000e-01 : f32
      %562 = vector.broadcast %cst_128 : f32 to vector<5x256xf32>
      %563 = arith.mulf %562, %561 : vector<5x256xf32>
      %cst_129 = arith.constant 0.166666672 : f32
      %564 = vector.broadcast %cst_129 : f32 to vector<5x256xf32>
      %565 = arith.mulf %564, %563 : vector<5x256xf32>
      %566 = arith.addf %435, %565 : vector<5x256xf32>
      scf.yield %566 : vector<5x256xf32>
    }
    %c8_i32_41 = arith.constant 8 : i32
    %c0_42 = arith.constant 0 : index
    %c0_43 = arith.constant 0 : index
    %38 = vector.load %arg11[%c0_42, %c0_43] : memref<5x256xf32, #tpu.memory_space<vmem>>, vector<5x256xf32>
    tpu.vector_store %arg11[%c0_42, %c0_43], %37 {strides = array<i32>} : memref<5x256xf32, #tpu.memory_space<vmem>>, vector<5x256xf32>,
    return
  }
  func.func @transform_0(%arg0: i32) -> (i32, i32) {
    %c0_i32 = arith.constant 0 : i32
    %c0_i32_0 = arith.constant 0 : i32
    return %c0_i32, %arg0 : i32, i32
  }
  func.func @transform_1(%arg0: i32) -> (i32, i32, i32) {
    %c0_i32 = arith.constant 0 : i32
    %c0_i32_0 = arith.constant 0 : i32
    %c0_i32_1 = arith.constant 0 : i32
    %c0_i32_2 = arith.constant 0 : i32
    return %c0_i32, %c0_i32_0, %c0_i32_1 : i32, i32, i32
  }
  func.func @transform_2(%arg0: i32) -> (i32, i32) {
    %c0_i32 = arith.constant 0 : i32
    %c0_i32_0 = arith.constant 0 : i32
    %c0_i32_1 = arith.constant 0 : i32
    return %c0_i32, %c0_i32_0 : i32, i32
  }
  func.func @transform_3(%arg0: i32) -> (i32, i32, i32) {
    %c0_i32 = arith.constant 0 : i32
    %c0_i32_0 = arith.constant 0 : i32
    %c0_i32_1 = arith.constant 0 : i32
    %c0_i32_2 = arith.constant 0 : i32
    return %c0_i32, %c0_i32_0, %c0_i32_1 : i32, i32, i32
  }
  func.func @transform_4(%arg0: i32) -> (i32, i32, i32) {
    %c0_i32 = arith.constant 0 : i32
    %c0_i32_0 = arith.constant 0 : i32
    %c0_i32_1 = arith.constant 0 : i32
    %c0_i32_2 = arith.constant 0 : i32
    return %c0_i32, %c0_i32_0, %c0_i32_1 : i32, i32, i32
  }
  func.func @transform_5(%arg0: i32) -> (i32, i32, i32) {
    %c0_i32 = arith.constant 0 : i32
    %c0_i32_0 = arith.constant 0 : i32
    %c0_i32_1 = arith.constant 0 : i32
    %c0_i32_2 = arith.constant 0 : i32
    return %c0_i32, %c0_i32_0, %c0_i32_1 : i32, i32, i32
  }
  func.func @transform_6(%arg0: i32) -> (i32, i32) {
    %c0_i32 = arith.constant 0 : i32
    %c0_i32_0 = arith.constant 0 : i32
    %c0_i32_1 = arith.constant 0 : i32
    return %c0_i32, %c0_i32_0 : i32, i32
  }
  func.func @transform_7(%arg0: i32) -> (i32, i32) {
    %c0_i32 = arith.constant 0 : i32
    %c0_i32_0 = arith.constant 0 : i32
    %c0_i32_1 = arith.constant 0 : i32
    return %c0_i32, %c0_i32_0 : i32, i32
  }
  func.func @transform_8(%arg0: i32) -> (i32, i32) {
    %c0_i32 = arith.constant 0 : i32
    %c0_i32_0 = arith.constant 0 : i32
    %c0_i32_1 = arith.constant 0 : i32
    return %c0_i32, %c0_i32_0 : i32, i32
  }
  func.func @transform_9(%arg0: i32) -> (i32, i32) {
    %c0_i32 = arith.constant 0 : i32
    %c0_i32_0 = arith.constant 0 : i32
    %c0_i32_1 = arith.constant 0 : i32
    return %c0_i32, %c0_i32_0 : i32, i32
  }
  func.func @transform_10(%arg0: i32) -> (i32, i32) {
    %c0_i32 = arith.constant 0 : i32
    %c0_i32_0 = arith.constant 0 : i32
    return %c0_i32, %arg0 : i32, i32
  }
}

</mosaic_0001>

<bundles_post_ra>
// kernel: tpu_custom_call.1
= control target key start
LH: loop header
LB: loop body
LE: loop exit
PB: predicated region body
PF: predicated region fallthrough
CT: control target
= control target key end

     0   :  { %s4662_s0 = inlined_call_operand.vmem [shape: f32[2,512], index: 0, kind: input, shape index: {}]   ;;  %s4663_s1 = inlined_call_operand.vmem [shape: f32[3,16,1], index: 1, kind: input, shape index: {}]   ;;  %s4664_s2 = inlined_call_operand.vmem [shape: f32[16,1], index: 2, kind: input, shape index: {}]   ;;  %s4665_s3 = inlined_call_operand.vmem [shape: f32[1,16,16], index: 3, kind: input, shape index: {}]   ;;  %s4666_s4 = inlined_call_operand.vmem [shape: f32[1,16,16], index: 4, kind: input, shape index: {}]   ;;  %s4667_s5 = inlined_call_operand.vmem [shape: f32[1,16,1], index: 5, kind: input, shape index: {}]   ;;  %s4668_s6 = inlined_call_operand.vmem [shape: f32[16,1], index: 6, kind: input, shape index: {}]   ;;  %s4669_s7 = inlined_call_operand.vmem [shape: f32[3,3], index: 7, kind: input, shape index: {}]   ;;  %s4670_s8 = inlined_call_operand.vmem [shape: f32[1,3], index: 8, kind: input, shape index: {}]   ;;  %s4671_s9 = inlined_call_operand.<no memory space> [shape: f32[1,1], index: 9, kind: input, shape index: {}]   ;;  %s4672_s10 = inlined_call_operand.hbm [shape: f32[5,512], index: 10, kind: output, shape index: {}]  }
   0x1   :  { %4743 = sst [smem:[#allocation44_spill]] %s4662_s0 }
   0x2   :  { %4744 = sst [smem:[#allocation45_spill]] %s4663_s1 }
   0x3   :  { %4745 = sst [smem:[#allocation46_spill]] %s4664_s2 }
   0x4   :  { %4746 = sst [smem:[#allocation47_spill]] %s4665_s3 }
   0x5   :  { %4747 = sst [smem:[#allocation48_spill]] %s4666_s4 }
   0x6   :  { %4748 = sst [smem:[#allocation49_spill]] %s4667_s5 }
   0x7   :  { %4749 = sst [smem:[#allocation50_spill]] %s4668_s6 }
   0x8   :  { %4750 = sst [smem:[#allocation51_spill]] %s4669_s7 }
   0x9   :  { %15 = sst [smem:[#allocation2]] %s4671_s9 }
   0xa   :  { %16 = vsyncpa [#allocation5], 0 }
   0xb   :  { %17 = vsyncpa [#allocation7], 0 }
   0xc   :  { %18 = vsyncpa [#allocation4], 0 }
   0xd   :  { %20 = vsyncpa [#allocation4 + $0x1], 0  ;;  %s3298_s15 = smov 0   ;;  %s3300_s16 = smov 0  }
   0xe   :  { %s3302_s17 = smov 0   ;;  %s3304_s18 = smov 0  }
   0xf LB: > { %s3319_s9 = sadd.s32 4294967295, %s3222_s18   ;;  %s2851_s19 = sadd.s32 4294967294, %s3222_s18   ;;  %s3222_s18 = sphi %s3304_s18, %s4895_s18   ;;  %s3218_s17 = sphi %s3302_s17, %s4894_s17   ;;  %s3214_s16 = sphi %s3300_s16, %s4893_s16   ;;  %s3210_s15 = sphi %s3298_s15, %s4892_s15  }
  0x10   : > { %s3323_s20 = sadd.s32 1, %s3222_s18   ;;  %s248_s21 = sadd.s32 1, %s3218_s17 }
  0x11   : > { %s245_s22 = ssub.s32 %s3222_s18, %s3323_s20  ;;  %p258_p0 = scmp.ne.s32.totalorder %s3218_s17, %s3214_s16 }
  0x12   : > { %p246_p1 = scmp.eq.s32.totalorder %s245_s22, 0  ;;  %p259_p2 = scmp.eq.s32.totalorder %s3319_s9, 1 }
  0x13   : > { %p264_p3 = scmp.ne.s32.totalorder %s3214_s16, %s3210_s15  ;;  %p265_p4 = scmp.eq.s32.totalorder %s2851_s19, 1 }
  0x14   : > { %s3334_s23 = scalar_select %p246_p1, %s3218_s17, %s248_s21  }
  0x15   : > { %p3336_p5 = por %p259_p2, %p258_p0  ;;  %p3340_p6 = por %p265_p4, %p264_p3 }
  0x16   : > { %p2852_p7 = scmp.ge.s32.totalorder %s3222_s18, 1  ;;  %p272_p8 = scmp.lt.s32.totalorder %s3222_s18, 3 }
  0x17   : > { %s4751_s24 = scalar_select %p3336_p5, 1, 0 }
  0x18   : > { %s4752_s25 = scalar_select %p3340_p6, 1, 0 }
  0x19   : > { %p4673_p9 = scmp.eq.s32.totalorder %s3319_s9, 0  ;;  %p3347_p10 = pnand %p2852_p7, %p272_p8 }
  0x1a   : > { %s4754_s7 = sld [smem:[#allocation51_spill]]  ;;  %s314_s12 = sshll.u32 %s4670_s8, 4  ;;  %s315_s12 = int_to_ptr.vmem [resolvable:$true] %s314_s12 }
  0x1b   : > { %s4753_s26 = scalar_select %p3347_p10, 1, 0 }
  0x1c   : > { %p2905_p11 = pneg %p3347_p10 }
  0x1e   : > { %p3361_p12 = pnand %p4673_p9, %p2905_p11 }
  0x20   : > { %s303_s29 = sshll.u32 %s4754_s7, 4  ;;  %p3112_p0 = pneg %p3361_p12  ;;  %s304_s29 = int_to_ptr.vmem [resolvable:$true] %s303_s29 }
  0x21   : > { %s3110_s14 = scalar_lea.vmem %s304_s29, 64  ;;  %p3118_p3 = scmp.lt.s32.totalorder %s304_s29, %s304_s29 }
  0x22   : > { %p3111_p13 = scmp.ne.s32.totalorder %s304_s29, %s3110_s14  ;;  %p3119_p4 = scmp.lt.s32.totalorder %s3110_s14, %s3110_s14 }
  0x24   : > { %p3113_p1 = pnand %p3112_p0, %p3111_p13  ;;  %p3120_p7 = por %p3119_p4, %p3118_p3 }
  0x26   : > { %p3114_p2 = pneg %p3113_p1 }
  0x28   : > { %p3121_p8 = pnand %p3120_p7, %p3114_p2 }
  0x2a   : > { %3124 = shalt.err (!%p3121_p8)
}
  0x2b   : > { %s3236_s19 = smov [#allocation3]   ;;  %s3125_s21 = scalar_lea.vmem %s315_s12, 16 }
  0x2c   : > { %2908 = dma.vmem_to_smem (!%p3361_p12), %s304_s29, 64, %s3236_s19, [#allocation5]  }
  0x2d   : > { %p3126_p11 = scmp.ne.s32.totalorder %s315_s12, %s3125_s21  ;;  %p3133_p5 = scmp.lt.s32.totalorder %s315_s12, %s315_s12 }
  0x2e   : > { %p3134_p10 = scmp.lt.s32.totalorder %s3125_s21, %s3125_s21 }
  0x2f   : > { %p3128_p9 = pnand %p3126_p11, %p3112_p0 }
  0x30   : > { %p3135_p13 = por %p3134_p10, %p3133_p5 }
  0x31   : > { %p3129_p6 = pneg %p3128_p9 }
  0x33   : > { %p3136_p1 = pnand %p3135_p13, %p3129_p6 }
  0x35   : > { %3139 = shalt.err (!%p3136_p1)
}
  0x36   : > { %s3237_s22 = smov [#allocation6]   ;;  %p4756_p2 = scmp.ne.s32.totalorder %s4753_s26, 0 }
  0x37   : > { %2911 = dma.vmem_to_smem (!%p3361_p12), %s315_s12, 16, %s3237_s22, [#allocation7]  }
  0x38   : > { %339 = sbr.rel (%p4756_p2) target bundleno = 2447 (0x98f), region = 60 }
  0x3f   : > { %p4757_p3 = scmp.eq.s32.totalorder %s3319_s9, 0 }
  0x41   : > { %3197 = dma.done.wait (%p4757_p3), [#allocation5], 64   ;;  %p4758_p4 = pmov %p4757_p3 }
  0x42   : > { %p4759_p9 = pmov %p4757_p3 }
  0x43   : > { %3199 = vsyncadd (%p4758_p4), [#allocation5], 4294967232 }
  0x44   : > { %3201 = dma.done.wait (%p4759_p9), [#allocation7], 16   ;;  %p4760_p5 = pmov %p4757_p3 }
  0x46   : > { %3203 = vsyncadd (%p4760_p5), [#allocation7], 4294967280 }
  0x47   : > { %349 = sfence }
  0x48   : > { %s4676_s27 = sand.u32 1, %s3214_s16   ;;  %s2860_s28 = sshll.u32 %s3319_s9, 1  ;;  %vm439_vm0 = vcmask 1041408  }
  0x49   : > { %s4761_s1 = sld [smem:[#allocation45_spill]]  ;;  %s3400_s14 = sshll.u32 %s4676_s27, 4 }
  0x4a   : > { %p383_p6 = scmp.lt.s32.totalorder %s2860_s28, 3  ;;  %s4768_s2 = sld [smem:[#allocation46_spill]] }
  0x4b   : > { %s4771_s6 = sld [smem:[#allocation50_spill]]  ;;  %s3438_s26 = sld [smem:[#allocation3]] }
  0x4c   : > { %s4897_s28 = smov (!%p383_p6, %s2860_s28), 3  ;;  %s4774_s3 = sld [smem:[#allocation47_spill]] }
  0x4d   : > { %s4776_s4 = sld [smem:[#allocation48_spill]]  ;;  %s4777_s5 = sld [smem:[#allocation49_spill]] }
  0x4e   : > { %s3468_s11 = sld [smem:[#allocation3 + $0x1]]  ;;  %s2861_s12 = sshll.u32 %s4897_s28, 1 }
  0x4f   : > { %v3386_v0 = vld [vmem:[%s4761_s1] sm:$0xff]  ;;  %v3391_v1 = vld [vmem:[%s4761_s1 + $0x8] sm:$0xff]  ;;  %v3396_v2 = vld [vmem:[%s4761_s1 + $0x10] sm:$0xff]  ;;  %s4784_s0 = sld [smem:[#allocation44_spill]]  ;;  %s3486_s30 = sld [smem:[#allocation3 + $0x81]] }
  0x50   : > { %4762 = vst [vmem:[#allocation12_spill] sm:$0xff] %v3386_v0  ;;  %4763 = vst [vmem:[#allocation13_spill] sm:$0xff] %v3391_v1  ;;  %v3405_v3 = vld [vmem:[%s4761_s1 + $0x18] sm:$0xff]  ;;  %v3410_v4 = vld [vmem:[%s4761_s1 + $0x20] sm:$0xff]  ;;  %v421_v6 = vmul.f32 %v3386_v0, %v3386_v0  ;;  %v422_v7 = vmul.f32 %v3391_v1, %v3391_v1  ;;  %v423_v8 = vmul.f32 %v3396_v2, %v3396_v2  ;;  %s3484_s29 = sld [smem:[#allocation3 + $0x80]]  ;;  %s3492_s13 = sld [smem:[#allocation3 + $0x101]] }
  0x51   : > { %4764 = vst [vmem:[#allocation14_spill] sm:$0xff] %v3396_v2  ;;  %4765 = vst [vmem:[#allocation15_spill] sm:$0xff] %v3405_v3  ;;  %v3415_v5 = vld [vmem:[%s4761_s1 + $0x28] sm:$0xff]  ;;  %v3426_v9 = vld [vmem:[%s4768_s2] sm:$0xff]  ;;  %v424_v12 = vmul.f32 %v3405_v3, %v3405_v3  ;;  %s3479_s1 = sld [smem:[#allocation3 + $0x2]]  ;;  %s3490_s28 = sld [smem:[#allocation3 + $0x100]] }
  0x52   : > { %4766 = vst [vmem:[#allocation16_spill] sm:$0xff] %v3410_v4  ;;  %4767 = vst [vmem:[#allocation17_spill] sm:$0xff] %v3415_v5  ;;  %v3431_v10 = vld [vmem:[%s4768_s2 + $0x8] sm:$0xff]  ;;  %v3436_v11 = vld [vmem:[%s4771_s6] sm:$0xff]  ;;  %v3453_v16 = vadd.f32 %v423_v8, %v421_v6  ;;  %s3488_s2 = sld [smem:[#allocation3 + $0x82]]  ;;  %s3507_s21 = scalar_lea.vmem [#allocation8], %s3400_s14 }
  0x53   : > { %4769 = vst [vmem:[#allocation18_spill] sm:$0xff] %v3426_v9  ;;  %4770 = vst [vmem:[#allocation19_spill] sm:$0xff] %v3431_v10  ;;  %v3445_v13 = vld [vmem:[%s4771_s6 + $0x8] sm:$0xff]  ;;  %v400_v14 = vld [vmem:[%s4774_s3] sm:$0xff]  ;;  %v3470_v21 = vadd.f32 %v424_v12, %v422_v7  ;;  %s3494_s19 = sld [smem:[#allocation3 + $0x102]] }
  0x54   : > { %4772 = vst [vmem:[#allocation20_spill] sm:$0xff] %v3436_v11  ;;  %4773 = vst [vmem:[#allocation21_spill] sm:$0xff] %v3445_v13  ;;  %v401_v15 = vld [vmem:[%s4774_s3 + $0x8] sm:$0xff]  ;;  %v402_v17 = vld [vmem:[%s4776_s4] sm:$0xff]  ;;  %s3496_s3 = sld [smem:[#allocation6]]  ;;  %s3500_s27 = sld [smem:[#allocation6 + $0x2]] }
  0x55   : > { %4775 = vst [vmem:[#allocation22_spill] sm:$0xff] %v3453_v16  ;;  %v403_v18 = vld [vmem:[%s4776_s4 + $0x8] sm:$0xff]  ;;  %v3464_v19 = vld [vmem:[%s4777_s5] sm:$0xff]  ;;  %v3466_v20 = vpack.c.bf16 %v401_v15, %v400_v14  ;;  %4780 = vst [vmem:[#allocation25_spill] sm:$0xff] %v3470_v21  ;;  %s386_s22 = scalar_lea.vmem %s4784_s0, %s2861_s12  ;;  %s3498_s4 = sld [smem:[#allocation6 + $0x1]] }
  0x56   : > { %4778 = vst [vmem:[#allocation23_spill] sm:$0xff] %v3464_v19  ;;  %v3475_v22 = vld [vmem:[%s4777_s5 + $0x8] sm:$0xff]  ;;  %v3477_v23 = vpack.c.bf16 %v403_v18, %v402_v17  ;;  %s3502_s12 = sld [smem:[#allocation2]]  ;;  %s3513_s0 = smov 0  }
  0x57   : > { %4779 = vst [vmem:[#allocation24_spill] sm:$0xff] %v3466_v20  ;;  %4781 = vst [vmem:[#allocation26_spill] sm:$0xff] %v3475_v22  ;;  %4783 = sst [smem:[#allocation28_spill]] %s3479_s1 }
  0x58   : > { %4782 = vst [vmem:[#allocation27_spill] sm:$0xff] %v3477_v23  ;;  %4785 = sst [smem:[#allocation29_spill]] %s3488_s2  ;;  %v2872_v24 = vld.sshfl [vmem:[%s386_s22] sm:$0x33 pattern:$0x76325410] }
  0x59   : > { %v436_v25 = vcombine.high %v2872_v24, %v2872_v24  ;;  %v440_v26 = vsel %vm439_vm0, %v2872_v24, 0.0  }
  0x5b   : > { %v441_v27 = vsel %vm439_vm0, %v436_v25, 0.0  }
  0x5c LB: >> { %v4788_v10 = vld [vmem:[#allocation19_spill] sm:$0xff]  ;;  %v4789_v9 = vld [vmem:[#allocation18_spill] sm:$0xff]  ;;  %v4790_v5 = vld [vmem:[#allocation17_spill] sm:$0xff]  ;;  %v4677_v28 = vmov 0   ;;  %s450_s14 = scvt.s32.f32 %s3234_s0  ;;  %v469_v44 = vlaneseq  ;;  %vm601_vm1 = vcmask 130048   ;;  %s4809_s2 = sld [smem:[#allocation29_spill]]  ;;  %s3234_s0 = sphi %s3513_s0, %s447_s0   ;;  %v3230_v26 = vphi %v440_v26, %v4888_v26   ;;  %v3226_v27 = vphi %v441_v27, %v4887_v27  }
  0x5d   : >> { %v4791_v4 = vld [vmem:[#allocation16_spill] sm:$0xff]  ;;  %2980 = vset.pattern.permute.xlu0 %v4677_v28  ;;  %2981 = vset.pattern.permute.xlu1 %v4677_v28  ;;  %v4793_v1 = vld [vmem:[#allocation13_spill] sm:$0xff]  ;;  %v4794_v2 = vld [vmem:[#allocation14_spill] sm:$0xff]  ;;  %s4810_s1 = sld [smem:[#allocation28_spill]]  ;;  %vm1070_vm6 = vcmask 1040384   ;;  %vm1075_vm7 = vcmask 1042432  }
  0x5e   : >> { %v4786_v20 = vld [vmem:[#allocation24_spill] sm:$0xff]  ;;  %637 = vmatprep.mubr.bf16.mxu0 %v4677_v28  ;;  %682 = vmatprep.mubr.bf16.mxu1 %v4677_v28  ;;  %s3530_s22 = smul.f32 0.125, %s450_s14  ;;  %v4795_v19 = vld [vmem:[#allocation23_spill] sm:$0xff]  ;;  %v4798_v22 = vld [vmem:[#allocation26_spill] sm:$0xff]  ;;  %v470_v45 = vshrl.u32 %v469_v44, 7  ;;  %vm1078_vm8 = vcmask 1043456  }
  0x5f   : >> { %v4787_v23 = vld [vmem:[#allocation27_spill] sm:$0xff]  ;;  %v4792_v0 = vld [vmem:[#allocation12_spill] sm:$0xff]  ;;  %v4799_v16 = vld [vmem:[#allocation22_spill] sm:$0xff]  ;;  %s447_s0 = sadd.s32 1, %s3234_s0  }
  0x60   : >> { %461 = vperm.xlu0 %2980, %v4792_v0   ;;  %v454_v29 = vstv %s3530_s22  ;;  %s3541_s14 = sadd.f32 0.0625, %s3530_s22  ;;  %v4796_v11 = vld [vmem:[#allocation20_spill] sm:$0xff]  ;;  %v4797_v3 = vld [vmem:[#allocation15_spill] sm:$0xff]  ;;  %v4800_v13 = vld [vmem:[#allocation21_spill] sm:$0xff]  ;;  %v3564_v46 = vsub.s32 0, %v470_v45  ;;  %v3568_v48 = vsub.s32 1, %v470_v45  ;;  %s846_s6 = smul.f32 %s3490_s28, %s3530_s22 }
  0x61   : >> { %v455_v30 = vmul.f32 %v454_v29, %v4791_v4  ;;  %v456_v31 = vmul.f32 %v454_v29, %v4790_v5  ;;  %s3547_s5 = sadd.f32 0.125, %s3530_s22  ;;  %v4801_v21 = vld [vmem:[#allocation25_spill] sm:$0xff]  ;;  %s885_s7 = smul.f32 %s3492_s13, %s3530_s22 }
  0x62   : >> { %v1091_v34 = vstv %s3541_s14  ;;  %v472_v49 = vrot.slane %v3230_v26, %v3564_v46  ;;  %v476_v50 = vrot.slane %v3226_v27, %v3564_v46  ;;  %v508_v52 = vrot.slane %v3230_v26, %v3568_v48  ;;  %p444_p10 = scmp.ge.s32.totalorder %s447_s0, 8  }
  0x63   : >> { %v457_v32 = vadd.f32 %v455_v30, %v4789_v9  ;;  %v458_v33 = vadd.f32 %v456_v31, %v4788_v10  ;;  %v1092_v35 = vmul.f32 %v1091_v34, %v4791_v4  ;;  %v2186_v36 = vstv %s3547_s5  ;;  %p4890_p0 = scmp.ne.s32.totalorder (%p444_p10), %s4751_s24, 0 }
  0x64   : >> { %466 = vperm.xlu0 %2980, %v4793_v1   ;;  %v2187_v38 = vmul.f32 %v2186_v36, %v4791_v4  ;;  %v1093_v40 = vmul.f32 %v1091_v34, %v4790_v5  ;;  %v2188_v42 = vmul.f32 %v2186_v36, %v4790_v5  ;;  %v512_v53 = vrot.slane %v3226_v27, %v3568_v48 }
  0x65   : >> { %483 = vperm.xlu1 %2981, %v457_v32   ;;  %v1094_v37 = vadd.f32 %v1092_v35, %v4789_v9 }
  0x66   : >> { %v2189_v39 = vadd.f32 %v2187_v38, %v4789_v9  ;;  %v1095_v41 = vadd.f32 %v1093_v40, %v4788_v10  ;;  %v2190_v43 = vadd.f32 %v2188_v42, %v4788_v10 }
  0x68   : >> { %497 = vperm.xlu0 %2980, %v4794_v2  }
  0x69   : >> { %488 = vperm.xlu1 %2981, %v458_v33  }
  0x6c   : >> { %593 = vperm.xlu0 %2980, %v4795_v19  }
  0x6d   : >> { %502 = vperm.xlu1 %2981, %v4797_v3  }
  0x70   : >> { %744 = vperm.xlu0 %2980, %v4796_v11  }
  0x71   : >> { %598 = vperm.xlu1 %2981, %v4798_v22  }
  0x74   : >> { %892 = vperm.xlu0 %2980, %v4791_v4  }
  0x75   : >> { %749 = vperm.xlu1 %2981, %v4800_v13  }
  0x78   : >> { %949 = vperm.xlu0 %2980, %v4799_v16  }
  0x79   : >> { %897 = vperm.xlu1 %2981, %v4790_v5  }
  0x7c   : >> { %1110 = vperm.xlu0 %2980, %v1094_v37  }
  0x7d   : >> { %954 = vperm.xlu1 %2981, %v4801_v21  }
  0x80   : >> { %2205 = vperm.xlu0 %2980, %v2189_v39  }
  0x81   : >> { %1115 = vperm.xlu1 %2981, %v1095_v41  }
  0x85   : >> { %2210 = vperm.xlu1 %2981, %v2190_v43  }
  0xdf   : >> { %v3566_v47 = vpop.permute.xlu0 %461 }
  0xe0   : >> { %v477_v54 = vmul.f32 %v472_v49, %v3566_v47  ;;  %v478_v55 = vmul.f32 %v476_v50, %v3566_v47 }
  0xe3   : >> { %v3574_v51 = vpop.permute.xlu0 %466 }
  0xe4   : >> { %v484_v57 = vpop.permute.xlu1 %483  ;;  %v479_v8 = vmul.f32 %v472_v49, %v3574_v51  ;;  %v480_v14 = vmul.f32 %v476_v50, %v3574_v51 }
  0xe5   : >> { %v491_v60 = vadd.f32 %v484_v57, %v477_v54  ;;  %v492_v61 = vadd.f32 %v484_v57, %v478_v55 }
  0xe7   : >> { %v3582_v56 = vpop.permute.xlu0 %497 }
  0xe8   : >> { %4802 = vst [vmem:[#allocation30_spill] sm:$0xff] %v3582_v56  ;;  %v513_v58 = vmul.f32 %v508_v52, %v3582_v56  ;;  %v514_v59 = vmul.f32 %v512_v53, %v3582_v56  ;;  %v489_v6 = vpop.permute.xlu1 %488 }
  0xe9   : >> { %v493_v17 = vadd.f32 %v489_v6, %v479_v8  ;;  %v494_v25 = vadd.f32 %v489_v6, %v480_v14 }
  0xea   : >> { %v3586_v62 = vadd.f32 %v513_v58, %v491_v60  ;;  %v3588_v63 = vadd.f32 %v514_v59, %v492_v61 }
  0xec   : >> { %v526_v7 = vand.u32 2147483647, %v3588_v63  ;;  %v525_v12 = vand.u32 2147483647, %v3586_v62  ;;  %2982 = vtanh.f32 %v3586_v62  ;;  %v3597_v18 = vpop.permute.xlu1 %502 }
  0xed   : >> { %4803 = vst [vmem:[#allocation31_spill] sm:$0xff] %v3597_v18  ;;  %v516_v29 = vmul.f32 %v512_v53, %v3597_v18  ;;  %v515_v30 = vmul.f32 %v508_v52, %v3597_v18  ;;  %2984 = vtanh.f32 %v3588_v63 }
  0xee   : >> { %v530_v15 = vmul.f32 -2.0, %v526_v7  ;;  %v529_v24 = vmul.f32 -2.0, %v525_v12 }
  0xef   : >> { %v3604_v33 = vadd.f32 %v516_v29, %v494_v25  ;;  %v3606_v34 = vadd.f32 %v515_v30, %v493_v17 }
  0xf0   : >> { %v535_v31 = vmul.f32 1.442695, %v530_v15  ;;  %v533_v32 = vmul.f32 1.442695, %v529_v24 }
  0xf1   : >> { %v528_v35 = vand.u32 2147483647, %v3604_v33  ;;  %v527_v36 = vand.u32 2147483647, %v3606_v34 }
  0xf2   : >> { %2986 = vpow2.f32 %v535_v31 }
  0xf3   : >> { %2988 = vpow2.f32 %v533_v32  ;;  %v532_v37 = vmul.f32 -2.0, %v528_v35  ;;  %v531_v38 = vmul.f32 -2.0, %v527_v36 }
  0xf4   : >> { %2990 = vtanh.f32 %v3604_v33 }
  0xf5   : >> { %2992 = vtanh.f32 %v3606_v34  ;;  %v539_v39 = vmul.f32 1.442695, %v532_v37  ;;  %v537_v40 = vmul.f32 1.442695, %v531_v38 }
  0xf6   : >> { %v3616_v41 = vpop.eup %2982 }
  0xf7   : >> { %2994 = vpow2.f32 %v539_v39  ;;  %v3618_v42 = vpop.eup %2984  ;;  %v581_v55 = vmul.f32 %v3616_v41, %v3566_v47 }
  0xf8   : >> { %2996 = vpow2.f32 %v537_v40  ;;  %v582_v53 = vmul.f32 %v3618_v42, %v3566_v47 }
  0xfc   : >> { %v2987_v43 = vpop.eup %2986 }
  0xfd   : >> { %v2989_v44 = vpop.eup %2988  ;;  %v550_v45 = vadd.f32 1.0, %v2987_v43  ;;  %v553_v14 = vmul.f32 -0.5, %v2987_v43  ;;  %v556_v31 = vand.u32 2147483647, %v2987_v43 }
  0xfe   : >> { %v3620_v49 = vpop.eup %2990  ;;  %v541_v50 = vadd.f32 1.0, %v2989_v44  ;;  %v544_v15 = vmul.f32 -0.5, %v2989_v44  ;;  %v547_v39 = vand.u32 2147483647, %v2989_v44 }
  0xff   : >> { %v3622_v52 = vpop.eup %2992  ;;  %v584_v54 = vmul.f32 %v3620_v49, %v3574_v51  ;;  %2998 = vlog2.f32 %v550_v45  ;;  %v554_v30 = vadd.f32 1.0, %v553_v14  ;;  %vm557_vm2 = vcmp.lt.f32.partialorder %v556_v31, 0.0004427343 }
 0x100   : >> { %v583_v57 = vmul.f32 %v3622_v52, %v3574_v51  ;;  %3000 = vlog2.f32 %v541_v50  ;;  %v545_v32 = vadd.f32 1.0, %v544_v15  ;;  %vm548_vm3 = vcmp.lt.f32.partialorder %v547_v39, 0.0004427343 }
 0x101   : >> { %v649_v58 = vpack.c.bf16 %v584_v54, %v582_v53  ;;  %v2995_v60 = vpop.eup %2994  ;;  %v555_v53 = vmul.f32 %v2987_v43, %v554_v30  ;;  %v587_v63 = vmul.f32 %v3622_v52, %v3597_v18 }
 0x102   : >> { %v648_v59 = vpack.c.bf16 %v583_v57, %v581_v55  ;;  %v2997_v61 = vpop.eup %2996  ;;  %v568_v6 = vadd.f32 1.0, %v2995_v60  ;;  %v571_v17 = vmul.f32 -0.5, %v2995_v60  ;;  %v574_v40 = vand.u32 2147483647, %v2995_v60 }
 0x103   : >> { %650 = vmatprep.subr.bf16.mxu1 %v649_v58  ;;  %v559_v8 = vadd.f32 1.0, %v2997_v61  ;;  %v562_v25 = vmul.f32 -0.5, %v2997_v61  ;;  %v565_v54 = vand.u32 2147483647, %v2997_v61  ;;  %v546_v57 = vmul.f32 %v2989_v44, %v545_v32  ;;  %v3657_v32 = vpop.permute.xlu0 %593 }
 0x104   : >> { %651 = vmatpush1.bf16.msra.mxu1 %v648_v59  ;;  %3002 = vlog2.f32 %v568_v6  ;;  %v572_v38 = vadd.f32 1.0, %v571_v17  ;;  %vm575_vm4 = vcmp.lt.f32.partialorder %v574_v40, 0.0004427343  ;;  %v588_v44 = vmul.f32 %v3620_v49, %v3597_v18  ;;  %4805 = vst [vmem:[#allocation32_spill] sm:$0xff] %v3657_v32  ;;  %v3660_v40 = vpop.permute.xlu1 %598 }
 0x105   : >> { %3004 = vlog2.f32 %v559_v8  ;;  %v563_v50 = vadd.f32 1.0, %v562_v25  ;;  %vm566_vm5 = vcmp.lt.f32.partialorder %v565_v54, 0.0004427343  ;;  %4806 = vst [vmem:[#allocation33_spill] sm:$0xff] %v3660_v40 }
 0x106   : >> { %v573_v8 = vmul.f32 %v2995_v60, %v572_v38 }
 0x107   : >> { %2874 = vmatmul.mubr.msk.bf16.vlgmr.msra.gmra.mrb[0].mxu1 %vm601_vm1, %v4786_v20  ;;  %v564_v15 = vmul.f32 %v2997_v61, %v563_v50  ;;  %v586_v61 = vmul.f32 %v3618_v42, %v3582_v56 }
 0x108   : >> { %793 = vmatprep.mubr.bf16.mxu1 %v4677_v28 }
 0x109   : >> { %v2999_v24 = vpop.eup %2998 }
 0x10a   : >> { %v3001_v29 = vpop.eup %3000  ;;  %v552_v37 = vmul.f32 0.6931472, %v2999_v24 }
 0x10b   : >> { %v543_v45 = vmul.f32 0.6931472, %v3001_v29 }
 0x10c   : >> { %v558_v59 = vsel %vm557_vm2, %v555_v53, %v552_v37 }
 0x10d   : >> { %v549_v14 = vsel %vm548_vm3, %v546_v57, %v543_v45  ;;  %v578_v17 = vadd.f32 %v558_v59, %v526_v7  ;;  %v694_v7 = vpack.c.bf16 %v588_v44, %v586_v61 }
 0x10e   : >> { %v3003_v55 = vpop.eup %3002  ;;  %v577_v60 = vadd.f32 %v549_v14, %v525_v12  ;;  %v4804_v12 = vmov 0   ;;  %v3665_v14 = vpop.permute.xlu0 %744 }
 0x10f   : >> { %v3005_v58 = vpop.eup %3004  ;;  %v570_v6 = vmul.f32 0.6931472, %v3003_v55  ;;  %4807 = vst [vmem:[#allocation34_spill] sm:$0xff] %v3665_v14 }
 0x110   : >> { %v561_v28 = vmul.f32 0.6931472, %v3005_v58 }
 0x111   : >> { %v576_v24 = vsel %vm575_vm4, %v573_v8, %v570_v6 }
 0x112   : >> { %v580_v43 = vadd.f32 %v576_v24, %v528_v35  ;;  %v567_v25 = vsel %vm566_vm5, %v564_v15, %v561_v28  ;;  %v585_v28 = vmul.f32 %v3616_v41, %v3582_v56 }
 0x113   : >> { %v579_v29 = vadd.f32 %v567_v25, %v527_v36 }
 0x114   : >> { %v590_v30 = vpack.c.bf16 %v580_v43, %v578_v17  ;;  %v693_v62 = vpack.c.bf16 %v587_v63, %v585_v28  ;;  %v3668_v43 = vpop.permute.xlu1 %749 }
 0x115   : >> { %v589_v31 = vpack.c.bf16 %v579_v29, %v577_v60  ;;  %4808 = vst [vmem:[#allocation35_spill] sm:$0xff] %v3668_v43 }
 0x116   : >> { %605 = vmatprep.subr.bf16.mxu0 %v590_v30 }
 0x117   : >> { %606 = vmatpush1.bf16.msra.mxu0 %v589_v31 }
 0x118   : >> { %695 = vmatprep.subr.bf16.mxu0 %v694_v7  ;;  %v3779_v4 = vpop.permute.xlu1 %897 }
 0x11a   : >> { %2873 = vmatmul.mubr.msk.bf16.vlgmr.msra.gmra.mrb[0].mxu0 %vm601_vm1, %v4786_v20 }
 0x11b   : >> { %696 = vmatpush1.bf16.msra.mxu0 %v693_v62  ;;  %727 = vmatprep.mubr.bf16.mxu0 %v4804_v12 }
 0x122   : >> { %2875 = vmatmul.mubr.msk.bf16.vlgmr.msra.gmra.mrb[4].mxu0 %vm601_vm1, %v4786_v20 }
 0x123   : >> { %1240 = vmatprep.mubr.bf16.mxu0 %v4804_v12 }
 0x1da   : >> { %v684_v33 = vpop.f32.mrb[0].mxu1 }
 0x1db   : >> { %v686_v34 = vpop.f32.mrb[1].mxu1 }
 0x1dc   : >> { %v688_v35 = vpop.f32.mrb[2].mxu1 }
 0x1dd   : >> { %v690_v36 = vpop.f32.mrb[3].mxu1 }
 0x1ed   : >> { %v639_v37 = vpop.f32.mrb[0].mxu0 }
 0x1ee   : >> { %v640_v38 = vadd.f32 %v639_v37, %v3657_v32  ;;  %v641_v39 = vpop.f32.mrb[1].mxu0 }
 0x1ef   : >> { %v642_v45 = vadd.f32 %v641_v39, %v3657_v32  ;;  %v643_v50 = vpop.f32.mrb[2].mxu0 }
 0x1f0   : >> { %3006 = vtanh.f32 %v640_v38  ;;  %v644_v53 = vadd.f32 %v643_v50, %v3660_v40  ;;  %v645_v54 = vpop.f32.mrb[3].mxu0 }
 0x1f1   : >> { %3008 = vtanh.f32 %v642_v45  ;;  %v646_v55 = vadd.f32 %v645_v54, %v3660_v40 }
 0x1f2   : >> { %3010 = vtanh.f32 %v644_v53 }
 0x1f3   : >> { %3012 = vtanh.f32 %v646_v55 }
 0x1f5   : >> { %v729_v57 = vpop.f32.mrb[4].mxu0 }
 0x1f6   : >> { %v731_v58 = vpop.f32.mrb[5].mxu0 }
 0x1f7   : >> { %v733_v59 = vpop.f32.mrb[6].mxu0 }
 0x1f8   : >> { %v735_v6 = vpop.f32.mrb[7].mxu0 }
 0x1fa   : >> { %v3007_v8 = vpop.eup %3006 }
 0x1fb   : >> { %v3009_v15 = vpop.eup %3008  ;;  %v752_v24 = vmul.f32 %v3007_v8, %v3665_v14 }
 0x1fc   : >> { %v3011_v17 = vpop.eup %3010  ;;  %v753_v25 = vmul.f32 %v3009_v15, %v3665_v14 }
 0x1fd   : >> { %v3013_v44 = vpop.eup %3012  ;;  %v975_v60 = vmul.f32 %v3007_v8, %v752_v24  ;;  %v754_v29 = vmul.f32 %v3011_v17, %v3668_v43 }
 0x1fe   : >> { %v976_v30 = vmul.f32 %v3009_v15, %v753_v25  ;;  %v755_v61 = vmul.f32 %v3013_v44, %v3668_v43 }
 0x1ff   : >> { %v979_v31 = vsub.f32 %v3665_v14, %v975_v60  ;;  %v977_v63 = vmul.f32 %v3011_v17, %v754_v29  ;;  %v756_v7 = vpack.c.bf16 %v754_v29, %v752_v24 }
 0x200   : >> { %v980_v28 = vsub.f32 %v3665_v14, %v976_v30  ;;  %v757_v62 = vpack.c.bf16 %v755_v61, %v753_v25  ;;  %v978_v37 = vmul.f32 %v3013_v44, %v755_v61 }
 0x201   : >> { %v983_v38 = vmul.f32 %v979_v31, %v684_v33  ;;  %v1005_v39 = vmul.f32 %v979_v31, %v729_v57  ;;  %v981_v45 = vsub.f32 %v3668_v43, %v977_v63 }
 0x202   : >> { %v984_v50 = vmul.f32 %v980_v28, %v686_v34  ;;  %v1006_v53 = vmul.f32 %v980_v28, %v731_v58  ;;  %761 = vmatprep.subr.bf16.mxu1 %v757_v62  ;;  %v982_v54 = vsub.f32 %v3668_v43, %v978_v37 }
 0x203   : >> { %v987_v55 = vmul.f32 %v983_v38, %v684_v33  ;;  %v1009_v8 = vmul.f32 %v1005_v39, %v729_v57  ;;  %v985_v15 = vmul.f32 %v981_v45, %v688_v35  ;;  %v1007_v0 = vmul.f32 %v981_v45, %v733_v59  ;;  %762 = vmatpush1.bf16.msra.mxu1 %v756_v7 }
 0x204   : >> { %v988_v17 = vmul.f32 %v984_v50, %v686_v34  ;;  %v1010_v24 = vmul.f32 %v1006_v53, %v731_v58  ;;  %v986_v60 = vmul.f32 %v982_v54, %v690_v36  ;;  %v1008_v29 = vmul.f32 %v982_v54, %v735_v6 }
 0x205   : >> { %v989_v25 = vmul.f32 %v985_v15, %v688_v35  ;;  %v1011_v44 = vmul.f32 %v1007_v0, %v733_v59 }
 0x206   : >> { %v990_v30 = vmul.f32 %v986_v60, %v690_v36  ;;  %v1012_v61 = vmul.f32 %v1008_v29, %v735_v6  ;;  %2876 = vmatmul.mubr.msk.bf16.vlgmr.msra.gmra.mrb[4].mxu1 %vm601_vm1, %v4787_v23 }
 0x207   : >> { %v991_v31 = vadd.f32 %v989_v25, %v987_v55  ;;  %v1013_v63 = vadd.f32 %v1011_v44, %v1009_v8  ;;  %1285 = vmatprep.mubr.bf16.mxu1 %v4804_v12 }
 0x208   : >> { %v998_v33 = vadd.f32 %v990_v30, %v988_v17  ;;  %v1020_v57 = vadd.f32 %v1012_v61, %v1010_v24  ;;  %v3685_v30 = vstv %s3484_s29  ;;  %v3688_v61 = vstv %s3486_s30 }
 0x209   : >> { %v992_v28 = vrot.slane %v991_v31, 4  ;;  %v1014_v62 = vrot.slane %v1013_v63, 4  ;;  %4811 = vst [vmem:[#allocation36_spill] sm:$0xff] %v3685_v30  ;;  %4812 = vst [vmem:[#allocation37_spill] sm:$0xff] %v3688_v61 }
 0x20a   : >> { %v999_v7 = vrot.slane %v998_v33, 4  ;;  %v1021_v34 = vrot.slane %v1020_v57, 4 }
 0x20b   : >> { %v993_v58 = vadd.f32 %v992_v28, %v991_v31  ;;  %v1015_v37 = vadd.f32 %v1014_v62, %v1013_v63  ;;  %v3691_v31 = vstv %s4809_s2  ;;  %v3694_v63 = vstv %s3438_s26  ;;  %s3744_s2 = sadd.f32 %s3498_s4, %s885_s7 }
 0x20c   : >> { %v1000_v38 = vadd.f32 %v999_v7, %v998_v33  ;;  %v1022_v35 = vadd.f32 %v1021_v34, %v1020_v57  ;;  %4813 = vst [vmem:[#allocation38_spill] sm:$0xff] %v3691_v31  ;;  %4814 = vst [vmem:[#allocation39_spill] sm:$0xff] %v3694_v63  ;;  %v3698_v33 = vmul.f32 %v3230_v26, %v3685_v30  ;;  %v3703_v57 = vstv %s3468_s11 }
 0x20d   : >> { %v994_v0 = vrot.slane %v993_v58, 2  ;;  %v1016_v36 = vrot.slane %v1015_v37, 2  ;;  %4815 = vst [vmem:[#allocation40_spill] sm:$0xff] %v3703_v57  ;;  %v3707_v28 = vmul.f32 %v3230_v26, %v3688_v61  ;;  %v3712_v62 = vstv %s4810_s1  ;;  %s3729_s1 = sadd.f32 %s846_s6, %s3496_s3  ;;  %s934_s6 = smul.f32 %s3494_s19, %s3530_s22 }
 0x20e   : >> { %v1001_v59 = vrot.slane %v1000_v38, 2  ;;  %v1023_v6 = vrot.slane %v1022_v35, 2  ;;  %4816 = vst [vmem:[#allocation41_spill] sm:$0xff] %v3712_v62  ;;  %v3716_v7 = vmul.f32 %v3230_v26, %v3691_v31 }
 0x20f   : >> { %v995_v39 = vadd.f32 %v994_v0, %v993_v58  ;;  %v1017_v45 = vadd.f32 %v1016_v36, %v1015_v37  ;;  %v3720_v58 = vmul.f32 %v3230_v26, %v3694_v63  ;;  %v3724_v37 = vmul.f32 %v3230_v26, %v3703_v57  ;;  %s3806_s7 = sadd.f32 %s3500_s27, %s934_s6 }
 0x210   : >> { %v1002_v50 = vadd.f32 %v1001_v59, %v1000_v38  ;;  %v1024_v53 = vadd.f32 %v1023_v6, %v1022_v35  ;;  %v3733_v36 = vmul.f32 %v3226_v27, %v3685_v30  ;;  %v3737_v59 = vmul.f32 %v3226_v27, %v3688_v61  ;;  %v3739_v6 = vpop.permute.xlu0 %892 }
 0x211   : >> { %v996_v54 = vrot.slane %v995_v39, 1  ;;  %v1018_v55 = vrot.slane %v1017_v45, 1  ;;  %4817 = vst [vmem:[#allocation42_spill] sm:$0xff] %v3739_v6 }
 0x212   : >> { %v1003_v8 = vrot.slane %v1002_v50, 1  ;;  %v1025_v15 = vrot.slane %v1024_v53, 1 }
 0x213   : >> { %v997_v17 = vadd.f32 %v996_v54, %v995_v39  ;;  %v1019_v24 = vadd.f32 %v1018_v55, %v1017_v45  ;;  %v3752_v54 = vmul.f32 %v3226_v27, %v3694_v63 }
 0x214   : >> { %v1004_v60 = vadd.f32 %v1003_v8, %v1002_v50  ;;  %v1026_v29 = vadd.f32 %v1025_v15, %v1024_v53  ;;  %v3748_v53 = vmul.f32 %v3230_v26, %v3712_v62  ;;  %v3784_v15 = vpop.permute.xlu0 %949 }
 0x215   : >> { %v3680_v25 = vadd.f32 %v1019_v24, %v997_v17  ;;  %v3759_v24 = vmul.f32 %v3226_v27, %v3703_v57  ;;  %4818 = vst [vmem:[#allocation43_spill] sm:$0xff] %v3784_v15 }
 0x216   : >> { %v3682_v44 = vadd.f32 %v1026_v29, %v1004_v60 }
 0x2d9   : >> { %v795_v34 = vpop.f32.mrb[4].mxu1 }
 0x2da   : >> { %v804_v38 = vadd.f32 %v795_v34, %v3665_v14  ;;  %v797_v35 = vpop.f32.mrb[5].mxu1  ;;  %v3765_v34 = vmul.f32 %v3226_v27, %v3712_v62 }
 0x2db   : >> { %v805_v39 = vadd.f32 %v797_v35, %v3665_v14  ;;  %v799_v45 = vpop.f32.mrb[6].mxu1  ;;  %v3769_v35 = vmul.f32 %v3226_v27, %v3691_v31  ;;  %v3799_v31 = vpop.permute.xlu1 %954 }
 0x2dc   : >> { %v808_v55 = vmul.f32 %v3616_v41, %v804_v38  ;;  %v806_v8 = vadd.f32 %v799_v45, %v3668_v43  ;;  %v801_v17 = vpop.f32.mrb[7].mxu1 }
 0x2dd   : >> { %v809_v60 = vmul.f32 %v3618_v42, %v805_v39  ;;  %v807_v29 = vadd.f32 %v801_v17, %v3668_v43 }
 0x2de   : >> { %v939_v45 = vmul.f32 %v3616_v41, %v808_v55  ;;  %v812_v1 = vmul.f32 %v808_v55, %v3566_v47  ;;  %v851_v2 = vmul.f32 %v808_v55, %v3582_v56  ;;  %v900_v5 = vmul.f32 %v3739_v6, %v808_v55 }
 0x2df   : >> { %v940_v17 = vmul.f32 %v3618_v42, %v809_v60  ;;  %v810_v10 = vmul.f32 %v3622_v52, %v806_v8  ;;  %v811_v41 = vmul.f32 %v3620_v49, %v807_v29  ;;  %v813_v0 = vmul.f32 %v809_v60, %v3566_v47 }
 0x2e0   : >> { %v943_v9 = vsub.f32 %v804_v38, %v939_v45  ;;  %v852_v50 = vmul.f32 %v809_v60, %v3582_v56  ;;  %v901_v11 = vmul.f32 %v3739_v6, %v809_v60 }
 0x2e1   : >> { %v944_v13 = vsub.f32 %v805_v39, %v940_v17  ;;  %v814_v3 = vmul.f32 %v810_v10, %v3574_v51  ;;  %v853_v55 = vmul.f32 %v810_v10, %v3597_v18  ;;  %v902_v38 = vmul.f32 %v3779_v4, %v810_v10 }
 0x2e2   : >> { %v957_v42 = vmul.f32 %v3784_v15, %v943_v9  ;;  %v941_v16 = vmul.f32 %v3622_v52, %v810_v10  ;;  %v815_v19 = vmul.f32 %v811_v41, %v3574_v51  ;;  %v854_v21 = vmul.f32 %v811_v41, %v3597_v18 }
 0x2e3   : >> { %v958_v45 = vmul.f32 %v3784_v15, %v944_v13  ;;  %v816_v22 = vadd.f32 %v814_v3, %v812_v1  ;;  %v855_v62 = vadd.f32 %v853_v55, %v851_v2  ;;  %v904_v60 = vadd.f32 %v902_v38, %v900_v5 }
 0x2e4   : >> { %v903_v39 = vmul.f32 %v3779_v4, %v811_v41  ;;  %v945_v9 = vsub.f32 %v806_v8, %v941_v16  ;;  %v823_v17 = vadd.f32 %v815_v19, %v813_v0  ;;  %v862_v6 = vadd.f32 %v854_v21, %v852_v50 }
 0x2e5   : >> { %v942_v57 = vmul.f32 %v3620_v49, %v811_v41  ;;  %v817_v63 = vrot.slane %v816_v22, 4  ;;  %v856_v13 = vrot.slane %v855_v62, 4  ;;  %v905_v15 = vrot.slane %v904_v60, 4 }
 0x2e6   : >> { %v911_v10 = vadd.f32 %v903_v39, %v901_v11  ;;  %v959_v52 = vmul.f32 %v3799_v31, %v945_v9  ;;  %v824_v61 = vrot.slane %v823_v17, 4  ;;  %v863_v30 = vrot.slane %v862_v6, 4 }
 0x2e7   : >> { %v946_v1 = vsub.f32 %v807_v29, %v942_v57  ;;  %v818_v2 = vadd.f32 %v817_v63, %v816_v22  ;;  %v857_v3 = vadd.f32 %v856_v13, %v855_v62  ;;  %v906_v5 = vadd.f32 %v905_v15, %v904_v60 }
 0x2e8   : >> { %v912_v55 = vrot.slane %v911_v10, 4  ;;  %v961_v16 = vadd.f32 %v959_v52, %v957_v42  ;;  %v825_v19 = vadd.f32 %v824_v61, %v823_v17  ;;  %v864_v21 = vadd.f32 %v863_v30, %v862_v6 }
 0x2e9   : >> { %v960_v49 = vmul.f32 %v3799_v31, %v946_v1  ;;  %v819_v0 = vrot.slane %v818_v2, 2  ;;  %v858_v50 = vrot.slane %v857_v3, 2  ;;  %v907_v8 = vrot.slane %v906_v5, 2 }
 0x2ea   : >> { %v913_v11 = vadd.f32 %v912_v55, %v911_v10  ;;  %v962_v41 = vrot.slane %v961_v16, 4  ;;  %v826_v38 = vrot.slane %v825_v19, 2  ;;  %v865_v39 = vrot.slane %v864_v21, 2 }
 0x2eb   : >> { %v968_v9 = vadd.f32 %v960_v49, %v958_v45  ;;  %v820_v57 = vadd.f32 %v819_v0, %v818_v2  ;;  %v859_v22 = vadd.f32 %v858_v50, %v857_v3  ;;  %v908_v63 = vadd.f32 %v907_v8, %v906_v5 }
 0x2ec   : >> { %v914_v62 = vrot.slane %v913_v11, 2  ;;  %v963_v15 = vadd.f32 %v962_v41, %v961_v16  ;;  %v827_v29 = vadd.f32 %v826_v38, %v825_v19  ;;  %v866_v61 = vadd.f32 %v865_v39, %v864_v21 }
 0x2ed   : >> { %v969_v30 = vrot.slane %v968_v9, 4  ;;  %v821_v6 = vrot.slane %v820_v57, 1  ;;  %v860_v42 = vrot.slane %v859_v22, 1  ;;  %v909_v60 = vrot.slane %v908_v63, 1 }
 0x2ee   : >> { %v915_v17 = vadd.f32 %v914_v62, %v913_v11  ;;  %v964_v13 = vrot.slane %v963_v15, 2  ;;  %v828_v10 = vrot.slane %v827_v29, 1  ;;  %v867_v52 = vrot.slane %v866_v61, 1 }
 0x2ef   : >> { %v970_v1 = vadd.f32 %v969_v30, %v968_v9  ;;  %v822_v55 = vadd.f32 %v821_v6, %v820_v57  ;;  %v861_v45 = vadd.f32 %v860_v42, %v859_v22  ;;  %v910_v2 = vadd.f32 %v909_v60, %v908_v63 }
 0x2f0   : >> { %v916_v3 = vrot.slane %v915_v17, 1  ;;  %v965_v5 = vadd.f32 %v964_v13, %v963_v15  ;;  %v829_v16 = vadd.f32 %v828_v10, %v827_v29  ;;  %v868_v19 = vadd.f32 %v867_v52, %v866_v61 }
 0x2f1   : >> { %v971_v21 = vrot.slane %v970_v1, 2  ;;  %v833_v49 = vadd.f32 %v3720_v58, %v822_v55  ;;  %v872_v0 = vadd.f32 %v3724_v37, %v861_v45  ;;  %v929_v8 = vrot.slane %v3769_v35, 1 }
 0x2f2   : >> { %v917_v50 = vadd.f32 %v916_v3, %v915_v17  ;;  %v966_v11 = vrot.slane %v965_v5, 1  ;;  %v834_v41 = vadd.f32 %v3752_v54, %v829_v16  ;;  %v873_v38 = vadd.f32 %v3759_v24, %v868_v19 }
 0x2f3   : >> { %v972_v39 = vadd.f32 %v971_v21, %v970_v1  ;;  %v4819_v9 = vrot.slane %v3698_v33, 1  ;;  %v4820_v58 = vrot.slane %v3707_v28, 1  ;;  %v921_v37 = vadd.f32 %v3748_v53, %v910_v2 }
 0x2f4   : >> { %v936_v63 = vstv %s3806_s7  ;;  %v967_v62 = vadd.f32 %v966_v11, %v965_v5  ;;  %v4821_v35 = vrot.slane %v3733_v36, 1  ;;  %v4822_v54 = vrot.slane %v3737_v59, 1  ;;  %s1508_s7 = smul.f32 %s3494_s19, %s3541_s14 }
 0x2f5   : >> { %v844_v57 = vadd.f32 %v4819_v9, %v833_v49  ;;  %v883_v22 = vadd.f32 %v4820_v58, %v872_v0  ;;  %v973_v61 = vrot.slane %v972_v39, 1  ;;  %v4823_v24 = vstv %s3729_s1  ;;  %s1471_s1 = smul.f32 %s3492_s13, %s3541_s14 }
 0x2f6   : >> { %v845_v15 = vadd.f32 %v4821_v35, %v834_v41  ;;  %v884_v29 = vadd.f32 %v4822_v54, %v873_v38  ;;  %v4824_v6 = vstv %s3744_s2  ;;  %v3828_v33 = vstv %s3502_s12  ;;  %s1434_s2 = smul.f32 %s3490_s28, %s3541_s14  ;;  %s1509_s14 = sadd.f32 %s3500_s27, %s1508_s7 }
 0x2f7   : >> { %v849_v30 = vadd.f32 %v4823_v24, %v844_v57  ;;  %v888_v42 = vadd.f32 %v4824_v6, %v883_v22  ;;  %v922_v28 = vadd.f32 %v3765_v34, %v917_v50  ;;  %v1029_v60 = vadd.f32 %v3680_v25, %v967_v62  ;;  %s1472_s6 = sadd.f32 %s3498_s4, %s1471_s1  ;;  %s2566_s1 = smul.f32 %s3492_s13, %s3547_s5 }
 0x2f8   : >> { %v4825_v53 = vmov %v4823_v24  ;;  %v4826_v13 = vmov %v4824_v6  ;;  %v974_v36 = vadd.f32 %v973_v61, %v972_v39  ;;  %v4827_v52 = vrot.slane %v3716_v7, 1  ;;  %s1435_s22 = sadd.f32 %s1434_s2, %s3496_s3  ;;  %s2529_s2 = smul.f32 %s3490_s28, %s3547_s5 }
 0x2f9   : >> { %v850_v17 = vadd.f32 %v4825_v53, %v845_v15  ;;  %v889_v10 = vadd.f32 %v4826_v13, %v884_v29  ;;  %v1034_v1 = vmul.f32 -1.0, %v849_v30  ;;  %v1036_v55 = vmul.f32 -1.0, %v888_v42  ;;  %s4476_s7 = sadd.f32 %s3498_s4, %s2566_s1 }
 0x2fa   : >> { %v932_v59 = vadd.f32 %v4827_v52, %v921_v37  ;;  %v1032_v45 = vadd.f32 %v3828_v33, %v1029_v60  ;;  %v1030_v2 = vadd.f32 %v3682_v44, %v974_v36  ;;  %v933_v19 = vadd.f32 %v929_v8, %v922_v28 }
 0x2fb   : >> { %v1035_v3 = vmul.f32 -1.0, %v850_v17  ;;  %v1037_v5 = vmul.f32 -1.0, %v889_v10  ;;  %v1040_v34 = vmul.f32 %v1034_v1, %v1034_v1  ;;  %v1042_v16 = vmul.f32 %v1036_v55, %v1036_v55 }
 0x2fc   : >> { %v1054_v25 = vrot.slane %v1036_v55, 7  ;;  %v1038_v21 = vmul.f32 -1.0, %v1032_v45  ;;  %v1033_v49 = vadd.f32 %v3828_v33, %v1030_v2  ;;  %v937_v44 = vadd.f32 %v936_v63, %v932_v59 }
 0x2fd   : >> { %v1041_v0 = vmul.f32 %v1035_v3, %v1035_v3  ;;  %v1043_v50 = vmul.f32 %v1037_v5, %v1037_v5  ;;  %v1044_v7 = vadd.f32 %v1042_v16, %v1040_v34  ;;  %v1055_v41 = vrot.slane %v1037_v5, 7  ;;  %v3873_v5 = vpop.permute.xlu1 %1115 }
 0x2fe   : >> { %v1071_v11 = vsel %vm1070_vm6, %v1034_v1, %v1054_v25  ;;  %v1039_v39 = vmul.f32 -1.0, %v1033_v49  ;;  %v938_v22 = vadd.f32 %v936_v63, %v933_v19 }
 0x2ff   : >> { %v1073_v38 = vsel %vm439_vm0, %v1071_v11, %v1038_v21  ;;  %v1045_v9 = vadd.f32 %v1043_v50, %v1041_v0  ;;  %v1046_v57 = vmul.f32 0.5, %v1044_v7  ;;  %v1072_v58 = vsel %vm1070_vm6, %v1035_v3, %v1055_v41  ;;  %v3871_v3 = vpop.permute.xlu0 %1110 }
 0x300   : >> { %v1074_v37 = vsel %vm439_vm0, %v1072_v58, %v1039_v39 }
 0x301   : >> { %v1047_v8 = vmul.f32 0.5, %v1045_v9  ;;  %v1048_v62 = vsub.f32 %v1046_v57, %v937_v44  ;;  %v1060_v35 = vrot.slane %v1046_v57, 5 }
 0x303   : >> { %v1049_v15 = vsub.f32 %v1047_v8, %v938_v22  ;;  %v1061_v54 = vrot.slane %v1047_v8, 5  ;;  %v1050_v29 = vand.u32 2147483647, %v1048_v62  ;;  %v1076_v61 = vsel %vm1075_vm7, %v1073_v38, %v1060_v35 }
 0x305   : >> { %v1051_v24 = vand.u32 2147483647, %v1049_v15  ;;  %v1077_v30 = vsel %vm1075_vm7, %v1074_v37, %v1061_v54  ;;  %v1066_v6 = vrot.slane %v1050_v29, 4 }
 0x307   : >> { %v1067_v42 = vrot.slane %v1051_v24, 4  ;;  %v1079_v28 = vsel %vm1078_vm8, %v1076_v61, %v1066_v6 }
 0x308   : >> { %v3848_v60 = vmul.f32 0.125, %v1079_v28 }
 0x309   : >> { %v1080_v63 = vsel %vm1078_vm8, %v1077_v30, %v1067_v42 }
 0x30a   : >> { %v3851_v53 = vmul.f32 0.125, %v1080_v63  ;;  %v1087_v17 = vmul.f32 0.5, %v3848_v60 }
 0x30c   : >> { %v1088_v13 = vmul.f32 0.5, %v3851_v53  ;;  %v3856_v10 = vadd.f32 %v3230_v26, %v1087_v17 }
 0x30e   : >> { %v3859_v36 = vadd.f32 %v3226_v27, %v1088_v13  ;;  %v1099_v52 = vrot.slane %v3856_v10, %v3564_v46  ;;  %v1125_v59 = vrot.slane %v3856_v10, %v3568_v48 }
 0x310   : >> { %v1103_v1 = vrot.slane %v3859_v36, %v3564_v46  ;;  %v1129_v55 = vrot.slane %v3859_v36, %v3568_v48  ;;  %v1104_v45 = vmul.f32 %v1099_v52, %v3566_v47  ;;  %v1106_v2 = vmul.f32 %v1099_v52, %v3574_v51 }
 0x311   : >> { %v1130_v21 = vmul.f32 %v1125_v59, %v3582_v56  ;;  %v1132_v49 = vmul.f32 %v1125_v59, %v3597_v18 }
 0x312   : >> { %v1105_v34 = vmul.f32 %v1103_v1, %v3566_v47  ;;  %v1107_v16 = vmul.f32 %v1103_v1, %v3574_v51  ;;  %v1118_v25 = vadd.f32 %v3871_v3, %v1104_v45  ;;  %v1120_v19 = vadd.f32 %v3873_v5, %v1106_v2 }
 0x313   : >> { %v1131_v7 = vmul.f32 %v1129_v55, %v3582_v56  ;;  %v1133_v11 = vmul.f32 %v1129_v55, %v3597_v18 }
 0x314   : >> { %v1119_v0 = vadd.f32 %v3871_v3, %v1105_v34  ;;  %v1121_v50 = vadd.f32 %v3873_v5, %v1107_v16  ;;  %v3885_v41 = vadd.f32 %v1130_v21, %v1118_v25  ;;  %v3887_v38 = vadd.f32 %v1132_v49, %v1120_v19 }
 0x316   : >> { %v3889_v39 = vadd.f32 %v1131_v7, %v1119_v0  ;;  %v3891_v9 = vadd.f32 %v1133_v11, %v1121_v50  ;;  %3014 = vtanh.f32 %v3885_v41  ;;  %v1142_v44 = vand.u32 2147483647, %v3885_v41 }
 0x317   : >> { %v1144_v57 = vand.u32 2147483647, %v3887_v38 }
 0x318   : >> { %3016 = vtanh.f32 %v3889_v39  ;;  %v1143_v58 = vand.u32 2147483647, %v3889_v39  ;;  %v1145_v22 = vand.u32 2147483647, %v3891_v9  ;;  %v1146_v8 = vmul.f32 -2.0, %v1142_v44 }
 0x319   : >> { %3018 = vtanh.f32 %v3891_v9  ;;  %v1148_v37 = vmul.f32 -2.0, %v1144_v57 }
 0x31a   : >> { %3020 = vtanh.f32 %v3887_v38  ;;  %v1147_v62 = vmul.f32 -2.0, %v1143_v58  ;;  %v1149_v35 = vmul.f32 -2.0, %v1145_v22  ;;  %v1150_v15 = vmul.f32 1.442695, %v1146_v8 }
 0x31b   : >> { %v1154_v61 = vmul.f32 1.442695, %v1148_v37 }
 0x31c   : >> { %v1152_v54 = vmul.f32 1.442695, %v1147_v62  ;;  %v1156_v29 = vmul.f32 1.442695, %v1149_v35  ;;  %3022 = vpow2.f32 %v1150_v15 }
 0x31e   : >> { %3024 = vpow2.f32 %v1152_v54 }
 0x31f   : >> { %3026 = vpow2.f32 %v1156_v29 }
 0x320   : >> { %3028 = vpow2.f32 %v1154_v61  ;;  %v3909_v24 = vpop.eup %3014 }
 0x321   : >> { %v1198_v28 = vmul.f32 %v3909_v24, %v3566_v47 }
 0x322   : >> { %v3911_v30 = vpop.eup %3016 }
 0x323   : >> { %v3913_v6 = vpop.eup %3018  ;;  %v1199_v42 = vmul.f32 %v3911_v30, %v3566_v47 }
 0x324   : >> { %v3919_v63 = vpop.eup %3020  ;;  %v1201_v17 = vmul.f32 %v3913_v6, %v3574_v51 }
 0x325   : >> { %v1200_v13 = vmul.f32 %v3919_v63, %v3574_v51  ;;  %v1204_v41 = vmul.f32 %v3919_v63, %v3597_v18 }
 0x326   : >> { %v1252_v52 = vpack.c.bf16 %v1201_v17, %v1199_v42  ;;  %v3023_v59 = vpop.eup %3022 }
 0x327   : >> { %v1251_v1 = vpack.c.bf16 %v1200_v13, %v1198_v28  ;;  %v1158_v45 = vadd.f32 1.0, %v3023_v59  ;;  %v1161_v49 = vmul.f32 -0.5, %v3023_v59  ;;  %v1164_v62 = vand.u32 2147483647, %v3023_v59 }
 0x328   : >> { %v3025_v55 = vpop.eup %3024  ;;  %1253 = vmatprep.subr.bf16.mxu1 %v1252_v52 }
 0x329   : >> { %v3027_v2 = vpop.eup %3026  ;;  %1254 = vmatpush1.bf16.msra.mxu1 %v1251_v1  ;;  %v1167_v34 = vadd.f32 1.0, %v3025_v55  ;;  %3030 = vlog2.f32 %v1158_v45  ;;  %v1170_v21 = vmul.f32 -0.5, %v3025_v55  ;;  %v1173_v50 = vand.u32 2147483647, %v3025_v55 }
 0x32a   : >> { %v3029_v16 = vpop.eup %3028  ;;  %v1185_v25 = vadd.f32 1.0, %v3027_v2  ;;  %v1188_v0 = vmul.f32 -0.5, %v3027_v2  ;;  %v1162_v11 = vadd.f32 1.0, %v1161_v49  ;;  %v1191_v15 = vand.u32 2147483647, %v3027_v2 }
 0x32b   : >> { %3032 = vlog2.f32 %v1167_v34  ;;  %v1176_v19 = vadd.f32 1.0, %v3029_v16  ;;  %v1171_v7 = vadd.f32 1.0, %v1170_v21  ;;  %v1179_v8 = vmul.f32 -0.5, %v3029_v16 }
 0x32c   : >> { %3034 = vlog2.f32 %v1185_v25  ;;  %2878 = vmatmul.mubr.msk.bf16.vlgmr.msra.gmra.mrb[8].mxu1 %vm601_vm1, %v4786_v20  ;;  %v1189_v37 = vadd.f32 1.0, %v1188_v0  ;;  %vm3928_vm9 = vcmp.lt.f32.partialorder %v1173_v50, 0.0004427343  ;;  %v1163_v13 = vmul.f32 %v3023_v59, %v1162_v11 }
 0x32d   : >> { %1383 = vmatprep.mubr.bf16.mxu1 %v4804_v12  ;;  %3036 = vlog2.f32 %v1176_v19  ;;  %v1172_v17 = vmul.f32 %v3025_v55, %v1171_v7  ;;  %v1180_v52 = vadd.f32 1.0, %v1179_v8  ;;  %vm1165_vm10 = vcmp.lt.f32.partialorder %v1164_v62, 0.0004427343 }
 0x32e   : >> { %v1190_v45 = vmul.f32 %v3027_v2, %v1189_v37  ;;  %v1182_v34 = vand.u32 2147483647, %v3029_v16  ;;  %vm1192_vm11 = vcmp.lt.f32.partialorder %v1191_v15, 0.0004427343  ;;  %v1203_v8 = vmul.f32 %v3911_v30, %v3582_v56 }
 0x32f   : >> { %v1181_v59 = vmul.f32 %v3029_v16, %v1180_v52  ;;  %v1205_v37 = vmul.f32 %v3913_v6, %v3597_v18 }
 0x330   : >> { %vm1183_vm12 = vcmp.lt.f32.partialorder %v1182_v34, 0.0004427343 }
 0x333   : >> { %v3031_v35 = vpop.eup %3030 }
 0x334   : >> { %v1160_v61 = vmul.f32 0.6931472, %v3031_v35 }
 0x335   : >> { %v3033_v54 = vpop.eup %3032 }
 0x336   : >> { %v3035_v42 = vpop.eup %3034  ;;  %v1169_v28 = vmul.f32 0.6931472, %v3033_v54  ;;  %v1166_v19 = vsel %vm1165_vm10, %v1163_v13, %v1160_v61 }
 0x337   : >> { %v1187_v1 = vmul.f32 0.6931472, %v3035_v42  ;;  %v3037_v21 = vpop.eup %3036  ;;  %v1194_v2 = vadd.f32 %v1166_v19, %v1142_v44  ;;  %v1297_v44 = vpack.c.bf16 %v1205_v37, %v1203_v8 }
 0x338   : >> { %v1175_v25 = vsel %vm3928_vm9, %v1172_v17, %v1169_v28  ;;  %v1178_v55 = vmul.f32 0.6931472, %v3037_v21 }
 0x339   : >> { %v1193_v49 = vsel %vm1192_vm11, %v1190_v45, %v1187_v1  ;;  %v1195_v0 = vadd.f32 %v1175_v25, %v1143_v58  ;;  %v1202_v58 = vmul.f32 %v3909_v24, %v3582_v56 }
 0x33a   : >> { %v1197_v50 = vadd.f32 %v1193_v49, %v1145_v22  ;;  %v1184_v11 = vsel %vm1183_vm12, %v1181_v59, %v1178_v55 }
 0x33b   : >> { %v1196_v39 = vadd.f32 %v1184_v11, %v1144_v57  ;;  %v1296_v22 = vpack.c.bf16 %v1204_v41, %v1202_v58 }
 0x33c   : >> { %v1207_v7 = vpack.c.bf16 %v1197_v50, %v1195_v0 }
 0x33d   : >> { %v1206_v9 = vpack.c.bf16 %v1196_v39, %v1194_v2 }
 0x33e   : >> { %1208 = vmatprep.subr.bf16.mxu0 %v1207_v7 }
 0x33f   : >> { %1209 = vmatpush1.bf16.msra.mxu0 %v1206_v9 }
 0x340   : >> { %1298 = vmatprep.subr.bf16.mxu0 %v1297_v44 }
 0x342   : >> { %2877 = vmatmul.mubr.msk.bf16.vlgmr.msra.gmra.mrb[8].mxu0 %vm601_vm1, %v4786_v20 }
 0x343   : >> { %1299 = vmatpush1.bf16.msra.mxu0 %v1296_v22  ;;  %1330 = vmatprep.mubr.bf16.mxu0 %v4804_v12 }
 0x34a   : >> { %2879 = vmatmul.mubr.msk.bf16.vlgmr.msra.gmra.mrb[12].mxu0 %vm601_vm1, %v4786_v20 }
 0x34b   : >> { %1785 = vmatprep.mubr.bf16.mxu0 %v4804_v12 }
 0x3ff   : >> { %v1287_v38 = vpop.f32.mrb[8].mxu1 }
 0x400   : >> { %v1289_v57 = vpop.f32.mrb[9].mxu1 }
 0x401   : >> { %v1291_v16 = vpop.f32.mrb[10].mxu1 }
 0x402   : >> { %v1293_v62 = vpop.f32.mrb[11].mxu1 }
 0x415   : >> { %v1242_v35 = vpop.f32.mrb[8].mxu0 }
 0x416   : >> { %v1243_v15 = vadd.f32 %v1242_v35, %v3657_v32  ;;  %v1244_v54 = vpop.f32.mrb[9].mxu0 }
 0x417   : >> { %v1245_v29 = vadd.f32 %v1244_v54, %v3657_v32  ;;  %v1246_v61 = vpop.f32.mrb[10].mxu0 }
 0x418   : >> { %3038 = vtanh.f32 %v1243_v15  ;;  %v1247_v42 = vadd.f32 %v1246_v61, %v3660_v40  ;;  %v1248_v28 = vpop.f32.mrb[11].mxu0 }
 0x419   : >> { %3040 = vtanh.f32 %v1245_v29  ;;  %v1249_v17 = vadd.f32 %v1248_v28, %v3660_v40 }
 0x41a   : >> { %3042 = vtanh.f32 %v1247_v42 }
 0x41b   : >> { %3044 = vtanh.f32 %v1249_v17 }
 0x41d   : >> { %v1332_v13 = vpop.f32.mrb[12].mxu0 }
 0x41e   : >> { %v1334_v52 = vpop.f32.mrb[13].mxu0 }
 0x41f   : >> { %v1336_v1 = vpop.f32.mrb[14].mxu0 }
 0x420   : >> { %v1338_v45 = vpop.f32.mrb[15].mxu0 }
 0x422   : >> { %v3039_v34 = vpop.eup %3038 }
 0x423   : >> { %v3041_v25 = vpop.eup %3040  ;;  %v1345_v19 = vmul.f32 %v3039_v34, %v3665_v14 }
 0x424   : >> { %v3043_v21 = vpop.eup %3042  ;;  %v1346_v49 = vmul.f32 %v3041_v25, %v3665_v14 }
 0x425   : >> { %v3045_v0 = vpop.eup %3044  ;;  %v1539_v50 = vmul.f32 %v3039_v34, %v1345_v19  ;;  %v1347_v55 = vmul.f32 %v3043_v21, %v3668_v43 }
 0x426   : >> { %v1540_v59 = vmul.f32 %v3041_v25, %v1346_v49  ;;  %v1348_v2 = vmul.f32 %v3045_v0, %v3668_v43 }
 0x427   : >> { %v1543_v7 = vsub.f32 %v3665_v14, %v1539_v50  ;;  %v1541_v11 = vmul.f32 %v3043_v21, %v1347_v55  ;;  %v1349_v8 = vpack.c.bf16 %v1347_v55, %v1345_v19 }
 0x428   : >> { %v1544_v37 = vsub.f32 %v3665_v14, %v1540_v59  ;;  %v1350_v39 = vpack.c.bf16 %v1348_v2, %v1346_v49  ;;  %v1542_v9 = vmul.f32 %v3045_v0, %v1348_v2 }
 0x429   : >> { %v1547_v58 = vmul.f32 %v1543_v7, %v1287_v38  ;;  %v1569_v41 = vmul.f32 %v1543_v7, %v1332_v13  ;;  %v1545_v44 = vsub.f32 %v3668_v43, %v1541_v11 }
 0x42a   : >> { %v1548_v22 = vmul.f32 %v1544_v37, %v1289_v57  ;;  %v1570_v35 = vmul.f32 %v1544_v37, %v1334_v52  ;;  %1351 = vmatprep.subr.bf16.mxu1 %v1350_v39  ;;  %v1546_v15 = vsub.f32 %v3668_v43, %v1542_v9 }
 0x42b   : >> { %v1551_v54 = vmul.f32 %v1547_v58, %v1287_v38  ;;  %v1573_v29 = vmul.f32 %v1569_v41, %v1332_v13  ;;  %v1549_v61 = vmul.f32 %v1545_v44, %v1291_v16  ;;  %v1571_v42 = vmul.f32 %v1545_v44, %v1336_v1  ;;  %1352 = vmatpush1.bf16.msra.mxu1 %v1349_v8 }
 0x42c   : >> { %v1552_v28 = vmul.f32 %v1548_v22, %v1289_v57  ;;  %v1574_v17 = vmul.f32 %v1570_v35, %v1334_v52  ;;  %v1550_v34 = vmul.f32 %v1546_v15, %v1293_v62  ;;  %v1572_v25 = vmul.f32 %v1546_v15, %v1338_v45 }
 0x42d   : >> { %v1553_v19 = vmul.f32 %v1549_v61, %v1291_v16  ;;  %v1575_v21 = vmul.f32 %v1571_v42, %v1336_v1 }
 0x42e   : >> { %v1554_v49 = vmul.f32 %v1550_v34, %v1293_v62  ;;  %v1576_v0 = vmul.f32 %v1572_v25, %v1338_v45  ;;  %2880 = vmatmul.mubr.msk.bf16.vlgmr.msra.gmra.mrb[12].mxu1 %vm601_vm1, %v4787_v23  ;;  %v4830_v34 = vld [vmem:[#allocation36_spill] sm:$0xff] }
 0x42f   : >> { %v1555_v50 = vadd.f32 %v1553_v19, %v1551_v54  ;;  %v1577_v55 = vadd.f32 %v1575_v21, %v1573_v29  ;;  %1830 = vmatprep.mubr.bf16.mxu1 %v4804_v12  ;;  %v3983_v25 = vmul.f32 %v3856_v10, %v4830_v34  ;;  %v4831_v19 = vld [vmem:[#allocation37_spill] sm:$0xff] }
 0x430   : >> { %v1562_v38 = vadd.f32 %v1554_v49, %v1552_v28  ;;  %v1584_v13 = vadd.f32 %v1576_v0, %v1574_v17  ;;  %v3987_v21 = vmul.f32 %v3856_v10, %v4831_v19  ;;  %v3989_v49 = vstv %s1435_s22  ;;  %s2603_s22 = smul.f32 %s3494_s19, %s3547_s5  ;;  %s2894_s5 = sshll.u32 (%p444_p10), %s3319_s9, 8 }
 0x431   : >> { %v1556_v59 = vrot.slane %v1555_v50, 4  ;;  %v1578_v2 = vrot.slane %v1577_v55, 4  ;;  %v3991_v0 = vstv %s1472_s6  ;;  %s4473_s6 = sadd.f32 %s2529_s2, %s3496_s3  ;;  %s3239_s3 = smov (%p444_p10), [#allocation8]  }
 0x432   : >> { %v1563_v7 = vrot.slane %v1562_v38, 4  ;;  %v1585_v57 = vrot.slane %v1584_v13, 4  ;;  %s3144_s4 = sshll.u32 (%p444_p10), %s3239_s3, 4  ;;  %s3145_s4 = int_to_ptr.vmem [resolvable:$false] %s3144_s4 }
 0x433   : >> { %v1557_v52 = vadd.f32 %v1556_v59, %v1555_v50  ;;  %v1579_v11 = vadd.f32 %v1578_v2, %v1577_v55  ;;  %v4832_v55 = vld [vmem:[#allocation39_spill] sm:$0xff]  ;;  %s3146_s26 = scalar_lea.vmem (%p444_p10), %s3145_s4, 512 }
 0x434   : >> { %v1564_v8 = vadd.f32 %v1563_v7, %v1562_v38  ;;  %v1586_v16 = vadd.f32 %v1585_v57, %v1584_v13  ;;  %v3995_v38 = vmul.f32 %v3856_v10, %v4832_v55  ;;  %v4833_v13 = vld [vmem:[#allocation38_spill] sm:$0xff]  ;;  %v4834_v57 = vld [vmem:[#allocation40_spill] sm:$0xff] }
 0x435   : >> { %v1558_v1 = vrot.slane %v1557_v52, 2  ;;  %v1580_v62 = vrot.slane %v1579_v11, 2  ;;  %v3999_v59 = vmul.f32 %v3856_v10, %v4833_v13 }
 0x436   : >> { %v1565_v45 = vrot.slane %v1564_v8, 2  ;;  %v1587_v37 = vrot.slane %v1586_v16, 2 }
 0x437   : >> { %v1559_v39 = vadd.f32 %v1558_v1, %v1557_v52  ;;  %v1581_v9 = vadd.f32 %v1580_v62, %v1579_v11  ;;  %v4004_v52 = vmul.f32 %v3856_v10, %v4834_v57  ;;  %v4008_v11 = vmul.f32 %v3859_v36, %v4830_v34 }
 0x438   : >> { %v1566_v58 = vadd.f32 %v1565_v45, %v1564_v8  ;;  %v1588_v41 = vadd.f32 %v1587_v37, %v1586_v16  ;;  %v4012_v8 = vmul.f32 %v3859_v36, %v4831_v19  ;;  %v4019_v37 = vmul.f32 %v3859_v36, %v4833_v13  ;;  %v4836_v45 = vld [vmem:[#allocation42_spill] sm:$0xff] }
 0x439   : >> { %v1560_v44 = vrot.slane %v1559_v39, 1  ;;  %v1582_v22 = vrot.slane %v1581_v9, 1 }
 0x43a   : >> { %v1567_v35 = vrot.slane %v1566_v58, 1  ;;  %v1589_v15 = vrot.slane %v1588_v41, 1 }
 0x43b   : >> { %v1561_v54 = vadd.f32 %v1560_v44, %v1559_v39  ;;  %v1583_v29 = vadd.f32 %v1582_v22, %v1581_v9  ;;  %v4029_v22 = vmul.f32 %v3859_v36, %v4832_v55  ;;  %v4837_v55 = vld [vmem:[#allocation43_spill] sm:$0xff] }
 0x43c   : >> { %v1568_v61 = vadd.f32 %v1567_v35, %v1566_v58  ;;  %v1590_v42 = vadd.f32 %v1589_v15, %v1588_v41  ;;  %v4835_v58 = vld [vmem:[#allocation41_spill] sm:$0xff] }
 0x43d   : >> { %v3971_v28 = vadd.f32 %v1583_v29, %v1561_v54  ;;  %v4025_v41 = vmul.f32 %v3856_v10, %v4835_v58  ;;  %v4036_v29 = vmul.f32 %v3859_v36, %v4834_v57 }
 0x43e   : >> { %v3973_v17 = vadd.f32 %v1590_v42, %v1568_v61 }
 0x501   : >> { %v1385_v50 = vpop.f32.mrb[12].mxu1 }
 0x502   : >> { %v1394_v2 = vadd.f32 %v1385_v50, %v3665_v14  ;;  %v1387_v7 = vpop.f32.mrb[13].mxu1  ;;  %v4043_v50 = vmul.f32 %v3859_v36, %v4835_v58 }
 0x503   : >> { %v1395_v16 = vadd.f32 %v1387_v7, %v3665_v14  ;;  %v1389_v1 = vpop.f32.mrb[14].mxu1 }
 0x504   : >> { %v1398_v39 = vmul.f32 %v3909_v24, %v1394_v2  ;;  %v1396_v9 = vadd.f32 %v1389_v1, %v3668_v43  ;;  %v1391_v44 = vpop.f32.mrb[15].mxu1 }
 0x505   : >> { %v1399_v35 = vmul.f32 %v3911_v30, %v1395_v16  ;;  %v1397_v54 = vadd.f32 %v1391_v44, %v3668_v43 }
 0x506   : >> { %v1513_v61 = vmul.f32 %v3909_v24, %v1398_v39  ;;  %v1402_v7 = vmul.f32 %v1398_v39, %v3566_v47  ;;  %v1439_v1 = vmul.f32 %v1398_v39, %v3582_v56  ;;  %v1476_v62 = vmul.f32 %v1398_v39, %v4836_v45 }
 0x507   : >> { %v1514_v44 = vmul.f32 %v3911_v30, %v1399_v35  ;;  %v1400_v24 = vmul.f32 %v3919_v63, %v1396_v9  ;;  %v1401_v10 = vmul.f32 %v3913_v6, %v1397_v54  ;;  %v1403_v42 = vmul.f32 %v1399_v35, %v3566_v47 }
 0x508   : >> { %v1517_v57 = vsub.f32 %v1394_v2, %v1513_v61  ;;  %v1440_v36 = vmul.f32 %v1399_v35, %v3582_v56  ;;  %v1477_v58 = vmul.f32 %v1399_v35, %v4836_v45 }
 0x509   : >> { %v1518_v13 = vsub.f32 %v1395_v16, %v1514_v44  ;;  %v1404_v30 = vmul.f32 %v1400_v24, %v3574_v51  ;;  %v1441_v15 = vmul.f32 %v1400_v24, %v3597_v18  ;;  %v1478_v39 = vmul.f32 %v1400_v24, %v3779_v4 }
 0x50a   : >> { %v1521_v19 = vmul.f32 %v1517_v57, %v4837_v55  ;;  %v1515_v61 = vmul.f32 %v3919_v63, %v1400_v24  ;;  %v1405_v34 = vmul.f32 %v1401_v10, %v3574_v51  ;;  %v1442_v23 = vmul.f32 %v1401_v10, %v3597_v18 }
 0x50b   : >> { %v1522_v2 = vmul.f32 %v1518_v13, %v4837_v55  ;;  %v1406_v43 = vadd.f32 %v1404_v30, %v1402_v7  ;;  %v1443_v14 = vadd.f32 %v1441_v15, %v1439_v1  ;;  %v1480_v35 = vadd.f32 %v1478_v39, %v1476_v62 }
 0x50c   : >> { %v1479_v16 = vmul.f32 %v1401_v10, %v3779_v4  ;;  %v1519_v57 = vsub.f32 %v1396_v9, %v1515_v61  ;;  %v1413_v44 = vadd.f32 %v1405_v34, %v1403_v42  ;;  %v1450_v45 = vadd.f32 %v1442_v23, %v1440_v36 }
 0x50d   : >> { %v1516_v40 = vmul.f32 %v3913_v6, %v1401_v10  ;;  %v1407_v32 = vrot.slane %v1406_v43, 4  ;;  %v1444_v12 = vrot.slane %v1443_v14, 4  ;;  %v1481_v20 = vrot.slane %v1480_v35, 4 }
 0x50e   : >> { %v1487_v13 = vadd.f32 %v1479_v16, %v1477_v58  ;;  %v1523_v63 = vmul.f32 %v1519_v57, %v3799_v31  ;;  %v1414_v24 = vrot.slane %v1413_v44, 4  ;;  %v1451_v55 = vrot.slane %v1450_v45, 4 }
 0x50f   : >> { %v1520_v56 = vsub.f32 %v1397_v54, %v1516_v40  ;;  %v1408_v18 = vadd.f32 %v1407_v32, %v1406_v43  ;;  %v1445_v7 = vadd.f32 %v1444_v12, %v1443_v14  ;;  %v1482_v15 = vadd.f32 %v1481_v20, %v1480_v35 }
 0x510   : >> { %v1488_v62 = vrot.slane %v1487_v13, 4  ;;  %v1525_v1 = vadd.f32 %v1523_v63, %v1521_v19  ;;  %v1415_v30 = vadd.f32 %v1414_v24, %v1413_v44  ;;  %v1452_v9 = vadd.f32 %v1451_v55, %v1450_v45 }
 0x511   : >> { %v1524_v23 = vmul.f32 %v1520_v56, %v3799_v31  ;;  %v1409_v34 = vrot.slane %v1408_v18, 2  ;;  %v1446_v6 = vrot.slane %v1445_v7, 2  ;;  %v1483_v10 = vrot.slane %v1482_v15, 2 }
 0x512   : >> { %v1489_v42 = vadd.f32 %v1488_v62, %v1487_v13  ;;  %v1526_v36 = vrot.slane %v1525_v1, 4  ;;  %v1416_v58 = vrot.slane %v1415_v30, 2  ;;  %v1453_v39 = vrot.slane %v1452_v9, 2 }
 0x513   : >> { %v1532_v61 = vadd.f32 %v1524_v23, %v1522_v2  ;;  %v1410_v16 = vadd.f32 %v1409_v34, %v1408_v18  ;;  %v1447_v57 = vadd.f32 %v1446_v6, %v1445_v7  ;;  %v1484_v40 = vadd.f32 %v1483_v10, %v1482_v15 }
 0x514   : >> { %v1490_v32 = vrot.slane %v1489_v42, 2  ;;  %v1527_v12 = vadd.f32 %v1526_v36, %v1525_v1  ;;  %v1417_v20 = vadd.f32 %v1416_v58, %v1415_v30  ;;  %v1454_v14 = vadd.f32 %v1453_v39, %v1452_v9 }
 0x515   : >> { %v1533_v43 = vrot.slane %v1532_v61, 4  ;;  %v1411_v19 = vrot.slane %v1410_v16, 1  ;;  %v1448_v56 = vrot.slane %v1447_v57, 1  ;;  %v1485_v55 = vrot.slane %v1484_v40, 1 }
 0x516   : >> { %v1491_v45 = vadd.f32 %v1490_v32, %v1489_v42  ;;  %v1528_v54 = vrot.slane %v1527_v12, 2  ;;  %v1418_v35 = vrot.slane %v1417_v20, 1  ;;  %v1455_v44 = vrot.slane %v1454_v14, 1 }
 0x517   : >> { %v1534_v13 = vadd.f32 %v1533_v43, %v1532_v61  ;;  %v1412_v63 = vadd.f32 %v1411_v19, %v1410_v16  ;;  %v1449_v2 = vadd.f32 %v1448_v56, %v1447_v57  ;;  %v1486_v18 = vadd.f32 %v1485_v55, %v1484_v40 }
 0x518   : >> { %v1492_v24 = vrot.slane %v1491_v45, 1  ;;  %v1529_v7 = vadd.f32 %v1528_v54, %v1527_v12  ;;  %v1419_v15 = vadd.f32 %v1418_v35, %v1417_v20  ;;  %v1456_v62 = vadd.f32 %v1455_v44, %v1454_v14 }
 0x519   : >> { %v1535_v1 = vrot.slane %v1534_v13, 2  ;;  %v1422_v30 = vadd.f32 %v3995_v38, %v1412_v63  ;;  %v1459_v9 = vadd.f32 %v4004_v52, %v1449_v2  ;;  %v1496_v23 = vadd.f32 %v4025_v41, %v1486_v18 }
 0x51a   : >> { %v1493_v34 = vadd.f32 %v1492_v24, %v1491_v45  ;;  %v1530_v6 = vrot.slane %v1529_v7, 1  ;;  %v1423_v10 = vadd.f32 %v4029_v22, %v1419_v15  ;;  %v1460_v42 = vadd.f32 %v4036_v29, %v1456_v62 }
 0x51b   : >> { %v1536_v36 = vadd.f32 %v1535_v1, %v1534_v13  ;;  %v4838_v58 = vrot.slane %v3983_v25, 1  ;;  %v4839_v61 = vrot.slane %v3987_v21, 1  ;;  %v4840_v38 = vrot.slane %v3999_v59, 1 }
 0x51c   : >> { %v1497_v52 = vadd.f32 %v4043_v50, %v1493_v34  ;;  %v1531_v40 = vadd.f32 %v1530_v6, %v1529_v7  ;;  %v4841_v41 = vrot.slane %v4008_v11, 1  ;;  %v4842_v22 = vrot.slane %v4012_v8, 1 }
 0x51d   : >> { %v1432_v39 = vadd.f32 %v4838_v58, %v1422_v30  ;;  %v1469_v16 = vadd.f32 %v4839_v61, %v1459_v9  ;;  %v1506_v57 = vadd.f32 %v4840_v38, %v1496_v23  ;;  %v1537_v29 = vrot.slane %v1536_v36, 1 }
 0x51e   : >> { %v1433_v32 = vadd.f32 %v4841_v41, %v1423_v10  ;;  %v1470_v12 = vadd.f32 %v4842_v22, %v1460_v42  ;;  %v4843_v21 = vrot.slane %v4019_v37, 1  ;;  %v1593_v59 = vadd.f32 %v3971_v28, %v1531_v40 }
 0x51f   : >> { %v1437_v25 = vadd.f32 %v3989_v49, %v1432_v39  ;;  %v1474_v20 = vadd.f32 %v3991_v0, %v1469_v16  ;;  %v1538_v11 = vadd.f32 %v1537_v29, %v1536_v36  ;;  %v4095_v35 = vstv %s1509_s14  ;;  %s4479_s14 = sadd.f32 %s3500_s27, %s2603_s22  ;;  %s4623_s22 = scalar_lea.hbm (%p444_p10), %s4672_s10, %s2894_s5 }
 0x520   : >> { %v1507_v14 = vadd.f32 %v4843_v21, %v1497_v52  ;;  %v1438_v50 = vadd.f32 %v3989_v49, %v1433_v32  ;;  %v1475_v43 = vadd.f32 %v3991_v0, %v1470_v12  ;;  %v1595_v8 = vadd.f32 %v1593_v59, %v3828_v33 }
 0x521   : >> { %v1597_v19 = vmul.f32 -1.0, %v1437_v25  ;;  %v1599_v56 = vmul.f32 -1.0, %v1474_v20  ;;  %v1594_v55 = vadd.f32 %v3973_v17, %v1538_v11  ;;  %v1511_v30 = vadd.f32 %v4095_v35, %v1506_v57 }
 0x522   : >> { %v1598_v45 = vmul.f32 -1.0, %v1438_v50  ;;  %v1600_v54 = vmul.f32 -1.0, %v1475_v43  ;;  %v1601_v63 = vmul.f32 -1.0, %v1595_v8  ;;  %v1512_v34 = vadd.f32 %v4095_v35, %v1507_v14 }
 0x523   : >> { %v1603_v44 = vmul.f32 %v1597_v19, %v1597_v19  ;;  %v1605_v37 = vmul.f32 %v1599_v56, %v1599_v56  ;;  %v1617_v13 = vrot.slane %v1599_v56, 7  ;;  %v1596_v28 = vadd.f32 %v1594_v55, %v3828_v33 }
 0x524   : >> { %v1604_v2 = vmul.f32 %v1598_v45, %v1598_v45  ;;  %v1606_v18 = vmul.f32 %v1600_v54, %v1600_v54  ;;  %v1618_v15 = vrot.slane %v1600_v54, 7  ;;  %v1083_v57 = vmul.f32 0.16666667, %v3848_v60 }
 0x525   : >> { %v1607_v24 = vadd.f32 %v1605_v37, %v1603_v44  ;;  %v1633_v7 = vsel %vm1070_vm6, %v1597_v19, %v1617_v13  ;;  %v1602_v1 = vmul.f32 -1.0, %v1596_v28  ;;  %v1084_v32 = vmul.f32 0.16666667, %v3851_v53 }
 0x526   : >> { %v1635_v62 = vsel %vm439_vm0, %v1633_v7, %v1601_v63  ;;  %v1608_v17 = vadd.f32 %v1606_v18, %v1604_v2  ;;  %v1634_v23 = vsel %vm1070_vm6, %v1598_v45, %v1618_v15  ;;  %v1085_v20 = vadd.f32 %v3230_v26, %v1083_v57  ;;  %v4844_v2 = vld [vmem:[#allocation30_spill] sm:$0xff] }
 0x527   : >> { %v1609_v9 = vmul.f32 0.5, %v1607_v24  ;;  %v1636_v10 = vsel %vm439_vm0, %v1634_v23, %v1602_v1  ;;  %v1086_v59 = vadd.f32 %v3226_v27, %v1084_v32  ;;  %v4845_v24 = vld [vmem:[#allocation31_spill] sm:$0xff] }
 0x528   : >> { %v1610_v6 = vmul.f32 0.5, %v1608_v17 }
 0x529   : >> { %v1611_v42 = vsub.f32 %v1609_v9, %v1511_v30  ;;  %v1623_v36 = vrot.slane %v1609_v9, 5 }
 0x52a   : >> { %v1612_v58 = vsub.f32 %v1610_v6, %v1512_v34  ;;  %v1624_v39 = vrot.slane %v1610_v6, 5 }
 0x52b   : >> { %v1613_v61 = vand.u32 2147483647, %v1611_v42  ;;  %v1637_v16 = vsel %vm1075_vm7, %v1635_v62, %v1623_v36 }
 0x52c   : >> { %v1614_v38 = vand.u32 2147483647, %v1612_v58  ;;  %v1638_v52 = vsel %vm1075_vm7, %v1636_v10, %v1624_v39 }
 0x52d   : >> { %v1629_v40 = vrot.slane %v1613_v61, 4 }
 0x52e   : >> { %v1630_v41 = vrot.slane %v1614_v38, 4 }
 0x52f   : >> { %v1639_v22 = vsel %vm1078_vm8, %v1637_v16, %v1629_v40 }
 0x530   : >> { %v1641_v12 = vmul.f32 0.125, %v1639_v22  ;;  %v1640_v29 = vsel %vm1078_vm8, %v1638_v52, %v1630_v41 }
 0x531   : >> { %v1642_v25 = vmul.f32 0.125, %v1640_v29 }
 0x532   : >> { %v1643_v21 = vmul.f32 0.33333334, %v1641_v12  ;;  %v1647_v14 = vmul.f32 0.5, %v1641_v12 }
 0x533   : >> { %v1644_v50 = vmul.f32 0.33333334, %v1642_v25  ;;  %v1648_v43 = vmul.f32 0.5, %v1642_v25 }
 0x534   : >> { %v4112_v11 = vadd.f32 %v1643_v21, %v1085_v20  ;;  %v4115_v60 = vadd.f32 %v3230_v26, %v1647_v14 }
 0x535   : >> { %v4117_v53 = vadd.f32 %v1644_v50, %v1086_v59  ;;  %v4120_v19 = vadd.f32 %v3226_v27, %v1648_v43 }
 0x536   : >> { %v1654_v56 = vrot.slane %v4115_v60, %v3564_v46  ;;  %v1670_v8 = vrot.slane %v4115_v60, %v3568_v48 }
 0x537   : >> { %v1658_v55 = vrot.slane %v4120_v19, %v3564_v46  ;;  %v1674_v45 = vrot.slane %v4120_v19, %v3568_v48 }
 0x538   : >> { %v1659_v54 = vmul.f32 %v1654_v56, %v3566_v47  ;;  %v1661_v44 = vmul.f32 %v1654_v56, %v3574_v51  ;;  %v1675_v18 = vmul.f32 %v1670_v8, %v4844_v2  ;;  %v1677_v7 = vmul.f32 %v1670_v8, %v4845_v24 }
 0x539   : >> { %v1660_v37 = vmul.f32 %v1658_v55, %v3566_v47  ;;  %v1662_v13 = vmul.f32 %v1658_v55, %v3574_v51  ;;  %v1676_v1 = vmul.f32 %v1674_v45, %v4844_v2  ;;  %v1678_v17 = vmul.f32 %v1674_v45, %v4845_v24  ;;  %v4846_v45 = vld [vmem:[#allocation24_spill] sm:$0xff] }
 0x53a   : >> { %v1663_v63 = vadd.f32 %v1659_v54, %v3871_v3  ;;  %v1665_v28 = vadd.f32 %v1661_v44, %v3873_v5  ;;  %v4847_v44 = vmov 0  }
 0x53b   : >> { %v1664_v15 = vadd.f32 %v1660_v37, %v3871_v3  ;;  %v1666_v62 = vadd.f32 %v1662_v13, %v3873_v5 }
 0x53c   : >> { %v4142_v30 = vadd.f32 %v1675_v18, %v1663_v63  ;;  %v4144_v9 = vadd.f32 %v1677_v7, %v1665_v28 }
 0x53d   : >> { %v4146_v23 = vadd.f32 %v1676_v1, %v1664_v15  ;;  %v4148_v34 = vadd.f32 %v1678_v17, %v1666_v62 }
 0x53e   : >> { %3046 = vtanh.f32 %v4142_v30  ;;  %v1687_v6 = vand.u32 2147483647, %v4142_v30  ;;  %v1689_v3 = vand.u32 2147483647, %v4144_v9 }
 0x53f   : >> { %3048 = vtanh.f32 %v4146_v23  ;;  %v1688_v5 = vand.u32 2147483647, %v4146_v23  ;;  %v1690_v10 = vand.u32 2147483647, %v4148_v34 }
 0x540   : >> { %3050 = vtanh.f32 %v4148_v34  ;;  %v1691_v42 = vmul.f32 -2.0, %v1687_v6  ;;  %v1693_v36 = vmul.f32 -2.0, %v1689_v3 }
 0x541   : >> { %3052 = vtanh.f32 %v4144_v9  ;;  %v1692_v58 = vmul.f32 -2.0, %v1688_v5  ;;  %v1694_v39 = vmul.f32 -2.0, %v1690_v10 }
 0x542   : >> { %v1695_v61 = vmul.f32 1.442695, %v1691_v42  ;;  %v1699_v52 = vmul.f32 1.442695, %v1693_v36 }
 0x543   : >> { %v1697_v16 = vmul.f32 1.442695, %v1692_v58  ;;  %v1701_v38 = vmul.f32 1.442695, %v1694_v39 }
 0x544   : >> { %3054 = vpow2.f32 %v1695_v61 }
 0x545   : >> { %3056 = vpow2.f32 %v1697_v16 }
 0x546   : >> { %3058 = vpow2.f32 %v1701_v38 }
 0x547   : >> { %3060 = vpow2.f32 %v1699_v52 }
 0x548   : >> { %v4166_v40 = vpop.eup %3046 }
 0x549   : >> { %v4168_v57 = vpop.eup %3048  ;;  %v1743_v22 = vmul.f32 %v4166_v40, %v3566_v47 }
 0x54a   : >> { %v4170_v41 = vpop.eup %3050  ;;  %v1744_v32 = vmul.f32 %v4168_v57, %v3566_v47 }
 0x54b   : >> { %v4176_v12 = vpop.eup %3052  ;;  %v1746_v29 = vmul.f32 %v4170_v41, %v3574_v51 }
 0x54c   : >> { %v1745_v25 = vmul.f32 %v4176_v12, %v3574_v51  ;;  %v1749_v30 = vmul.f32 %v4176_v12, %v4845_v24 }
 0x54d   : >> { %v1797_v20 = vpack.c.bf16 %v1746_v29, %v1744_v32 }
 0x54e   : >> { %v3055_v21 = vpop.eup %3054  ;;  %v1796_v14 = vpack.c.bf16 %v1745_v25, %v1743_v22 }
 0x54f   : >> { %v3057_v59 = vpop.eup %3056  ;;  %1798 = vmatprep.subr.bf16.mxu1 %v1797_v20  ;;  %v1703_v50 = vadd.f32 1.0, %v3055_v21  ;;  %v1706_v13 = vmul.f32 -0.5, %v3055_v21  ;;  %v1709_v1 = vand.u32 2147483647, %v3055_v21 }
 0x550   : >> { %v3059_v43 = vpop.eup %3058  ;;  %1799 = vmatpush1.bf16.msra.mxu1 %v1796_v14  ;;  %v1712_v56 = vadd.f32 1.0, %v3057_v59  ;;  %v1715_v37 = vmul.f32 -0.5, %v3057_v59  ;;  %v1718_v28 = vand.u32 2147483647, %v3057_v59 }
 0x551   : >> { %v3061_v8 = vpop.eup %3060  ;;  %v1730_v55 = vadd.f32 1.0, %v3059_v43  ;;  %3062 = vlog2.f32 %v1703_v50  ;;  %v1733_v63 = vmul.f32 -0.5, %v3059_v43  ;;  %v1707_v7 = vadd.f32 1.0, %v1706_v13 }
 0x552   : >> { %3064 = vlog2.f32 %v1712_v56  ;;  %v1721_v54 = vadd.f32 1.0, %v3061_v8  ;;  %v1716_v18 = vadd.f32 1.0, %v1715_v37  ;;  %v1724_v15 = vmul.f32 -0.5, %v3061_v8 }
 0x553   : >> { %3066 = vlog2.f32 %v1730_v55  ;;  %2882 = vmatmul.mubr.msk.bf16.vlgmr.msra.gmra.mrb[16].mxu1 %vm601_vm1, %v4846_v45  ;;  %v1734_v62 = vadd.f32 1.0, %v1733_v63  ;;  %v1736_v42 = vand.u32 2147483647, %v3059_v43  ;;  %vm4185_vm13 = vcmp.lt.f32.partialorder %v1718_v28, 0.0004427343 }
 0x554   : >> { %1928 = vmatprep.mubr.bf16.mxu1 %v4847_v44  ;;  %3068 = vlog2.f32 %v1721_v54  ;;  %v1717_v38 = vmul.f32 %v3057_v59, %v1716_v18  ;;  %v1708_v52 = vmul.f32 %v3055_v21, %v1707_v7  ;;  %v1725_v32 = vadd.f32 1.0, %v1724_v15  ;;  %v4850_v15 = vld [vmem:[#allocation32_spill] sm:$0xff] }
 0x555   : >> { %v1735_v29 = vmul.f32 %v3059_v43, %v1734_v62  ;;  %vm1710_vm14 = vcmp.lt.f32.partialorder %v1709_v1, 0.0004427343  ;;  %v1727_v25 = vand.u32 2147483647, %v3061_v8  ;;  %vm1737_vm15 = vcmp.lt.f32.partialorder %v1736_v42, 0.0004427343 }
 0x556   : >> { %v1726_v21 = vmul.f32 %v3061_v8, %v1725_v32  ;;  %v1748_v63 = vmul.f32 %v4168_v57, %v4844_v2  ;;  %v1750_v28 = vmul.f32 %v4170_v41, %v4845_v24 }
 0x557   : >> { %vm1728_vm2 = vcmp.lt.f32.partialorder %v1727_v25, 0.0004427343  ;;  %v4852_v25 = vld [vmem:[#allocation34_spill] sm:$0xff] }
 0x55b   : >> { %v3063_v17 = vpop.eup %3062 }
 0x55c   : >> { %v3065_v36 = vpop.eup %3064  ;;  %v1705_v39 = vmul.f32 0.6931472, %v3063_v17 }
 0x55d   : >> { %v3067_v61 = vpop.eup %3066  ;;  %v1714_v16 = vmul.f32 0.6931472, %v3065_v36  ;;  %v4851_v36 = vld [vmem:[#allocation33_spill] sm:$0xff] }
 0x55e   : >> { %v1732_v22 = vmul.f32 0.6931472, %v3067_v61  ;;  %v1711_v14 = vsel %vm1710_vm14, %v1708_v52, %v1705_v39  ;;  %v3069_v50 = vpop.eup %3068 }
 0x55f   : >> { %v1720_v20 = vsel %vm4185_vm13, %v1717_v38, %v1714_v16  ;;  %v1723_v59 = vmul.f32 0.6931472, %v3069_v50  ;;  %v1739_v43 = vadd.f32 %v1711_v14, %v1687_v6  ;;  %v1842_v6 = vpack.c.bf16 %v1750_v28, %v1748_v63 }
 0x560   : >> { %v1738_v56 = vsel %vm1737_vm15, %v1735_v29, %v1732_v22  ;;  %v1740_v55 = vadd.f32 %v1720_v20, %v1688_v5  ;;  %v1747_v5 = vmul.f32 %v4166_v40, %v4844_v2 }
 0x561   : >> { %v1742_v54 = vadd.f32 %v1738_v56, %v1690_v10  ;;  %v1729_v13 = vsel %vm1728_vm2, %v1726_v21, %v1723_v59 }
 0x562   : >> { %v1741_v23 = vadd.f32 %v1729_v13, %v1689_v3  ;;  %v1841_v10 = vpack.c.bf16 %v1749_v30, %v1747_v5 }
 0x563   : >> { %v1752_v37 = vpack.c.bf16 %v1742_v54, %v1740_v55  ;;  %v4853_v54 = vld [vmem:[#allocation35_spill] sm:$0xff] }
 0x564   : >> { %v1751_v34 = vpack.c.bf16 %v1741_v23, %v1739_v43 }
 0x565   : >> { %1753 = vmatprep.subr.bf16.mxu0 %v1752_v37 }
 0x566   : >> { %1754 = vmatpush1.bf16.msra.mxu0 %v1751_v34 }
 0x567   : >> { %1843 = vmatprep.subr.bf16.mxu0 %v1842_v6 }
 0x569   : >> { %2881 = vmatmul.mubr.msk.bf16.vlgmr.msra.gmra.mrb[16].mxu0 %vm601_vm1, %v4846_v45 }
 0x56a   : >> { %1844 = vmatpush1.bf16.msra.mxu0 %v1841_v10  ;;  %1875 = vmatprep.mubr.bf16.mxu0 %v4847_v44 }
 0x571   : >> { %2883 = vmatmul.mubr.msk.bf16.vlgmr.msra.gmra.mrb[20].mxu0 %vm601_vm1, %v4846_v45 }
 0x572   : >> { %2335 = vmatprep.mubr.bf16.mxu0 %v4847_v44 }
 0x626   : >> { %v1832_v9 = vpop.f32.mrb[16].mxu1 }
 0x627   : >> { %v1834_v3 = vpop.f32.mrb[17].mxu1 }
 0x628   : >> { %v1836_v8 = vpop.f32.mrb[18].mxu1 }
 0x629   : >> { %v1838_v18 = vpop.f32.mrb[19].mxu1 }
 0x63c   : >> { %v1787_v7 = vpop.f32.mrb[16].mxu0 }
 0x63d   : >> { %v1788_v62 = vadd.f32 %v1787_v7, %v4850_v15  ;;  %v1789_v1 = vpop.f32.mrb[17].mxu0 }
 0x63e   : >> { %v1790_v17 = vadd.f32 %v1789_v1, %v4850_v15  ;;  %v1791_v42 = vpop.f32.mrb[18].mxu0 }
 0x63f   : >> { %3070 = vtanh.f32 %v1788_v62  ;;  %v1792_v58 = vadd.f32 %v1791_v42, %v4851_v36  ;;  %v1793_v39 = vpop.f32.mrb[19].mxu0 }
 0x640   : >> { %3072 = vtanh.f32 %v1790_v17  ;;  %v1794_v61 = vadd.f32 %v1793_v39, %v4851_v36 }
 0x641   : >> { %3074 = vtanh.f32 %v1792_v58 }
 0x642   : >> { %3076 = vtanh.f32 %v1794_v61 }
 0x644   : >> { %v1877_v16 = vpop.f32.mrb[20].mxu0 }
 0x645   : >> { %v1879_v38 = vpop.f32.mrb[21].mxu0 }
 0x646   : >> { %v1881_v52 = vpop.f32.mrb[22].mxu0 }
 0x647   : >> { %v1883_v32 = vpop.f32.mrb[23].mxu0 }
 0x649   : >> { %v3071_v22 = vpop.eup %3070 }
 0x64a   : >> { %v3073_v29 = vpop.eup %3072  ;;  %v1890_v20 = vmul.f32 %v3071_v22, %v4852_v25 }
 0x64b   : >> { %v3075_v14 = vpop.eup %3074  ;;  %v1891_v50 = vmul.f32 %v3073_v29, %v4852_v25 }
 0x64c   : >> { %v3077_v56 = vpop.eup %3076  ;;  %v2075_v55 = vmul.f32 %v3071_v22, %v1890_v20  ;;  %v1892_v59 = vmul.f32 %v3075_v14, %v4853_v54 }
 0x64d   : >> { %v2076_v21 = vmul.f32 %v3073_v29, %v1891_v50  ;;  %v1893_v43 = vmul.f32 %v3077_v56, %v4853_v54 }
 0x64e   : >> { %v2079_v37 = vsub.f32 %v4852_v25, %v2075_v55  ;;  %v2077_v13 = vmul.f32 %v3075_v14, %v1892_v59  ;;  %v1894_v63 = vpack.c.bf16 %v1892_v59, %v1890_v20  ;;  %v4854_v55 = vld [vmem:[#allocation27_spill] sm:$0xff] }
 0x64f   : >> { %v2080_v28 = vsub.f32 %v4852_v25, %v2076_v21  ;;  %v1895_v23 = vpack.c.bf16 %v1893_v43, %v1891_v50  ;;  %v2078_v34 = vmul.f32 %v3077_v56, %v1893_v43 }
 0x650   : >> { %v2083_v5 = vmul.f32 %v2079_v37, %v1832_v9  ;;  %v2105_v30 = vmul.f32 %v2079_v37, %v1877_v16  ;;  %v2081_v6 = vsub.f32 %v4853_v54, %v2077_v13 }
 0x651   : >> { %v2084_v10 = vmul.f32 %v2080_v28, %v1834_v3  ;;  %v2106_v7 = vmul.f32 %v2080_v28, %v1879_v38  ;;  %1896 = vmatprep.subr.bf16.mxu1 %v1895_v23  ;;  %v2082_v62 = vsub.f32 %v4853_v54, %v2078_v34 }
 0x652   : >> { %v2087_v1 = vmul.f32 %v2083_v5, %v1832_v9  ;;  %v2109_v17 = vmul.f32 %v2105_v30, %v1877_v16  ;;  %v2085_v42 = vmul.f32 %v2081_v6, %v1836_v8  ;;  %v2107_v58 = vmul.f32 %v2081_v6, %v1881_v52  ;;  %1897 = vmatpush1.bf16.msra.mxu1 %v1894_v63 }
 0x653   : >> { %v2088_v39 = vmul.f32 %v2084_v10, %v1834_v3  ;;  %v2110_v61 = vmul.f32 %v2106_v7, %v1879_v38  ;;  %v2086_v22 = vmul.f32 %v2082_v62, %v1838_v18  ;;  %v2108_v29 = vmul.f32 %v2082_v62, %v1883_v32 }
 0x654   : >> { %v2089_v20 = vmul.f32 %v2085_v42, %v1836_v8  ;;  %v2111_v14 = vmul.f32 %v2107_v58, %v1881_v52 }
 0x655   : >> { %v2090_v50 = vmul.f32 %v2086_v22, %v1838_v18  ;;  %v2112_v56 = vmul.f32 %v2108_v29, %v1883_v32  ;;  %2884 = vmatmul.mubr.msk.bf16.vlgmr.msra.gmra.mrb[20].mxu1 %vm601_vm1, %v4854_v55  ;;  %v4855_v29 = vld [vmem:[#allocation36_spill] sm:$0xff] }
 0x656   : >> { %v2091_v59 = vadd.f32 %v2089_v20, %v2087_v1  ;;  %v2113_v21 = vadd.f32 %v2111_v14, %v2109_v17  ;;  %2380 = vmatprep.mubr.bf16.mxu1 %v4847_v44  ;;  %v4234_v20 = vmul.f32 %v4115_v60, %v4855_v29  ;;  %v4856_v14 = vld [vmem:[#allocation37_spill] sm:$0xff] }
 0x657   : >> { %v2098_v9 = vadd.f32 %v2090_v50, %v2088_v39  ;;  %v2120_v16 = vadd.f32 %v2112_v56, %v2110_v61  ;;  %v4238_v50 = vmul.f32 %v4115_v60, %v4856_v14 }
 0x658   : >> { %v2092_v43 = vrot.slane %v2091_v59, 4  ;;  %v2114_v37 = vrot.slane %v2113_v21, 4 }
 0x659   : >> { %v2099_v13 = vrot.slane %v2098_v9, 4  ;;  %v2121_v3 = vrot.slane %v2120_v16, 4 }
 0x65a   : >> { %v2093_v38 = vadd.f32 %v2092_v43, %v2091_v59  ;;  %v2115_v63 = vadd.f32 %v2114_v37, %v2113_v21  ;;  %v4857_v59 = vld [vmem:[#allocation39_spill] sm:$0xff] }
 0x65b   : >> { %v2100_v28 = vadd.f32 %v2099_v13, %v2098_v9  ;;  %v2122_v8 = vadd.f32 %v2121_v3, %v2120_v16  ;;  %v4242_v21 = vmul.f32 %v4115_v60, %v4857_v59  ;;  %v4858_v9 = vld [vmem:[#allocation38_spill] sm:$0xff]  ;;  %v4859_v13 = vld [vmem:[#allocation40_spill] sm:$0xff] }
 0x65c   : >> { %v2094_v52 = vrot.slane %v2093_v38, 2  ;;  %v2116_v18 = vrot.slane %v2115_v63, 2  ;;  %v4246_v16 = vmul.f32 %v4115_v60, %v4858_v9  ;;  %v4251_v3 = vmul.f32 %v4115_v60, %v4859_v13 }
 0x65d   : >> { %v2101_v32 = vrot.slane %v2100_v28, 2  ;;  %v2123_v23 = vrot.slane %v2122_v8, 2 }
 0x65e   : >> { %v2095_v34 = vadd.f32 %v2094_v52, %v2093_v38  ;;  %v2117_v5 = vadd.f32 %v2116_v18, %v2115_v63  ;;  %v4255_v38 = vmul.f32 %v4120_v19, %v4855_v29  ;;  %v4259_v63 = vmul.f32 %v4120_v19, %v4856_v14 }
 0x65f   : >> { %v2102_v30 = vadd.f32 %v2101_v32, %v2100_v28  ;;  %v2124_v6 = vadd.f32 %v2123_v23, %v2122_v8  ;;  %v4266_v32 = vmul.f32 %v4120_v19, %v4858_v9 }
 0x660   : >> { %v2096_v10 = vrot.slane %v2095_v34, 1  ;;  %v2118_v7 = vrot.slane %v2117_v5, 1 }
 0x661   : >> { %v2103_v62 = vrot.slane %v2102_v30, 1  ;;  %v2125_v1 = vrot.slane %v2124_v6, 1 }
 0x662   : >> { %v2097_v17 = vadd.f32 %v2096_v10, %v2095_v34  ;;  %v2119_v42 = vadd.f32 %v2118_v7, %v2117_v5  ;;  %v4860_v5 = vld [vmem:[#allocation41_spill] sm:$0xff]  ;;  %v4276_v10 = vmul.f32 %v4120_v19, %v4857_v59  ;;  %v4862_v59 = vld [vmem:[#allocation43_spill] sm:$0xff] }
 0x663   : >> { %v2104_v58 = vadd.f32 %v2103_v62, %v2102_v30  ;;  %v2126_v39 = vadd.f32 %v2125_v1, %v2124_v6  ;;  %v4272_v30 = vmul.f32 %v4115_v60, %v4860_v5  ;;  %v4861_v62 = vld [vmem:[#allocation42_spill] sm:$0xff] }
 0x664   : >> { %v4228_v61 = vadd.f32 %v2119_v42, %v2097_v17  ;;  %v4283_v17 = vmul.f32 %v4120_v19, %v4859_v13 }
 0x665   : >> { %v4230_v22 = vadd.f32 %v2126_v39, %v2104_v58  ;;  %v4290_v39 = vmul.f32 %v4120_v19, %v4860_v5 }
 0x728   : >> { %v1930_v56 = vpop.f32.mrb[20].mxu1 }
 0x729   : >> { %v1939_v43 = vadd.f32 %v1930_v56, %v4852_v25  ;;  %v1932_v37 = vpop.f32.mrb[21].mxu1 }
 0x72a   : >> { %v1940_v28 = vadd.f32 %v1932_v37, %v4852_v25  ;;  %v1934_v8 = vpop.f32.mrb[22].mxu1 }
 0x72b   : >> { %v1943_v23 = vmul.f32 %v4166_v40, %v1939_v43  ;;  %v1941_v34 = vadd.f32 %v1934_v8, %v4853_v54  ;;  %v1936_v6 = vpop.f32.mrb[23].mxu1 }
 0x72c   : >> { %v1944_v7 = vmul.f32 %v4168_v57, %v1940_v28  ;;  %v1942_v1 = vadd.f32 %v1936_v6, %v4853_v54 }
 0x72d   : >> { %v2049_v42 = vmul.f32 %v4166_v40, %v1943_v23  ;;  %v1947_v56 = vmul.f32 %v1943_v23, %v3566_v47  ;;  %v1981_v37 = vmul.f32 %v1943_v23, %v4844_v2  ;;  %v2015_v18 = vmul.f32 %v1943_v23, %v4861_v62 }
 0x72e   : >> { %v2050_v8 = vmul.f32 %v4168_v57, %v1944_v7  ;;  %v1945_v40 = vmul.f32 %v4176_v12, %v1941_v34  ;;  %v1946_v60 = vmul.f32 %v4170_v41, %v1942_v1  ;;  %v1948_v58 = vmul.f32 %v1944_v7, %v3566_v47 }
 0x72f   : >> { %v2053_v52 = vsub.f32 %v1939_v43, %v2049_v42  ;;  %v1982_v19 = vmul.f32 %v1944_v7, %v4844_v2  ;;  %v2016_v5 = vmul.f32 %v1944_v7, %v4861_v62 }
 0x730   : >> { %v2054_v13 = vsub.f32 %v1940_v28, %v2050_v8  ;;  %v1949_v57 = vmul.f32 %v1945_v40, %v3574_v51  ;;  %v1983_v6 = vmul.f32 %v1945_v40, %v4845_v24  ;;  %v2017_v23 = vmul.f32 %v1945_v40, %v3779_v4 }
 0x731   : >> { %v2057_v9 = vmul.f32 %v2053_v52, %v4862_v59  ;;  %v2051_v42 = vmul.f32 %v4176_v12, %v1945_v40  ;;  %v1950_v14 = vmul.f32 %v1946_v60, %v3574_v51  ;;  %v1984_v29 = vmul.f32 %v1946_v60, %v4845_v24 }
 0x732   : >> { %v2058_v43 = vmul.f32 %v2054_v13, %v4862_v59  ;;  %v1951_v55 = vadd.f32 %v1949_v57, %v1947_v56  ;;  %v1985_v54 = vadd.f32 %v1983_v6, %v1981_v37  ;;  %v2019_v7 = vadd.f32 %v2017_v23, %v2015_v18 }
 0x733   : >> { %v2018_v28 = vmul.f32 %v1946_v60, %v3779_v4  ;;  %v2055_v52 = vsub.f32 %v1941_v34, %v2051_v42  ;;  %v1958_v8 = vadd.f32 %v1950_v14, %v1948_v58  ;;  %v1992_v62 = vadd.f32 %v1984_v29, %v1982_v19 }
 0x734   : >> { %v2052_v25 = vmul.f32 %v4170_v41, %v1946_v60  ;;  %v1952_v36 = vrot.slane %v1951_v55, 4  ;;  %v1986_v15 = vrot.slane %v1985_v54, 4  ;;  %v2020_v44 = vrot.slane %v2019_v7, 4 }
 0x735   : >> { %v2026_v13 = vadd.f32 %v2018_v28, %v2016_v5  ;;  %v2059_v12 = vmul.f32 %v2055_v52, %v3799_v31  ;;  %v1959_v40 = vrot.slane %v1958_v8, 4  ;;  %v1993_v59 = vrot.slane %v1992_v62, 4 }
 0x736   : >> { %v2056_v45 = vsub.f32 %v1942_v1, %v2052_v25  ;;  %v1953_v24 = vadd.f32 %v1952_v36, %v1951_v55  ;;  %v1987_v56 = vadd.f32 %v1986_v15, %v1985_v54  ;;  %v2021_v37 = vadd.f32 %v2020_v44, %v2019_v7 }
 0x737   : >> { %v2027_v18 = vrot.slane %v2026_v13, 4  ;;  %v2061_v6 = vadd.f32 %v2059_v12, %v2057_v9  ;;  %v1960_v57 = vadd.f32 %v1959_v40, %v1958_v8  ;;  %v1994_v34 = vadd.f32 %v1993_v59, %v1992_v62 }
 0x738   : >> { %v2060_v29 = vmul.f32 %v2056_v45, %v3799_v31  ;;  %v1954_v14 = vrot.slane %v1953_v24, 2  ;;  %v1988_v41 = vrot.slane %v1987_v56, 2  ;;  %v2022_v60 = vrot.slane %v2021_v37, 2 }
 0x739   : >> { %v2028_v58 = vadd.f32 %v2027_v18, %v2026_v13  ;;  %v2062_v19 = vrot.slane %v2061_v6, 4  ;;  %v1961_v5 = vrot.slane %v1960_v57, 2  ;;  %v1995_v23 = vrot.slane %v1994_v34, 2 }
 0x73a   : >> { %v2068_v42 = vadd.f32 %v2060_v29, %v2058_v43  ;;  %v1955_v28 = vadd.f32 %v1954_v14, %v1953_v24  ;;  %v1989_v52 = vadd.f32 %v1988_v41, %v1987_v56  ;;  %v2023_v25 = vadd.f32 %v2022_v60, %v2021_v37 }
 0x73b   : >> { %v2029_v36 = vrot.slane %v2028_v58, 2  ;;  %v2063_v15 = vadd.f32 %v2062_v19, %v2061_v6  ;;  %v1962_v44 = vadd.f32 %v1961_v5, %v1960_v57  ;;  %v1996_v54 = vadd.f32 %v1995_v23, %v1994_v34 }
 0x73c   : >> { %v2069_v55 = vrot.slane %v2068_v42, 4  ;;  %v1956_v9 = vrot.slane %v1955_v28, 1  ;;  %v1990_v59 = vrot.slane %v1989_v52, 1  ;;  %v2024_v62 = vrot.slane %v2023_v25, 1 }
 0x73d   : >> { %v2030_v45 = vadd.f32 %v2029_v36, %v2028_v58  ;;  %v2064_v1 = vrot.slane %v2063_v15, 2  ;;  %v1963_v7 = vrot.slane %v1962_v44, 1  ;;  %v1997_v8 = vrot.slane %v1996_v54, 1 }
 0x73e   : >> { %v2070_v13 = vadd.f32 %v2069_v55, %v2068_v42  ;;  %v1957_v12 = vadd.f32 %v1956_v9, %v1955_v28  ;;  %v1991_v40 = vadd.f32 %v1990_v59, %v1989_v52  ;;  %v2025_v18 = vadd.f32 %v2024_v62, %v2023_v25 }
 0x73f   : >> { %v2031_v43 = vrot.slane %v2030_v45, 1  ;;  %v2065_v24 = vadd.f32 %v2064_v1, %v2063_v15  ;;  %v1964_v56 = vadd.f32 %v1963_v7, %v1962_v44  ;;  %v1998_v37 = vadd.f32 %v1997_v8, %v1996_v54 }
 0x740   : >> { %v2071_v29 = vrot.slane %v2070_v13, 2  ;;  %v1967_v6 = vadd.f32 %v4242_v21, %v1957_v12  ;;  %v2001_v57 = vadd.f32 %v4251_v3, %v1991_v40  ;;  %v2035_v34 = vadd.f32 %v4272_v30, %v2025_v18 }
 0x741   : >> { %v2032_v14 = vadd.f32 %v2031_v43, %v2030_v45  ;;  %v2066_v41 = vrot.slane %v2065_v24, 1  ;;  %v1968_v60 = vadd.f32 %v4276_v10, %v1964_v56  ;;  %v2002_v58 = vadd.f32 %v4283_v17, %v1998_v37 }
 0x742   : >> { %v2072_v19 = vadd.f32 %v2071_v29, %v2070_v13  ;;  %v4863_v5 = vrot.slane %v4234_v20, 1  ;;  %v4864_v42 = vrot.slane %v4238_v50, 1  ;;  %v4865_v52 = vrot.slane %v4246_v16, 1 }
 0x743   : >> { %v2036_v3 = vadd.f32 %v4290_v39, %v2032_v14  ;;  %v2067_v25 = vadd.f32 %v2066_v41, %v2065_v24  ;;  %v4866_v30 = vrot.slane %v4255_v38, 1  ;;  %v4867_v10 = vrot.slane %v4259_v63, 1 }
 0x744   : >> { %v1977_v23 = vadd.f32 %v4863_v5, %v1967_v6  ;;  %v2011_v28 = vadd.f32 %v4864_v42, %v2001_v57  ;;  %v2045_v21 = vadd.f32 %v4865_v52, %v2035_v34  ;;  %v2073_v17 = vrot.slane %v2072_v19, 1 }
 0x745   : >> { %v1978_v36 = vadd.f32 %v4866_v30, %v1968_v60  ;;  %v2012_v15 = vadd.f32 %v4867_v10, %v2002_v58  ;;  %v4868_v50 = vrot.slane %v4266_v32, 1  ;;  %v2129_v16 = vadd.f32 %v4228_v61, %v2067_v25 }
 0x746   : >> { %v1979_v44 = vadd.f32 %v1977_v23, %v3989_v49  ;;  %v2013_v20 = vadd.f32 %v2011_v28, %v3991_v0  ;;  %v2074_v9 = vadd.f32 %v2073_v17, %v2072_v19 }
 0x747   : >> { %v2046_v54 = vadd.f32 %v4868_v50, %v2036_v3  ;;  %v1980_v55 = vadd.f32 %v1978_v36, %v3989_v49  ;;  %v2014_v39 = vadd.f32 %v2012_v15, %v3991_v0  ;;  %v2131_v63 = vadd.f32 %v2129_v16, %v3828_v33  ;;  %v2206_v16 = vpop.permute.xlu0 %2205 }
 0x748   : >> { %v2133_v38 = vmul.f32 -1.0, %v1979_v44  ;;  %v2135_v59 = vmul.f32 -1.0, %v2013_v20  ;;  %v2130_v62 = vadd.f32 %v4230_v22, %v2074_v9  ;;  %v2047_v22 = vadd.f32 %v2045_v21, %v4095_v35 }
 0x749   : >> { %v2134_v45 = vmul.f32 -1.0, %v1980_v55  ;;  %v2136_v1 = vmul.f32 -1.0, %v2014_v39  ;;  %v2137_v32 = vmul.f32 -1.0, %v2131_v63  ;;  %v2048_v6 = vadd.f32 %v2046_v54, %v4095_v35  ;;  %v2211_v55 = vpop.permute.xlu1 %2210  ;;  %v4869_v63 = vld [vmem:[#allocation31_spill] sm:$0xff] }
 0x74a   : >> { %v2139_v7 = vmul.f32 %v2133_v38, %v2133_v38  ;;  %v2141_v8 = vmul.f32 %v2135_v59, %v2135_v59  ;;  %v2153_v13 = vrot.slane %v2135_v59, 7  ;;  %v2132_v12 = vadd.f32 %v2130_v62, %v3828_v33 }
 0x74b   : >> { %v2140_v61 = vmul.f32 %v2134_v45, %v2134_v45  ;;  %v2142_v40 = vmul.f32 %v2136_v1, %v2136_v1  ;;  %v2154_v18 = vrot.slane %v2136_v1, 7 }
 0x74c   : >> { %v2143_v49 = vadd.f32 %v2141_v8, %v2139_v7  ;;  %v2169_v0 = vsel %vm1070_vm6, %v2133_v38, %v2153_v13  ;;  %v2138_v24 = vmul.f32 -1.0, %v2132_v12 }
 0x74d   : >> { %v2171_v43 = vsel %vm439_vm0, %v2169_v0, %v2137_v32  ;;  %v2144_v56 = vadd.f32 %v2142_v40, %v2140_v61  ;;  %v2170_v29 = vsel %vm1070_vm6, %v2134_v45, %v2154_v18 }
 0x74e   : >> { %v2145_v37 = vmul.f32 0.5, %v2143_v49  ;;  %v2172_v34 = vsel %vm439_vm0, %v2170_v29, %v2138_v24 }
 0x74f   : >> { %v2146_v57 = vmul.f32 0.5, %v2144_v56 }
 0x750   : >> { %v2147_v14 = vsub.f32 %v2145_v37, %v2047_v22  ;;  %v2159_v41 = vrot.slane %v2145_v37, 5 }
 0x751   : >> { %v2148_v60 = vsub.f32 %v2146_v57, %v2048_v6  ;;  %v2160_v58 = vrot.slane %v2146_v57, 5 }
 0x752   : >> { %v2149_v19 = vand.u32 2147483647, %v2147_v14  ;;  %v2173_v5 = vsel %vm1075_vm7, %v2171_v43, %v2159_v41 }
 0x753   : >> { %v2150_v23 = vand.u32 2147483647, %v2148_v60  ;;  %v2174_v42 = vsel %vm1075_vm7, %v2172_v34, %v2160_v58 }
 0x754   : >> { %v2165_v28 = vrot.slane %v2149_v19, 4 }
 0x755   : >> { %v2166_v52 = vrot.slane %v2150_v23, 4 }
 0x756   : >> { %v2175_v21 = vsel %vm1078_vm8, %v2173_v5, %v2165_v28 }
 0x757   : >> { %v2177_v3 = vmul.f32 0.125, %v2175_v21  ;;  %v2176_v35 = vsel %vm1078_vm8, %v2174_v42, %v2166_v52 }
 0x758   : >> { %v2178_v25 = vmul.f32 0.125, %v2176_v35 }
 0x759   : >> { %v2179_v30 = vmul.f32 0.33333334, %v2177_v3  ;;  %v4351_v36 = vadd.f32 %v3230_v26, %v2177_v3 }
 0x75a   : >> { %v2180_v10 = vmul.f32 0.33333334, %v2178_v25  ;;  %v4354_v15 = vadd.f32 %v3226_v27, %v2178_v25 }
 0x75b   : >> { %v4357_v17 = vadd.f32 %v2179_v30, %v4112_v11  ;;  %v2194_v44 = vrot.slane %v4351_v36, %v3564_v46  ;;  %v2220_v20 = vrot.slane %v4351_v36, %v3568_v48  ;;  %v4870_v30 = vld [vmem:[#allocation24_spill] sm:$0xff] }
 0x75c   : >> { %v4364_v50 = vadd.f32 %v2180_v10, %v4117_v53  ;;  %v2198_v26 = vrot.slane %v4354_v15, %v3564_v46  ;;  %v2224_v54 = vrot.slane %v4354_v15, %v3568_v48 }
 0x75d   : >> { %v2199_v27 = vmul.f32 %v2194_v44, %v3566_v47  ;;  %v2201_v11 = vmul.f32 %v2194_v44, %v3574_v51  ;;  %v2225_v53 = vmul.f32 %v2220_v20, %v4844_v2  ;;  %v2227_v62 = vmul.f32 %v2220_v20, %v4869_v63 }
 0x75e   : >> { %v2200_v39 = vmul.f32 %v2198_v26, %v3566_v47  ;;  %v2202_v9 = vmul.f32 %v2198_v26, %v3574_v51  ;;  %v2226_v48 = vmul.f32 %v2224_v54, %v4844_v2  ;;  %v2228_v1 = vmul.f32 %v2224_v54, %v4869_v63 }
 0x75f   : >> { %v2213_v38 = vadd.f32 %v2206_v16, %v2199_v27  ;;  %v2215_v59 = vadd.f32 %v2211_v55, %v2201_v11  ;;  %v4871_v44 = vmov 0  }
 0x760   : >> { %v2214_v46 = vadd.f32 %v2206_v16, %v2200_v39  ;;  %v2216_v45 = vadd.f32 %v2211_v55, %v2202_v9 }
 0x761   : >> { %v4378_v7 = vadd.f32 %v2225_v53, %v2213_v38  ;;  %v4380_v8 = vadd.f32 %v2227_v62, %v2215_v59  ;;  %v4876_v62 = vld [vmem:[#allocation34_spill] sm:$0xff] }
 0x762   : >> { %v4382_v13 = vadd.f32 %v2226_v48, %v2214_v46  ;;  %v4384_v32 = vadd.f32 %v2228_v1, %v2216_v45 }
 0x763   : >> { %3078 = vtanh.f32 %v4378_v7  ;;  %v2237_v12 = vand.u32 2147483647, %v4378_v7  ;;  %v2239_v61 = vand.u32 2147483647, %v4380_v8 }
 0x764   : >> { %3080 = vtanh.f32 %v4382_v13  ;;  %v2238_v40 = vand.u32 2147483647, %v4382_v13  ;;  %v2240_v49 = vand.u32 2147483647, %v4384_v32 }
 0x765   : >> { %3082 = vtanh.f32 %v4384_v32  ;;  %v2241_v0 = vmul.f32 -2.0, %v2237_v12  ;;  %v2243_v18 = vmul.f32 -2.0, %v2239_v61 }
 0x766   : >> { %3084 = vtanh.f32 %v4380_v8  ;;  %v2242_v43 = vmul.f32 -2.0, %v2238_v40  ;;  %v2244_v24 = vmul.f32 -2.0, %v2240_v49 }
 0x767   : >> { %v2245_v56 = vmul.f32 1.442695, %v2241_v0  ;;  %v2249_v29 = vmul.f32 1.442695, %v2243_v18 }
 0x768   : >> { %v2247_v22 = vmul.f32 1.442695, %v2242_v43  ;;  %v2251_v37 = vmul.f32 1.442695, %v2244_v24 }
 0x769   : >> { %3086 = vpow2.f32 %v2245_v56 }
 0x76a   : >> { %3088 = vpow2.f32 %v2247_v22 }
 0x76b   : >> { %3090 = vpow2.f32 %v2251_v37 }
 0x76c   : >> { %3092 = vpow2.f32 %v2249_v29 }
 0x76d   : >> { %v4402_v6 = vpop.eup %3078 }
 0x76e   : >> { %v4404_v57 = vpop.eup %3080  ;;  %v2293_v41 = vmul.f32 %v4402_v6, %v3566_v47 }
 0x76f   : >> { %v4406_v34 = vpop.eup %3082  ;;  %v2294_v14 = vmul.f32 %v4404_v57, %v3566_v47 }
 0x770   : >> { %v4412_v60 = vpop.eup %3084  ;;  %v2296_v58 = vmul.f32 %v4406_v34, %v3574_v51 }
 0x771   : >> { %v2295_v19 = vmul.f32 %v4412_v60, %v3574_v51  ;;  %v2299_v7 = vmul.f32 %v4412_v60, %v4869_v63 }
 0x772   : >> { %v2347_v5 = vpack.c.bf16 %v2296_v58, %v2294_v14 }
 0x773   : >> { %v3087_v23 = vpop.eup %3086  ;;  %v2346_v42 = vpack.c.bf16 %v2295_v19, %v2293_v41 }
 0x774   : >> { %v3089_v28 = vpop.eup %3088  ;;  %2348 = vmatprep.subr.bf16.mxu1 %v2347_v5  ;;  %v2253_v52 = vadd.f32 1.0, %v3087_v23  ;;  %v2256_v26 = vmul.f32 -0.5, %v3087_v23  ;;  %v2259_v9 = vand.u32 2147483647, %v3087_v23 }
 0x775   : >> { %v3091_v21 = vpop.eup %3090  ;;  %2349 = vmatpush1.bf16.msra.mxu1 %v2346_v42  ;;  %v2262_v3 = vadd.f32 1.0, %v3089_v28  ;;  %v2265_v20 = vmul.f32 -0.5, %v3089_v28  ;;  %v2268_v27 = vand.u32 2147483647, %v3089_v28 }
 0x776   : >> { %v3093_v35 = vpop.eup %3092  ;;  %v2280_v25 = vadd.f32 1.0, %v3091_v21  ;;  %3094 = vlog2.f32 %v2253_v52  ;;  %v2283_v54 = vmul.f32 -0.5, %v3091_v21  ;;  %v2257_v16 = vadd.f32 1.0, %v2256_v26 }
 0x777   : >> { %3096 = vlog2.f32 %v2262_v3  ;;  %v2271_v10 = vadd.f32 1.0, %v3093_v35  ;;  %v2266_v11 = vadd.f32 1.0, %v2265_v20  ;;  %v2274_v55 = vmul.f32 -0.5, %v3093_v35 }
 0x778   : >> { %3098 = vlog2.f32 %v2280_v25  ;;  %2886 = vmatmul.mubr.msk.bf16.vlgmr.msra.gmra.mrb[24].mxu1 %vm601_vm1, %v4870_v30  ;;  %v2284_v39 = vadd.f32 1.0, %v2283_v54  ;;  %v2286_v59 = vand.u32 2147483647, %v3091_v21  ;;  %vm4421_vm3 = vcmp.lt.f32.partialorder %v2268_v27, 0.0004427343 }
 0x779   : >> { %2478 = vmatprep.mubr.bf16.mxu1 %v4871_v44  ;;  %3100 = vlog2.f32 %v2271_v10  ;;  %v2267_v1 = vmul.f32 %v3089_v28, %v2266_v11  ;;  %v2258_v0 = vmul.f32 %v3087_v23, %v2257_v16  ;;  %v2275_v18 = vadd.f32 1.0, %v2274_v55  ;;  %v4874_v10 = vld [vmem:[#allocation32_spill] sm:$0xff]  ;;  %v4875_v11 = vld [vmem:[#allocation33_spill] sm:$0xff] }
 0x77a   : >> { %v2285_v24 = vmul.f32 %v3091_v21, %v2284_v39  ;;  %vm2260_vm4 = vcmp.lt.f32.partialorder %v2259_v9, 0.0004427343  ;;  %v2277_v56 = vand.u32 2147483647, %v3093_v35  ;;  %vm2287_vm5 = vcmp.lt.f32.partialorder %v2286_v59, 0.0004427343 }
 0x77b   : >> { %v2276_v5 = vmul.f32 %v3093_v35, %v2275_v18  ;;  %v2298_v52 = vmul.f32 %v4404_v57, %v4844_v2  ;;  %v2300_v21 = vmul.f32 %v4406_v34, %v4869_v63  ;;  %v4877_v18 = vld [vmem:[#allocation35_spill] sm:$0xff] }
 0x77c   : >> { %vm2278_vm9 = vcmp.lt.f32.partialorder %v2277_v56, 0.0004427343 }
 0x780   : >> { %v3095_v38 = vpop.eup %3094 }
 0x781   : >> { %v3097_v53 = vpop.eup %3096  ;;  %v2255_v46 = vmul.f32 0.6931472, %v3095_v38 }
 0x782   : >> { %v3099_v45 = vpop.eup %3098  ;;  %v2264_v48 = vmul.f32 0.6931472, %v3097_v53 }
 0x783   : >> { %v2282_v43 = vmul.f32 0.6931472, %v3099_v45  ;;  %v2261_v37 = vsel %vm2260_vm4, %v2258_v0, %v2255_v46  ;;  %v3101_v29 = vpop.eup %3100 }
 0x784   : >> { %v2270_v22 = vsel %vm4421_vm3, %v2267_v1, %v2264_v48  ;;  %v2273_v19 = vmul.f32 0.6931472, %v3101_v29  ;;  %v2289_v23 = vadd.f32 %v2261_v37, %v2237_v12  ;;  %v2392_v12 = vpack.c.bf16 %v2300_v21, %v2298_v52 }
 0x785   : >> { %v2288_v14 = vsel %vm2287_vm5, %v2285_v24, %v2282_v43  ;;  %v2290_v41 = vadd.f32 %v2270_v22, %v2238_v40  ;;  %v2297_v40 = vmul.f32 %v4402_v6, %v4844_v2 }
 0x786   : >> { %v2292_v58 = vadd.f32 %v2288_v14, %v2240_v49  ;;  %v2279_v28 = vsel %vm2278_vm9, %v2276_v5, %v2273_v19 }
 0x787   : >> { %v2291_v13 = vadd.f32 %v2279_v28, %v2239_v61  ;;  %v2391_v49 = vpack.c.bf16 %v2299_v7, %v2297_v40 }
 0x788   : >> { %v2302_v42 = vpack.c.bf16 %v2292_v58, %v2290_v41 }
 0x789   : >> { %v2301_v32 = vpack.c.bf16 %v2291_v13, %v2289_v23 }
 0x78a   : >> { %2303 = vmatprep.subr.bf16.mxu0 %v2302_v42 }
 0x78b   : >> { %2304 = vmatpush1.bf16.msra.mxu0 %v2301_v32 }
 0x78c   : >> { %2393 = vmatprep.subr.bf16.mxu0 %v2392_v12 }
 0x78e   : >> { %2885 = vmatmul.mubr.msk.bf16.vlgmr.msra.gmra.mrb[24].mxu0 %vm601_vm1, %v4870_v30 }
 0x78f   : >> { %2394 = vmatpush1.bf16.msra.mxu0 %v2391_v49  ;;  %2425 = vmatprep.mubr.bf16.mxu0 %v4871_v44 }
 0x796   : >> { %2887 = vmatmul.mubr.msk.bf16.vlgmr.msra.gmra.mrb[28].mxu0 %vm601_vm1, %v4870_v30 }
 0x84b   : >> { %v2382_v8 = vpop.f32.mrb[24].mxu1 }
 0x84c   : >> { %v2384_v61 = vpop.f32.mrb[25].mxu1 }
 0x84d   : >> { %v2386_v3 = vpop.f32.mrb[26].mxu1 }
 0x84e   : >> { %v2388_v35 = vpop.f32.mrb[27].mxu1 }
 0x861   : >> { %v2337_v25 = vpop.f32.mrb[24].mxu0 }
 0x862   : >> { %v2338_v20 = vadd.f32 %v2337_v25, %v4874_v10  ;;  %v2339_v26 = vpop.f32.mrb[25].mxu0 }
 0x863   : >> { %v2340_v54 = vadd.f32 %v2339_v26, %v4874_v10  ;;  %v2341_v27 = vpop.f32.mrb[26].mxu0 }
 0x864   : >> { %3102 = vtanh.f32 %v2338_v20  ;;  %v2342_v16 = vadd.f32 %v2341_v27, %v4875_v11  ;;  %v2343_v55 = vpop.f32.mrb[27].mxu0  ;;  %v4878_v27 = vld [vmem:[#allocation27_spill] sm:$0xff] }
 0x865   : >> { %3104 = vtanh.f32 %v2340_v54  ;;  %v2344_v44 = vadd.f32 %v2343_v55, %v4875_v11 }
 0x866   : >> { %3106 = vtanh.f32 %v2342_v16 }
 0x867   : >> { %3108 = vtanh.f32 %v2344_v44 }
 0x869   : >> { %v2427_v30 = vpop.f32.mrb[28].mxu0 }
 0x86a   : >> { %v2429_v39 = vpop.f32.mrb[29].mxu0 }
 0x86b   : >> { %v2431_v9 = vpop.f32.mrb[30].mxu0 }
 0x86c   : >> { %v2433_v38 = vpop.f32.mrb[31].mxu0 }
 0x86e   : >> { %v3103_v59 = vpop.eup %3102 }
 0x86f   : >> { %v3105_v53 = vpop.eup %3104  ;;  %v2440_v46 = vmul.f32 %v3103_v59, %v4876_v62 }
 0x870   : >> { %v3107_v45 = vpop.eup %3106  ;;  %v2441_v48 = vmul.f32 %v3105_v53, %v4876_v62 }
 0x871   : >> { %v3109_v1 = vpop.eup %3108  ;;  %v2634_v0 = vmul.f32 %v3103_v59, %v2440_v46  ;;  %v2442_v43 = vmul.f32 %v3107_v45, %v4877_v18 }
 0x872   : >> { %v2635_v24 = vmul.f32 %v3105_v53, %v2441_v48  ;;  %v2443_v56 = vmul.f32 %v3109_v1, %v4877_v18 }
 0x873   : >> { %v2638_v22 = vsub.f32 %v4876_v62, %v2634_v0  ;;  %v2636_v37 = vmul.f32 %v3107_v45, %v2442_v43  ;;  %v2444_v29 = vpack.c.bf16 %v2442_v43, %v2440_v46 }
 0x874   : >> { %v2639_v14 = vsub.f32 %v4876_v62, %v2635_v24  ;;  %v2445_v41 = vpack.c.bf16 %v2443_v56, %v2441_v48  ;;  %v2637_v58 = vmul.f32 %v3109_v1, %v2443_v56 }
 0x875   : >> { %v2642_v19 = vmul.f32 %v2638_v22, %v2382_v8  ;;  %v2664_v5 = vmul.f32 %v2638_v22, %v2427_v30  ;;  %v2640_v23 = vsub.f32 %v4877_v18, %v2636_v37 }
 0x876   : >> { %v2643_v42 = vmul.f32 %v2639_v14, %v2384_v61  ;;  %v2665_v28 = vmul.f32 %v2639_v14, %v2429_v39  ;;  %2446 = vmatprep.subr.bf16.mxu1 %v2445_v41  ;;  %v2641_v52 = vsub.f32 %v4877_v18, %v2637_v58 }
 0x877   : >> { %v2646_v21 = vmul.f32 %v2642_v19, %v2382_v8  ;;  %v2668_v13 = vmul.f32 %v2664_v5, %v2427_v30  ;;  %v2644_v32 = vmul.f32 %v2640_v23, %v2386_v3  ;;  %v2666_v40 = vmul.f32 %v2640_v23, %v2431_v9  ;;  %2447 = vmatpush1.bf16.msra.mxu1 %v2444_v29  ;;  %v4879_v23 = vld [vmem:[#allocation36_spill] sm:$0xff] }
 0x878   : >> { %v2647_v7 = vmul.f32 %v2643_v42, %v2384_v61  ;;  %v2669_v12 = vmul.f32 %v2665_v28, %v2429_v39  ;;  %v2645_v49 = vmul.f32 %v2641_v52, %v2388_v35  ;;  %v2667_v25 = vmul.f32 %v2641_v52, %v2433_v38  ;;  %v4880_v52 = vld [vmem:[#allocation37_spill] sm:$0xff] }
 0x879   : >> { %v2648_v10 = vmul.f32 %v2644_v32, %v2386_v3  ;;  %v2670_v20 = vmul.f32 %v2666_v40, %v2431_v9  ;;  %v4483_v42 = vmul.f32 %v4351_v36, %v4879_v23  ;;  %v2531_v28 = vstv %s4473_s6  ;;  %s2759_s6 = sshll.u32 (%p444_p10), %s3507_s21, 4  ;;  %s2760_s6 = int_to_ptr.vmem [resolvable:$true] %s2759_s6 }
 0x87a   : >> { %v2649_v26 = vmul.f32 %v2645_v49, %v2388_v35  ;;  %v2671_v54 = vmul.f32 %v2667_v25, %v2433_v38  ;;  %2888 = vmatmul.mubr.msk.bf16.vlgmr.msra.gmra.mrb[28].mxu1 %vm601_vm1, %v4878_v27  ;;  %v2605_v32 = vstv %s4479_s14  ;;  %v4498_v49 = vmul.f32 %v4354_v15, %v4879_v23  ;;  %v4886_v23 = vld [vmem:[#allocation43_spill] sm:$0xff]  ;;  %s3140_s0 = scalar_lea.vmem (%p444_p10), %s2760_s6, 256  ;;  %p3147_p11 = scmp.lt.s32.totalorder (%p444_p10), %s2760_s6, %s3145_s4 }
 0x87b   : >> { %v2650_v11 = vadd.f32 %v2648_v10, %v2646_v21  ;;  %v2672_v16 = vadd.f32 %v2670_v20, %v2668_v13  ;;  %v4488_v21 = vmul.f32 %v4351_v36, %v4880_v52  ;;  %v2568_v13 = vstv %s4476_s7  ;;  %v4882_v20 = vld [vmem:[#allocation39_spill] sm:$0xff]  ;;  %s4889_s7 = sand.u32 (%p444_p10), 1, %s3214_s16   ;;  %p3141_p12 = scmp.ne.s32.totalorder (%p444_p10), %s2760_s6, %s3140_s0 }
 0x87c   : >> { %v2657_v55 = vadd.f32 %v2649_v26, %v2647_v7  ;;  %v2679_v44 = vadd.f32 %v2671_v54, %v2669_v12  ;;  %v4881_v7 = vld [vmem:[#allocation38_spill] sm:$0xff]  ;;  %v4503_v26 = vmul.f32 %v4351_v36, %v4882_v20  ;;  %v2523_v54 = vrot.slane %v4483_v42, 1  ;;  %s2745_s14 = scalar_lea.sflag (%p444_p10), [#allocation4], %s4889_s7  ;;  %p3148_p13 = scmp.lt.s32.totalorder (%p444_p10), %s3146_s26, %s3140_s0 }
 0x87d   : >> { %v2651_v8 = vrot.slane %v2650_v11, 4  ;;  %v2673_v30 = vrot.slane %v2672_v16, 4  ;;  %v4494_v12 = vmul.f32 %v4351_v36, %v4881_v7  ;;  %v4508_v27 = vmul.f32 %v4354_v15, %v4880_v52  ;;  %p3142_p7 = pnand (%p444_p10), %p3141_p12, %p4890_p0 }
 0x87e   : >> { %v2658_v59 = vrot.slane %v2657_v55, 4  ;;  %v2680_v53 = vrot.slane %v2679_v44, 4  ;;  %p3149_p1 = por (%p444_p10), %p3148_p13, %p3147_p11 }
 0x87f   : >> { %v2652_v46 = vadd.f32 %v2651_v8, %v2650_v11  ;;  %v2674_v61 = vadd.f32 %v2673_v30, %v2672_v16  ;;  %v4884_v8 = vld [vmem:[#allocation41_spill] sm:$0xff]  ;;  %p3143_p8 = pneg (%p444_p10), %p3142_p7 }
 0x880   : >> { %v2659_v39 = vadd.f32 %v2658_v59, %v2657_v55  ;;  %v2681_v45 = vadd.f32 %v2680_v53, %v2679_v44  ;;  %v4883_v55 = vld [vmem:[#allocation40_spill] sm:$0xff]  ;;  %v4517_v30 = vmul.f32 %v4351_v36, %v4884_v8  ;;  %v4521_v59 = vmul.f32 %v4354_v15, %v4881_v7 }
 0x881   : >> { %v2653_v48 = vrot.slane %v2652_v46, 2  ;;  %v2675_v3 = vrot.slane %v2674_v61, 2  ;;  %v4513_v44 = vmul.f32 %v4351_v36, %v4883_v55  ;;  %v2597_v36 = vrot.slane %v4494_v12, 1  ;;  %p3150_p2 = pnand (%p444_p10), %p3149_p1, %p3143_p8 }
 0x882   : >> { %v2660_v9 = vrot.slane %v2659_v39, 2  ;;  %v2682_v35 = vrot.slane %v2681_v45, 2 }
 0x883   : >> { %v2654_v38 = vadd.f32 %v2653_v48, %v2652_v46  ;;  %v2676_v1 = vadd.f32 %v2675_v3, %v2674_v61  ;;  %v2560_v61 = vrot.slane %v4488_v21, 1  ;;  %v2524_v3 = vrot.slane %v4498_v49, 1 }
 0x884   : >> { %v2661_v0 = vadd.f32 %v2660_v9, %v2659_v39  ;;  %v2683_v43 = vadd.f32 %v2682_v35, %v2681_v45  ;;  %v4528_v39 = vmul.f32 %v4354_v15, %v4882_v20  ;;  %v4537_v35 = vmul.f32 %v4354_v15, %v4883_v55 }
 0x885   : >> { %v2655_v24 = vrot.slane %v2654_v38, 1  ;;  %v2677_v56 = vrot.slane %v2676_v1, 1 }
 0x886   : >> { %v2662_v22 = vrot.slane %v2661_v0, 1  ;;  %v2684_v37 = vrot.slane %v2683_v43, 1 }
 0x887   : >> { %v2656_v29 = vadd.f32 %v2655_v24, %v2654_v38  ;;  %v2678_v14 = vadd.f32 %v2677_v56, %v2676_v1  ;;  %v2561_v38 = vrot.slane %v4508_v27, 1  ;;  %v4542_v1 = vmul.f32 %v4354_v15, %v4884_v8  ;;  %v4885_v56 = vld [vmem:[#allocation42_spill] sm:$0xff] }
 0x888   : >> { %v2663_v41 = vadd.f32 %v2662_v22, %v2661_v0  ;;  %v2685_v58 = vadd.f32 %v2684_v37, %v2683_v43  ;;  %v2598_v24 = vrot.slane %v4521_v59, 1 }
 0x889   : >> { %v4462_v19 = vadd.f32 %v2678_v14, %v2656_v29 }
 0x88a   : >> { %v4464_v5 = vadd.f32 %v2685_v58, %v2663_v41 }
 0x94d   : >> { %v2480_v40 = vpop.f32.mrb[28].mxu1 }
 0x94e   : >> { %v2489_v25 = vadd.f32 %v2480_v40, %v4876_v62  ;;  %v2482_v10 = vpop.f32.mrb[29].mxu1 }
 0x94f   : >> { %v2490_v11 = vadd.f32 %v2482_v10, %v4876_v62  ;;  %v2484_v16 = vpop.f32.mrb[30].mxu1 }
 0x950   : >> { %v2493_v53 = vmul.f32 %v4402_v6, %v2489_v25  ;;  %v2491_v46 = vadd.f32 %v2484_v16, %v4877_v18  ;;  %v2486_v62 = vpop.f32.mrb[31].mxu1 }
 0x951   : >> { %v2494_v45 = vmul.f32 %v4404_v57, %v2490_v11  ;;  %v2492_v48 = vadd.f32 %v2486_v62, %v4877_v18 }
 0x952   : >> { %v2608_v9 = vmul.f32 %v4402_v6, %v2493_v53  ;;  %v2497_v0 = vmul.f32 %v2493_v53, %v3566_v47  ;;  %v2534_v43 = vmul.f32 %v2493_v53, %v4844_v2  ;;  %v2571_v6 = vmul.f32 %v2493_v53, %v4885_v56 }
 0x953   : >> { %v2609_v18 = vmul.f32 %v4404_v57, %v2494_v45  ;;  %v2495_v37 = vmul.f32 %v4412_v60, %v2491_v46  ;;  %v2496_v29 = vmul.f32 %v4406_v34, %v2492_v48  ;;  %v2498_v14 = vmul.f32 %v2494_v45, %v3566_v47 }
 0x954   : >> { %v2612_v22 = vsub.f32 %v2489_v25, %v2608_v9  ;;  %v2535_v15 = vmul.f32 %v2494_v45, %v4844_v2  ;;  %v2572_v41 = vmul.f32 %v2494_v45, %v4885_v56 }
 0x955   : >> { %v2613_v58 = vsub.f32 %v2490_v11, %v2609_v18  ;;  %v2499_v57 = vmul.f32 %v2495_v37, %v3574_v51  ;;  %v2536_v40 = vmul.f32 %v2495_v37, %v4869_v63  ;;  %v2573_v7 = vmul.f32 %v2495_v37, %v3779_v4 }
 0x956   : >> { %v2616_v52 = vmul.f32 %v2612_v22, %v4886_v23  ;;  %v2610_v10 = vmul.f32 %v4412_v60, %v2495_v37  ;;  %v2500_v20 = vmul.f32 %v2496_v29, %v3574_v51  ;;  %v2537_v47 = vmul.f32 %v2496_v29, %v4869_v63 }
 0x957   : >> { %v2617_v25 = vmul.f32 %v2613_v58, %v4886_v23  ;;  %v2501_v2 = vadd.f32 %v2499_v57, %v2497_v0  ;;  %v2538_v16 = vadd.f32 %v2536_v40, %v2534_v43  ;;  %v2575_v55 = vadd.f32 %v2573_v7, %v2571_v6 }
 0x958   : >> { %v2574_v11 = vmul.f32 %v2496_v29, %v3779_v4  ;;  %v2614_v8 = vsub.f32 %v2491_v46, %v2610_v10  ;;  %v2508_v53 = vadd.f32 %v2500_v20, %v2498_v14  ;;  %v2545_v62 = vadd.f32 %v2537_v47, %v2535_v15 }
 0x959   : >> { %v2611_v45 = vmul.f32 %v4406_v34, %v2496_v29  ;;  %v2502_v9 = vrot.slane %v2501_v2, 4  ;;  %v2539_v18 = vrot.slane %v2538_v16, 4  ;;  %v2576_v56 = vrot.slane %v2575_v55, 4 }
 0x95a   : >> { %v2582_v22 = vadd.f32 %v2574_v11, %v2572_v41  ;;  %v2618_v60 = vmul.f32 %v2614_v8, %v3799_v31  ;;  %v2509_v37 = vrot.slane %v2508_v53, 4  ;;  %v2546_v51 = vrot.slane %v2545_v62, 4 }
 0x95b   : >> { %v2615_v58 = vsub.f32 %v2492_v48, %v2611_v45  ;;  %v2503_v63 = vadd.f32 %v2502_v9, %v2501_v2  ;;  %v2540_v0 = vadd.f32 %v2539_v18, %v2538_v16  ;;  %v2577_v43 = vadd.f32 %v2576_v56, %v2575_v55 }
 0x95c   : >> { %v2583_v6 = vrot.slane %v2582_v22, 4  ;;  %v2620_v23 = vadd.f32 %v2618_v60, %v2616_v52  ;;  %v2510_v4 = vadd.f32 %v2509_v37, %v2508_v53  ;;  %v2547_v46 = vadd.f32 %v2546_v51, %v2545_v62 }
 0x95d   : >> { %v2619_v14 = vmul.f32 %v2615_v58, %v3799_v31  ;;  %v2504_v15 = vrot.slane %v2503_v63, 2  ;;  %v2541_v34 = vrot.slane %v2540_v0, 2  ;;  %v2578_v29 = vrot.slane %v2577_v43, 2 }
 0x95e   : >> { %v2584_v57 = vadd.f32 %v2583_v6, %v2582_v22  ;;  %v2621_v40 = vrot.slane %v2620_v23, 4  ;;  %v2511_v41 = vrot.slane %v2510_v4, 2  ;;  %v2548_v7 = vrot.slane %v2547_v46, 2 }
 0x95f   : >> { %v2627_v10 = vadd.f32 %v2619_v14, %v2617_v25  ;;  %v2505_v20 = vadd.f32 %v2504_v15, %v2503_v63  ;;  %v2542_v47 = vadd.f32 %v2541_v34, %v2540_v0  ;;  %v2579_v48 = vadd.f32 %v2578_v29, %v2577_v43 }
 0x960   : >> { %v2585_v2 = vrot.slane %v2584_v57, 2  ;;  %v2622_v16 = vadd.f32 %v2621_v40, %v2620_v23  ;;  %v2512_v55 = vadd.f32 %v2511_v41, %v2510_v4  ;;  %v2549_v11 = vadd.f32 %v2548_v7, %v2547_v46 }
 0x961   : >> { %v2628_v52 = vrot.slane %v2627_v10, 4  ;;  %v2506_v8 = vrot.slane %v2505_v20, 1  ;;  %v2543_v53 = vrot.slane %v2542_v47, 1  ;;  %v2580_v62 = vrot.slane %v2579_v48, 1 }
 0x962   : >> { %v2586_v31 = vadd.f32 %v2585_v2, %v2584_v57  ;;  %v2623_v45 = vrot.slane %v2622_v16, 2  ;;  %v2513_v9 = vrot.slane %v2512_v55, 1  ;;  %v2550_v18 = vrot.slane %v2549_v11, 1 }
 0x963   : >> { %v2629_v56 = vadd.f32 %v2628_v52, %v2627_v10  ;;  %v2507_v22 = vadd.f32 %v2506_v8, %v2505_v20  ;;  %v2544_v60 = vadd.f32 %v2543_v53, %v2542_v47  ;;  %v2581_v37 = vadd.f32 %v2580_v62, %v2579_v48 }
 0x964   : >> { %v2587_v25 = vrot.slane %v2586_v31, 1  ;;  %v2624_v51 = vadd.f32 %v2623_v45, %v2622_v16  ;;  %v2514_v58 = vadd.f32 %v2513_v9, %v2512_v55  ;;  %v2551_v63 = vadd.f32 %v2550_v18, %v2549_v11 }
 0x965   : >> { %v2630_v0 = vrot.slane %v2629_v56, 2  ;;  %v2517_v43 = vadd.f32 %v4503_v26, %v2507_v22  ;;  %v2554_v6 = vadd.f32 %v4513_v44, %v2544_v60  ;;  %v2591_v23 = vadd.f32 %v4517_v30, %v2581_v37 }
 0x966   : >> { %v2588_v4 = vadd.f32 %v2587_v25, %v2586_v31  ;;  %v2625_v46 = vrot.slane %v2624_v51, 1  ;;  %v2518_v14 = vadd.f32 %v4528_v39, %v2514_v58  ;;  %v2555_v15 = vadd.f32 %v4537_v35, %v2551_v63 }
 0x967   : >> { %v2631_v34 = vadd.f32 %v2630_v0, %v2629_v56  ;;  %v2527_v29 = vadd.f32 %v2523_v54, %v2517_v43  ;;  %v2564_v26 = vadd.f32 %v2560_v61, %v2554_v6  ;;  %v2601_v44 = vadd.f32 %v2597_v36, %v2591_v23 }
 0x968   : >> { %v2592_v30 = vadd.f32 %v4542_v1, %v2588_v4  ;;  %v2626_v57 = vadd.f32 %v2625_v46, %v2624_v51  ;;  %v2528_v39 = vadd.f32 %v2524_v3, %v2518_v14  ;;  %v2565_v35 = vadd.f32 %v2561_v38, %v2555_v15 }
 0x969   : >> { %v2632_v40 = vrot.slane %v2631_v34, 1  ;;  %v2532_v42 = vadd.f32 %v2531_v28, %v2527_v29  ;;  %v2569_v54 = vadd.f32 %v2568_v13, %v2564_v26  ;;  %v2606_v21 = vadd.f32 %v2605_v32, %v2601_v44 }
 0x96a   : >> { %v2602_v12 = vadd.f32 %v2598_v24, %v2592_v30  ;;  %v2688_v61 = vadd.f32 %v4462_v19, %v2626_v57  ;;  %v2533_v36 = vadd.f32 %v2531_v28, %v2528_v39  ;;  %v2570_v49 = vadd.f32 %v2568_v13, %v2565_v35 }
 0x96b   : >> { %v2633_v3 = vadd.f32 %v2632_v40, %v2631_v34  ;;  %v2692_v1 = vmul.f32 -1.0, %v2532_v42  ;;  %v2694_v27 = vmul.f32 -1.0, %v2569_v54 }
 0x96c   : >> { %v2607_v38 = vadd.f32 %v2605_v32, %v2602_v12  ;;  %v2690_v41 = vadd.f32 %v2688_v61, %v3828_v33  ;;  %v2693_v10 = vmul.f32 -1.0, %v2533_v36  ;;  %v2695_v20 = vmul.f32 -1.0, %v2570_v49 }
 0x96d   : >> { %v2689_v7 = vadd.f32 %v4464_v5, %v2633_v3  ;;  %v2698_v47 = vmul.f32 %v2692_v1, %v2692_v1  ;;  %v2700_v59 = vmul.f32 %v2694_v27, %v2694_v27  ;;  %v2712_v24 = vrot.slane %v2694_v27, 7 }
 0x96e   : >> { %v2696_v48 = vmul.f32 -1.0, %v2690_v41  ;;  %v2699_v28 = vmul.f32 %v2693_v10, %v2693_v10  ;;  %v2701_v2 = vmul.f32 %v2695_v20, %v2695_v20  ;;  %v2713_v55 = vrot.slane %v2695_v20, 7 }
 0x96f   : >> { %v2691_v19 = vadd.f32 %v2689_v7, %v3828_v33  ;;  %v2702_v13 = vadd.f32 %v2700_v59, %v2698_v47  ;;  %v2728_v16 = vsel %vm1070_vm6, %v2692_v1, %v2712_v24 }
 0x970   : >> { %v2730_v32 = vsel %vm439_vm0, %v2728_v16, %v2696_v48  ;;  %v2703_v52 = vadd.f32 %v2701_v2, %v2699_v28  ;;  %v2729_v5 = vsel %vm1070_vm6, %v2693_v10, %v2713_v55 }
 0x971   : >> { %v2697_v11 = vmul.f32 -1.0, %v2691_v19  ;;  %v2704_v8 = vmul.f32 0.5, %v2702_v13 }
 0x972   : >> { %v2705_v53 = vmul.f32 0.5, %v2703_v52 }
 0x973   : >> { %v2731_v62 = vsel %vm439_vm0, %v2729_v5, %v2697_v11  ;;  %v2706_v31 = vsub.f32 %v2704_v8, %v2606_v21  ;;  %v2718_v45 = vrot.slane %v2704_v8, 5 }
 0x974   : >> { %v2707_v9 = vsub.f32 %v2705_v53, %v2607_v38  ;;  %v2719_v33 = vrot.slane %v2705_v53, 5 }
 0x975   : >> { %v2708_v18 = vand.u32 2147483647, %v2706_v31  ;;  %v2732_v56 = vsel %vm1075_vm7, %v2730_v32, %v2718_v45 }
 0x976   : >> { %v2709_v22 = vand.u32 2147483647, %v2707_v9  ;;  %v2733_v60 = vsel %vm1075_vm7, %v2731_v62, %v2719_v33 }
 0x977   : >> { %v2724_v37 = vrot.slane %v2708_v18, 4 }
 0x978   : >> { %v2725_v25 = vrot.slane %v2709_v22, 4 }
 0x979   : >> { %v2734_v51 = vsel %vm1078_vm8, %v2732_v56, %v2724_v37 }
 0x97a   : >> { %v2736_v58 = vmul.f32 0.125, %v2734_v51  ;;  %v2735_v63 = vsel %vm1078_vm8, %v2733_v60, %v2725_v25 }
 0x97b   : >> { %v2737_v0 = vmul.f32 0.125, %v2735_v63  ;;  %446 = sbr.rel (!%p444_p10) target bundleno = 92 (0x5c), region = 111 }
 0x97c   : >> { %v2738_v43 = vmul.f32 0.16666667, %v2736_v58 }
 0x97d   : >> { %v2739_v6 = vmul.f32 0.16666667, %v2737_v0 }
 0x97e   : >> { %v2740_v23 = vadd.f32 %v2738_v43, %v4357_v17  }
 0x97f   : >> { %v2741_v4 = vadd.f32 %v2739_v6, %v4364_v50  }
 0x980   : >> { %v4888_v26 = vmov %v2740_v23  ;;  %2742 = vst [vmem:[%s3507_s21] sm:$0x1f] (%p444_p10), %v2740_v23 }
 0x981   : >> { %v4887_v27 = vmov %v2741_v4  ;;  %2743 = vst [vmem:[%s3507_s21 + $0x8] sm:$0x1f] (%p444_p10), %v2741_v4 }
 0x982   : > { %3153 = shalt.err (!%p3150_p2)
}
 0x983   : > { %s3154_s9 = scalar_lea.hbm %s4623_s22, 256  ;;  %s3158_s30 = scalar_lea.hbm %s4672_s10, 512 }
 0x984   : > { %p3155_p3 = scmp.ne.s32.totalorder %s4623_s22, %s3154_s9  ;;  %p3159_p5 = scmp.lt.u32.totalorder %s4623_s22, %s4672_s10 }
 0x985   : > { %p3160_p6 = scmp.lt.u32.totalorder %s3158_s30, %s3154_s9  ;;  %p3162_p12 = scmp.lt.u32.totalorder %s3154_s9, %s4623_s22 }
 0x986   : > { %p3156_p4 = pnand %p3155_p3, %p4890_p0 }
 0x987   : > { %p3161_p10 = por %p3160_p6, %p3159_p5 }
 0x988   : > { %p3157_p9 = pneg %p3156_p4 }
 0x989   : > { %p3163_p7 = por %p3162_p12, %p3161_p10 }
 0x98b   : > { %p3164_p8 = pnand %p3163_p7, %p3157_p9 }
 0x98d   : > { %3167 = shalt.err (!%p3164_p8)
}
 0x98e   : > { %2903 = dma.vmem_to_hbm [thread:$0]  (%p4890_p0), %s2760_s6, 256, %s4623_s22, %s2745_s14  }
 0x98f PF: > { %p2920_p11 = scmp.ge.s32.totalorder %s3222_s18, 2  ;;  %s2771_s19 = sand.u32 1, %s3210_s15  }
 0x990   : > { %p4891_p13 = scmp.ne.s32.totalorder %s4752_s25, 0  ;;  %s2772_s27 = scalar_lea.sflag [#allocation4], %s2771_s19 }
 0x992   : > { %p2913_p1 = pnand %p2920_p11, %p4891_p13 }
 0x994   : > { %3205 = dma.done.wait (!%p2913_p1), %s2772_s27, 256  }
 0x995   : > { %3207 = vsyncadd (!%p2913_p1), %s2772_s27, 4294967040  ;;  %p23_p2 = scmp.ge.s32.totalorder %s3323_s20, 4   ;;  %s4892_s15 = smov %s3214_s16 }
 0x996   : > { %s4893_s16 = smov %s3218_s17  ;;  %s4894_s17 = smov %s3334_s23 }
 0x997   : > { %s4895_s18 = smov %s3323_s20  ;;  %25 = sbr.rel (!%p23_p2) target bundleno = 15 (0xf), region = 122 }
 0x99e   :  { %2777 = vsyncpa [#allocation4], 1 }
 0x99f   :  { %2779 = vsyncpa [#allocation4 + $0x1], 1 }
 0x9a0   :  { %2780 = vsyncpa [#allocation5], 1 }
 0x9a1   :  { %2782 = vsyncpa [#allocation5 + $0x1], 1 }
 0x9a2   :  { %2783 = vsyncpa [#allocation7], 1 }

</bundles_post_ra>
